<compile_context>
chip_gen: v6e
topology: v6e:2x2x1
jax: 0.10.0
libtpu: 0.0.40
codegen_flags: <defaults>
</compile_context>

<pallas_src>
import functools

import jax
import jax.numpy as jnp
import numpy as np
from jax.experimental import pallas as pl
from jax.experimental.pallas import tpu as pltpu


def _vmem_limit_bytes():
    try:
        cap = getattr(pltpu.get_tpu_info(), "vmem_capacity_bytes", None)
    except Exception:
        cap = None
    if cap is None:
        return 48 * 1024 * 1024  # safe on every generation (v7x physical = 64 MiB)
    return min(int(cap) * 3 // 4, 100 * 1024 * 1024)


_VMEM_LIMIT = _vmem_limit_bytes()


def _prefers_kc128():
    """v5-class chips have a 128-deep MXU contraction; prefer kc=128 there."""
    try:
        info = pltpu.get_tpu_info()
    except Exception:
        return False
    for attr in ("chip_version", "chip_name", "name"):
        v = getattr(info, attr, None)
        if v is not None and "5" in str(v):
            return True
    return False


_KC_PREF = 128 if _prefers_kc128() else 256


def _pick_kc(cin):
    if cin % _KC_PREF == 0:
        return _KC_PREF
    if cin % 128 == 0:
        return 128
    return cin


# --------------------------------------------------------------------------
# Kernel 1: 3x3 "same" conv + bias + PReLU (single shared alpha).
#
# The padded image (H+3 rows x (W+2) cols, extra junk row at the bottom) is
# flattened to a single row axis.  For tap (dy, dx) the needed lhs is the
# contiguous slice  x_flat[dy*(W+2)+dx : dy*(W+2)+dx + H*(W+2)]  of shape
# (H*(W+2), kc); the accumulator lives in the same "padded-width" layout and
# the 2 junk columns per row are dropped by the per-row epilogue stores.
#
# Grid = (N, K):  N images ("parallel"), K Cin tiles ("arbitrary").
#   x_ref   : (1, (H+3)*(W+2), kc) bf16
#   w_ref   : (3, 3, kc, Cout) bf16
#   b_ref   : (1, Cout) f32
#   a_ref   : (1,) f32 in SMEM            -- PReLU alpha
#   o_ref   : (1, H, W, Cout) bf16        -- resident across K
#   acc_ref : VMEM (H*(W+2), Cout) f32    -- only used when K > 1
# --------------------------------------------------------------------------
def _conv3x3_prelu_kernel(x_ref, w_ref, b_ref, a_ref, o_ref, acc_ref,
                          *, k_steps, H, W):
    P = W + 2
    M = H * P
    k = pl.program_id(1)

    partial = None
    for dy in range(3):
        for dx in range(3):
            off = dy * P + dx
            lhs = x_ref[0, off:off + M, :]                   # (M, kc) bf16
            rhs = w_ref[dy, dx, :, :]                        # (kc, Cout) bf16
            d = jnp.dot(lhs, rhs, preferred_element_type=jnp.float32)
            partial = d if partial is None else partial + d  # local f32 acc

    def _epilogue(acc):
        y = acc + b_ref[...]                                 # (M, Cout) f32
        alpha = a_ref[0]
        y = jnp.where(y >= 0.0, y, alpha * y)                # PReLU, shared alpha
        y = y.astype(o_ref.dtype)
        for h in range(H):                                   # drop the 2 junk cols
            o_ref[0, h, :, :] = y[h * P:h * P + W, :]

    if k_steps == 1:
        _epilogue(partial)
    else:
        @pl.when(k == 0)
        def _():
            acc_ref[...] = partial

        @pl.when(jnp.logical_and(k > 0, k < k_steps - 1))
        def _():
            acc_ref[...] = acc_ref[...] + partial

        @pl.when(k == k_steps - 1)
        def _():
            _epilogue(acc_ref[...] + partial)


def conv3x3_prelu(x, w, b, alpha):
    """x: (N,H,W,Cin) bf16; w: (3,3,Cin,Cout) bf16; b: (1,Cout) f32; alpha: (1,) f32."""
    N, H, W, Cin = x.shape
    Cout = w.shape[-1]
    kc = _pick_kc(Cin)
    K = Cin // kc
    P = W + 2
    R = (H + 3) * P                                          # padded rows, flattened

    # One padded copy (extra zero row at the bottom so the last tap's slice
    # stays in bounds); the flatten is free (row-major).
    xp = jnp.pad(x, ((0, 0), (1, 2), (1, 1), (0, 0)))        # (N, H+3, W+2, Cin)
    xp = xp.reshape(N, R, Cin)

    out = pl.pallas_call(
        functools.partial(_conv3x3_prelu_kernel, k_steps=K, H=H, W=W),
        out_shape=jax.ShapeDtypeStruct((N, H, W, Cout), jnp.bfloat16),
        grid=(N, K),
        in_specs=[
            pl.BlockSpec((1, R, kc), lambda n, k: (n, 0, k)),
            pl.BlockSpec((3, 3, kc, Cout), lambda n, k: (0, 0, k, 0)),
            pl.BlockSpec((1, Cout), lambda n, k: (0, 0)),
            pl.BlockSpec(memory_space=pltpu.MemorySpace.SMEM),
        ],
        out_specs=pl.BlockSpec((1, H, W, Cout), lambda n, k: (n, 0, 0, 0)),
        scratch_shapes=[pltpu.VMEM((H * P, Cout), jnp.float32)],
        compiler_params=pltpu.CompilerParams(
            dimension_semantics=("parallel", "arbitrary"),
            vmem_limit_bytes=_VMEM_LIMIT,
        ),
    )(xp, w, b, alpha)
    return out


# --------------------------------------------------------------------------
# Kernel 2: 2x2 max pool.  One image per grid step (whole-level tiles).
# --------------------------------------------------------------------------
def _maxpool_kernel(x_ref, o_ref):
    x = x_ref[...]                                   # (Ho, 2, Wo, 2, C)
    m = jnp.maximum(x[:, 0], x[:, 1])                # (Ho, Wo, 2, C)
    o_ref[...] = jnp.maximum(m[:, :, 0, :], m[:, :, 1, :])


def maxpool2x2(x):
    N, H, W, C = x.shape
    Ho, Wo = H // 2, W // 2
    xr = x.reshape(N * Ho, 2, Wo, 2, C)              # free reshape
    out = pl.pallas_call(
        _maxpool_kernel,
        out_shape=jax.ShapeDtypeStruct((N * Ho, Wo, C), x.dtype),
        grid=(N,),
        in_specs=[pl.BlockSpec((Ho, 2, Wo, 2, C), lambda n: (n, 0, 0, 0, 0))],
        out_specs=pl.BlockSpec((Ho, Wo, C), lambda n: (n, 0, 0)),
        compiler_params=pltpu.CompilerParams(
            dimension_semantics=("parallel",),
            vmem_limit_bytes=_VMEM_LIMIT,
        ),
    )(xr)
    return out.reshape(N, Ho, Wo, C)


# --------------------------------------------------------------------------
# Kernel 3: ConvTranspose2d(kernel=2, stride=2).  One matmul per image on
# (H*W, Cin); the out spec is (1, H, 2, W, 2*Cout) so the 2x2 pixel shuffle
# falls out of free reshapes (no transpose / extra HBM pass).
# --------------------------------------------------------------------------
def _conv_transpose_kernel(x_ref, w_ref, b_ref, o_ref, *, H, W):
    C4 = w_ref.shape[-1]
    C2 = C4 // 2                                     # 2*Cout  (dy split)
    lhs = x_ref[0]                                   # (H*W, Cin) bf16
    y = jnp.dot(lhs, w_ref[...], preferred_element_type=jnp.float32) + b_ref[...]
    y = y.astype(o_ref.dtype)                        # (H*W, 4*Cout)
    top = y[:, :C2]                                  # dy = 0 -> output row 2h
    bot = y[:, C2:]                                  # dy = 1 -> output row 2h+1
    for h in range(H):
        o_ref[0, h, 0, :, :] = top[h * W:(h + 1) * W, :]
        o_ref[0, h, 1, :, :] = bot[h * W:(h + 1) * W, :]


def conv_transpose2x2(x, w2, b4):
    """x: (N,H,W,Cin) bf16; w2: (Cin, 4*Cout) bf16 in (dy,dx,cout) column order;
    b4: (1, 4*Cout) f32.  Returns (N, 2H, 2W, Cout) bf16."""
    N, H, W, Cin = x.shape
    C4 = w2.shape[-1]
    Cout = C4 // 4
    C2 = 2 * Cout
    xr = x.reshape(N, H * W, Cin)                    # free reshape
    out = pl.pallas_call(
        functools.partial(_conv_transpose_kernel, H=H, W=W),
        out_shape=jax.ShapeDtypeStruct((N, H, 2, W, C2), jnp.bfloat16),
        grid=(N,),
        in_specs=[
            pl.BlockSpec((1, H * W, Cin), lambda n: (n, 0, 0)),
            pl.BlockSpec((Cin, C4), lambda n: (0, 0)),
            pl.BlockSpec((1, C4), lambda n: (0, 0)),
        ],
        out_specs=pl.BlockSpec((1, H, 2, W, C2), lambda n: (n, 0, 0, 0, 0)),
        compiler_params=pltpu.CompilerParams(
            dimension_semantics=("parallel",),
            vmem_limit_bytes=_VMEM_LIMIT,
        ),
    )(xr, w2, b4)
    # (N, H, 2, W, 2*Cout) -> (N, 2H, 2W, Cout): pure reshapes, no transpose.
    return out.reshape(N, 2 * H, 2 * W, Cout)


# --------------------------------------------------------------------------
# Kernel 4: 1x1 out conv (out_features == 1) + ReLU.  Input is presented as
# (C, H*W) so the channel reduce is a sublane reduction and the output is
# lane-dense (last dim H*W).
# --------------------------------------------------------------------------
def _outconv_relu_kernel(x_ref, w_ref, b_ref, o_ref):
    x = x_ref[0].astype(jnp.float32)                 # (C, HW)
    y = jnp.sum(x * w_ref[...], axis=0, keepdims=True) + b_ref[0]   # (1, HW)
    o_ref[0] = jnp.maximum(y, 0.0)


def outconv1x1_relu(x, w, b):
    # TODO(synk): out_features > 1 (no channel squeeze) not implemented.
    N, H, W, C = x.shape
    HW = H * W
    xt = jnp.transpose(x.reshape(N, HW, C), (0, 2, 1))       # (N, C, HW), tiny
    wv = w.reshape(C, 1).astype(jnp.float32)
    out = pl.pallas_call(
        _outconv_relu_kernel,
        out_shape=jax.ShapeDtypeStruct((N, 1, HW), jnp.float32),
        grid=(N,),
        in_specs=[
            pl.BlockSpec((1, C, HW), lambda n: (n, 0, 0)),
            pl.BlockSpec((C, 1), lambda n: (0, 0)),
            pl.BlockSpec(memory_space=pltpu.MemorySpace.SMEM),
        ],
        out_specs=pl.BlockSpec((1, 1, HW), lambda n: (n, 0, 0)),
        compiler_params=pltpu.CompilerParams(
            dimension_semantics=("parallel",),
            vmem_limit_bytes=_VMEM_LIMIT,
        ),
    )(xt, wv, b)
    return out.reshape(N, H, W)


# --------------------------------------------------------------------------
# Parameter init (deterministic, He-style scaling).  use_batchnorm=False.
# --------------------------------------------------------------------------
def _conv_params(key, cin, cout):
    w = jax.random.normal(key, (3, 3, cin, cout), jnp.float32) * np.sqrt(2.0 / (cin * 9))
    return {
        "w": w.astype(jnp.bfloat16),
        "b": jnp.zeros((1, cout), jnp.float32),
        "a": jnp.full((1,), 0.25, jnp.float32),  # nn.PReLU(num_parameters=1) default
    }


def _block_params(key, cin, cout):
    k1, k2 = jax.random.split(key)
    return {"c1": _conv_params(k1, cin, cout), "c2": _conv_params(k2, cout, cout)}


def _upconv_params(key, cin, cout):
    w = jax.random.normal(key, (cin, cout, 2, 2), jnp.float32) * np.sqrt(2.0 / (cin * 4))
    w2 = jnp.transpose(w, (0, 2, 3, 1)).reshape(cin, 4 * cout)  # (cin, dy*dx*cout)
    b = jnp.zeros((cout,), jnp.float32)
    return {"w2": w2.astype(jnp.bfloat16),
            "b4": jnp.tile(b, 4).reshape(1, 4 * cout)}


def init_unet_params(key, in_features, out_features):
    assert out_features == 1, "only out_features == 1 supported (see outconv1x1_relu)"
    keys = jax.random.split(key, 14)
    return {
        "enc1": _block_params(keys[0], in_features, 64),
        "enc2": _block_params(keys[1], 64, 128),
        "enc3": _block_params(keys[2], 128, 256),
        "enc4": _block_params(keys[3], 256, 512),
        "center": _block_params(keys[4], 512, 1024),
        "up1": _upconv_params(keys[5], 1024, 512),
        "dec1": _block_params(keys[6], 1024, 512),
        "up2": _upconv_params(keys[7], 512, 256),
        "dec2": _block_params(keys[8], 512, 256),
        "up3": _upconv_params(keys[9], 256, 128),
        "dec3": _block_params(keys[10], 256, 128),
        "up4": _upconv_params(keys[11], 128, 64),
        "dec4": _block_params(keys[12], 128, 64),
        "out": {
            "w": jax.random.normal(keys[13], (1, 64), jnp.float32) * np.sqrt(2.0 / 64),
            "b": jnp.zeros((1,), jnp.float32),
        },
    }


# --------------------------------------------------------------------------
# Forward pass
# --------------------------------------------------------------------------
def _double_conv(x, p):
    x = conv3x3_prelu(x, p["c1"]["w"], p["c1"]["b"], p["c1"]["a"])
    x = conv3x3_prelu(x, p["c2"]["w"], p["c2"]["b"], p["c2"]["a"])
    return x


def unet_forward(x_nchw, params):
    x = jnp.transpose(x_nchw, (0, 2, 3, 1)).astype(jnp.bfloat16)  # NCHW -> NHWC, bf16

    x1 = _double_conv(x, params["enc1"]); p1 = maxpool2x2(x1)
    x2 = _double_conv(p1, params["enc2"]); p2 = maxpool2x2(x2)
    x3 = _double_conv(p2, params["enc3"]); p3 = maxpool2x2(x3)
    x4 = _double_conv(p3, params["enc4"]); p4 = maxpool2x2(x4)
    center = _double_conv(p4, params["center"])

    up1 = conv_transpose2x2(center, params["up1"]["w2"], params["up1"]["b4"])
    d1 = _double_conv(jnp.concatenate([up1, x4], axis=-1), params["dec1"])
    up2 = conv_transpose2x2(d1, params["up2"]["w2"], params["up2"]["b4"])
    d2 = _double_conv(jnp.concatenate([up2, x3], axis=-1), params["dec2"])
    up3 = conv_transpose2x2(d2, params["up3"]["w2"], params["up3"]["b4"])
    d3 = _double_conv(jnp.concatenate([up3, x2], axis=-1), params["dec3"])
    up4 = conv_transpose2x2(d3, params["up4"]["w2"], params["up4"]["b4"])
    d4 = _double_conv(jnp.concatenate([up4, x1], axis=-1), params["dec4"])

    # torch: relu(outconv(d4)).squeeze(1)  -> (N, H, W)
    return outconv1x1_relu(d4, params["out"]["w"], params["out"]["b"])


# --------------------------------------------------------------------------
# Small numerical self-checks against pure-JAX references.
# --------------------------------------------------------------------------
def _check_conv3x3():
    kx, kw = jax.random.split(jax.random.PRNGKey(1))
    N, H, W, Cin, Cout = 2, 16, 16, 4, 64
    xb = (jax.random.normal(kx, (N, H, W, Cin), jnp.float32)).astype(jnp.bfloat16)
    wb = (jax.random.normal(kw, (3, 3, Cin, Cout), jnp.float32) * 0.2).astype(jnp.bfloat16)
    b = jnp.linspace(-0.1, 0.1, Cout, dtype=jnp.float32).reshape(1, Cout)
    alpha = jnp.full((1,), 0.25, jnp.float32)
    got = conv3x3_prelu(xb, wb, b, alpha).astype(jnp.float32)
    ref = jax.lax.conv_general_dilated(
        xb.astype(jnp.float32), wb.astype(jnp.float32), (1, 1), "SAME",
        dimension_numbers=("NHWC", "HWIO", "NHWC")) + b.reshape(1, 1, 1, Cout)
    ref = jnp.where(ref >= 0, ref, 0.25 * ref)
    err = float(jnp.max(jnp.abs(got - ref)))
    assert err < 0.06, f"conv3x3 mismatch: {err}"


def _check_conv_transpose():
    kx, kw = jax.random.split(jax.random.PRNGKey(2))
    N, H, W, Cin, Cout = 2, 4, 4, 128, 64
    xb = (jax.random.normal(kx, (N, H, W, Cin), jnp.float32)).astype(jnp.bfloat16)
    wt = (jax.random.normal(kw, (Cin, Cout, 2, 2), jnp.float32) * 0.05).astype(jnp.bfloat16)
    b = jnp.linspace(-0.1, 0.1, Cout, dtype=jnp.float32)
    w2 = jnp.transpose(wt, (0, 2, 3, 1)).reshape(Cin, 4 * Cout)
    b4 = jnp.tile(b, 4).reshape(1, 4 * Cout)
    got = conv_transpose2x2(xb, w2, b4).astype(jnp.float32)
    ref = jnp.einsum("nhwi,ioab->nhawbo",
                     xb.astype(jnp.float32), wt.astype(jnp.float32))
    ref = ref.reshape(N, 2 * H, 2 * W, Cout) + b
    err = float(jnp.max(jnp.abs(got - ref)))
    assert err < 0.06, f"conv_transpose mismatch: {err}"


if __name__ == "__main__":
    _check_conv3x3()
    _check_conv_transpose()

    IN_FEATURES = 4
    OUT_FEATURES = 1
    N, H, W = 2, 16, 16

    key = jax.random.PRNGKey(0)
    k_x, k_p = jax.random.split(key)
    x = jax.random.normal(k_x, (N, IN_FEATURES, H, W), jnp.float32)  # NCHW like PyTorch
    params = init_unet_params(k_p, IN_FEATURES, OUT_FEATURES)

    fwd = jax.jit(unet_forward)
    out = jax.block_until_ready(fwd(x, params))

    assert out.shape == (N, H, W), out.shape
    assert bool(jnp.all(jnp.isfinite(out)))
    assert bool(jnp.all(out >= 0.0))  # final ReLU
    print("KERNEL_OK")
</pallas_src>

<mosaic_0001>
module attributes {stable_mosaic.version = 11 : i64} {
  func.func @_conv3x3_prelu_kernel(%arg0: i32, %arg1: i32, %arg2: memref<1x342x4xbf16, #tpu.memory_space<vmem>>, %arg3: memref<3x3x4x64xbf16, #tpu.memory_space<vmem>>, %arg4: memref<1x64xf32, #tpu.memory_space<vmem>>, %arg5: memref<1xf32, #tpu.memory_space<smem>>, %arg6: memref<1x16x16x64xbf16, #tpu.memory_space<vmem>>, %arg7: memref<288x64xf32, #tpu.memory_space<vmem>>) attributes {dimension_semantics = [#tpu.dimension_semantics<parallel>, #tpu.dimension_semantics<arbitrary>], iteration_bounds = array<i64: 2, 1>, scalar_prefetch = 0 : i64, scratch_operands = 1 : i64, tpu.core_type = #tpu.core_type<tc>, window_params = [{transform_indices = @transform_0, window_bounds = array<i64: 1, 342, 4>}, {transform_indices = @transform_1, window_bounds = array<i64: 3, 3, 4, 64>}, {pipeline_mode = #tpu.pipeline_mode<synchronous>, transform_indices = @transform_2, window_bounds = array<i64: 1, 64>}, {transform_indices = @transform_3, window_bounds = array<i64: 1>}, {transform_indices = @transform_4, window_bounds = array<i64: 1, 16, 16, 64>}]} {
    %c0 = arith.constant 0 : index
    %c0_0 = arith.constant 0 : index
    %c0_1 = arith.constant 0 : index
    %0 = vector.load %arg2[%c0, %c0_0, %c0_1] : memref<1x342x4xbf16, #tpu.memory_space<vmem>>, vector<1x288x4xbf16>
    %1 = vector.shape_cast %0 : vector<1x288x4xbf16> to vector<288x4xbf16>
    %c0_2 = arith.constant 0 : index
    %c0_3 = arith.constant 0 : index
    %c0_4 = arith.constant 0 : index
    %c0_5 = arith.constant 0 : index
    %2 = vector.load %arg3[%c0_2, %c0_3, %c0_4, %c0_5] : memref<3x3x4x64xbf16, #tpu.memory_space<vmem>>, vector<1x1x4x64xbf16>
    %3 = vector.shape_cast %2 : vector<1x1x4x64xbf16> to vector<4x64xbf16>
    %cst = arith.constant dense<0.000000e+00> : vector<288x64xf32>
    %4 = tpu.matmul %1, %3, %cst {dimension_numbers = #tpu.dot_dimension_numbers<[1], [0], [0], [1], [0, 0, 1, 1], [], []>} : vector<288x4xbf16>, vector<4x64xbf16>, vector<288x64xf32> -> vector<288x64xf32>
    %c0_6 = arith.constant 0 : index
    %c1 = arith.constant 1 : index
    %c0_7 = arith.constant 0 : index
    %5 = vector.load %arg2[%c0_6, %c1, %c0_7] : memref<1x342x4xbf16, #tpu.memory_space<vmem>>, vector<1x288x4xbf16>
    %6 = vector.shape_cast %5 : vector<1x288x4xbf16> to vector<288x4xbf16>
    %c0_8 = arith.constant 0 : index
    %c1_9 = arith.constant 1 : index
    %c0_10 = arith.constant 0 : index
    %c0_11 = arith.constant 0 : index
    %7 = vector.load %arg3[%c0_8, %c1_9, %c0_10, %c0_11] : memref<3x3x4x64xbf16, #tpu.memory_space<vmem>>, vector<1x1x4x64xbf16>
    %8 = vector.shape_cast %7 : vector<1x1x4x64xbf16> to vector<4x64xbf16>
    %cst_12 = arith.constant dense<0.000000e+00> : vector<288x64xf32>
    %9 = tpu.matmul %6, %8, %cst_12 {dimension_numbers = #tpu.dot_dimension_numbers<[1], [0], [0], [1], [0, 0, 1, 1], [], []>} : vector<288x4xbf16>, vector<4x64xbf16>, vector<288x64xf32> -> vector<288x64xf32>
    %10 = arith.addf %4, %9 : vector<288x64xf32>
    %c0_13 = arith.constant 0 : index
    %c2 = arith.constant 2 : index
    %c0_14 = arith.constant 0 : index
    %11 = vector.load %arg2[%c0_13, %c2, %c0_14] : memref<1x342x4xbf16, #tpu.memory_space<vmem>>, vector<1x288x4xbf16>
    %12 = vector.shape_cast %11 : vector<1x288x4xbf16> to vector<288x4xbf16>
    %c0_15 = arith.constant 0 : index
    %c2_16 = arith.constant 2 : index
    %c0_17 = arith.constant 0 : index
    %c0_18 = arith.constant 0 : index
    %13 = vector.load %arg3[%c0_15, %c2_16, %c0_17, %c0_18] : memref<3x3x4x64xbf16, #tpu.memory_space<vmem>>, vector<1x1x4x64xbf16>
    %14 = vector.shape_cast %13 : vector<1x1x4x64xbf16> to vector<4x64xbf16>
    %cst_19 = arith.constant dense<0.000000e+00> : vector<288x64xf32>
    %15 = tpu.matmul %12, %14, %cst_19 {dimension_numbers = #tpu.dot_dimension_numbers<[1], [0], [0], [1], [0, 0, 1, 1], [], []>} : vector<288x4xbf16>, vector<4x64xbf16>, vector<288x64xf32> -> vector<288x64xf32>
    %16 = arith.addf %10, %15 : vector<288x64xf32>
    %c0_20 = arith.constant 0 : index
    %c18 = arith.constant 18 : index
    %c0_21 = arith.constant 0 : index
    %17 = vector.load %arg2[%c0_20, %c18, %c0_21] : memref<1x342x4xbf16, #tpu.memory_space<vmem>>, vector<1x288x4xbf16>
    %18 = vector.shape_cast %17 : vector<1x288x4xbf16> to vector<288x4xbf16>
    %c1_22 = arith.constant 1 : index
    %c0_23 = arith.constant 0 : index
    %c0_24 = arith.constant 0 : index
    %c0_25 = arith.constant 0 : index
    %19 = vector.load %arg3[%c1_22, %c0_23, %c0_24, %c0_25] : memref<3x3x4x64xbf16, #tpu.memory_space<vmem>>, vector<1x1x4x64xbf16>
    %20 = vector.shape_cast %19 : vector<1x1x4x64xbf16> to vector<4x64xbf16>
    %cst_26 = arith.constant dense<0.000000e+00> : vector<288x64xf32>
    %21 = tpu.matmul %18, %20, %cst_26 {dimension_numbers = #tpu.dot_dimension_numbers<[1], [0], [0], [1], [0, 0, 1, 1], [], []>} : vector<288x4xbf16>, vector<4x64xbf16>, vector<288x64xf32> -> vector<288x64xf32>
    %22 = arith.addf %16, %21 : vector<288x64xf32>
    %c0_27 = arith.constant 0 : index
    %c19 = arith.constant 19 : index
    %c0_28 = arith.constant 0 : index
    %23 = vector.load %arg2[%c0_27, %c19, %c0_28] : memref<1x342x4xbf16, #tpu.memory_space<vmem>>, vector<1x288x4xbf16>
    %24 = vector.shape_cast %23 : vector<1x288x4xbf16> to vector<288x4xbf16>
    %c1_29 = arith.constant 1 : index
    %c1_30 = arith.constant 1 : index
    %c0_31 = arith.constant 0 : index
    %c0_32 = arith.constant 0 : index
    %25 = vector.load %arg3[%c1_29, %c1_30, %c0_31, %c0_32] : memref<3x3x4x64xbf16, #tpu.memory_space<vmem>>, vector<1x1x4x64xbf16>
    %26 = vector.shape_cast %25 : vector<1x1x4x64xbf16> to vector<4x64xbf16>
    %cst_33 = arith.constant dense<0.000000e+00> : vector<288x64xf32>
    %27 = tpu.matmul %24, %26, %cst_33 {dimension_numbers = #tpu.dot_dimension_numbers<[1], [0], [0], [1], [0, 0, 1, 1], [], []>} : vector<288x4xbf16>, vector<4x64xbf16>, vector<288x64xf32> -> vector<288x64xf32>
    %28 = arith.addf %22, %27 : vector<288x64xf32>
    %c0_34 = arith.constant 0 : index
    %c20 = arith.constant 20 : index
    %c0_35 = arith.constant 0 : index
    %29 = vector.load %arg2[%c0_34, %c20, %c0_35] : memref<1x342x4xbf16, #tpu.memory_space<vmem>>, vector<1x288x4xbf16>
    %30 = vector.shape_cast %29 : vector<1x288x4xbf16> to vector<288x4xbf16>
    %c1_36 = arith.constant 1 : index
    %c2_37 = arith.constant 2 : index
    %c0_38 = arith.constant 0 : index
    %c0_39 = arith.constant 0 : index
    %31 = vector.load %arg3[%c1_36, %c2_37, %c0_38, %c0_39] : memref<3x3x4x64xbf16, #tpu.memory_space<vmem>>, vector<1x1x4x64xbf16>
    %32 = vector.shape_cast %31 : vector<1x1x4x64xbf16> to vector<4x64xbf16>
    %cst_40 = arith.constant dense<0.000000e+00> : vector<288x64xf32>
    %33 = tpu.matmul %30, %32, %cst_40 {dimension_numbers = #tpu.dot_dimension_numbers<[1], [0], [0], [1], [0, 0, 1, 1], [], []>} : vector<288x4xbf16>, vector<4x64xbf16>, vector<288x64xf32> -> vector<288x64xf32>
    %34 = arith.addf %28, %33 : vector<288x64xf32>
    %c0_41 = arith.constant 0 : index
    %c36 = arith.constant 36 : index
    %c0_42 = arith.constant 0 : index
    %35 = vector.load %arg2[%c0_41, %c36, %c0_42] : memref<1x342x4xbf16, #tpu.memory_space<vmem>>, vector<1x288x4xbf16>
    %36 = vector.shape_cast %35 : vector<1x288x4xbf16> to vector<288x4xbf16>
    %c2_43 = arith.constant 2 : index
    %c0_44 = arith.constant 0 : index
    %c0_45 = arith.constant 0 : index
    %c0_46 = arith.constant 0 : index
    %37 = vector.load %arg3[%c2_43, %c0_44, %c0_45, %c0_46] : memref<3x3x4x64xbf16, #tpu.memory_space<vmem>>, vector<1x1x4x64xbf16>
    %38 = vector.shape_cast %37 : vector<1x1x4x64xbf16> to vector<4x64xbf16>
    %cst_47 = arith.constant dense<0.000000e+00> : vector<288x64xf32>
    %39 = tpu.matmul %36, %38, %cst_47 {dimension_numbers = #tpu.dot_dimension_numbers<[1], [0], [0], [1], [0, 0, 1, 1], [], []>} : vector<288x4xbf16>, vector<4x64xbf16>, vector<288x64xf32> -> vector<288x64xf32>
    %40 = arith.addf %34, %39 : vector<288x64xf32>
    %c0_48 = arith.constant 0 : index
    %c37 = arith.constant 37 : index
    %c0_49 = arith.constant 0 : index
    %41 = vector.load %arg2[%c0_48, %c37, %c0_49] : memref<1x342x4xbf16, #tpu.memory_space<vmem>>, vector<1x288x4xbf16>
    %42 = vector.shape_cast %41 : vector<1x288x4xbf16> to vector<288x4xbf16>
    %c2_50 = arith.constant 2 : index
    %c1_51 = arith.constant 1 : index
    %c0_52 = arith.constant 0 : index
    %c0_53 = arith.constant 0 : index
    %43 = vector.load %arg3[%c2_50, %c1_51, %c0_52, %c0_53] : memref<3x3x4x64xbf16, #tpu.memory_space<vmem>>, vector<1x1x4x64xbf16>
    %44 = vector.shape_cast %43 : vector<1x1x4x64xbf16> to vector<4x64xbf16>
    %cst_54 = arith.constant dense<0.000000e+00> : vector<288x64xf32>
    %45 = tpu.matmul %42, %44, %cst_54 {dimension_numbers = #tpu.dot_dimension_numbers<[1], [0], [0], [1], [0, 0, 1, 1], [], []>} : vector<288x4xbf16>, vector<4x64xbf16>, vector<288x64xf32> -> vector<288x64xf32>
    %46 = arith.addf %40, %45 : vector<288x64xf32>
    %c0_55 = arith.constant 0 : index
    %c38 = arith.constant 38 : index
    %c0_56 = arith.constant 0 : index
    %47 = vector.load %arg2[%c0_55, %c38, %c0_56] : memref<1x342x4xbf16, #tpu.memory_space<vmem>>, vector<1x288x4xbf16>
    %48 = vector.shape_cast %47 : vector<1x288x4xbf16> to vector<288x4xbf16>
    %c2_57 = arith.constant 2 : index
    %c2_58 = arith.constant 2 : index
    %c0_59 = arith.constant 0 : index
    %c0_60 = arith.constant 0 : index
    %49 = vector.load %arg3[%c2_57, %c2_58, %c0_59, %c0_60] : memref<3x3x4x64xbf16, #tpu.memory_space<vmem>>, vector<1x1x4x64xbf16>
    %50 = vector.shape_cast %49 : vector<1x1x4x64xbf16> to vector<4x64xbf16>
    %cst_61 = arith.constant dense<0.000000e+00> : vector<288x64xf32>
    %51 = tpu.matmul %48, %50, %cst_61 {dimension_numbers = #tpu.dot_dimension_numbers<[1], [0], [0], [1], [0, 0, 1, 1], [], []>} : vector<288x4xbf16>, vector<4x64xbf16>, vector<288x64xf32> -> vector<288x64xf32>
    %52 = arith.addf %46, %51 : vector<288x64xf32>
    %c0_62 = arith.constant 0 : index
    %c0_63 = arith.constant 0 : index
    %53 = vector.load %arg4[%c0_62, %c0_63] : memref<1x64xf32, #tpu.memory_space<vmem>>, vector<1x64xf32>
    %54 = vector.broadcast %53 : vector<1x64xf32> to vector<288x64xf32>
    %55 = arith.addf %52, %54 : vector<288x64xf32>
    %c0_64 = arith.constant 0 : index
    %56 = memref.load %arg5[%c0_64] : memref<1xf32, #tpu.memory_space<smem>>
    %cst_65 = arith.constant 0.000000e+00 : f32
    %57 = vector.broadcast %cst_65 : f32 to vector<288x64xf32>
    %58 = arith.cmpf oge, %55, %57 : vector<288x64xf32>
    %59 = vector.broadcast %56 : f32 to vector<288x64xf32>
    %60 = arith.mulf %59, %55 : vector<288x64xf32>
    %61 = arith.select %58, %55, %60 : vector<288x64xi1>, vector<288x64xf32>
    %62 = arith.truncf %61 : vector<288x64xf32> to vector<288x64xbf16>
    %63 = vector.extract_strided_slice %62 {offsets = [0, 0], sizes = [16, 64], strides = [1, 1]} : vector<288x64xbf16> to vector<16x64xbf16>
    %c0_66 = arith.constant 0 : index
    %c0_67 = arith.constant 0 : index
    %c0_68 = arith.constant 0 : index
    %c0_69 = arith.constant 0 : index
    %64 = vector.load %arg6[%c0_66, %c0_67, %c0_68, %c0_69] : memref<1x16x16x64xbf16, #tpu.memory_space<vmem>>, vector<1x1x16x64xbf16>
    %65 = vector.shape_cast %64 : vector<1x1x16x64xbf16> to vector<16x64xbf16>
    %66 = vector.shape_cast %63 : vector<16x64xbf16> to vector<1x1x16x64xbf16>
    tpu.vector_store %arg6[%c0_66, %c0_67, %c0_68, %c0_69], %66 {strides = array<i32>} : memref<1x16x16x64xbf16, #tpu.memory_space<vmem>>, vector<1x1x16x64xbf16>,
    %67 = vector.extract_strided_slice %62 {offsets = [18, 0], sizes = [16, 64], strides = [1, 1]} : vector<288x64xbf16> to vector<16x64xbf16>
    %c0_70 = arith.constant 0 : index
    %c1_71 = arith.constant 1 : index
    %c0_72 = arith.constant 0 : index
    %c0_73 = arith.constant 0 : index
    %68 = vector.load %arg6[%c0_70, %c1_71, %c0_72, %c0_73] : memref<1x16x16x64xbf16, #tpu.memory_space<vmem>>, vector<1x1x16x64xbf16>
    %69 = vector.shape_cast %68 : vector<1x1x16x64xbf16> to vector<16x64xbf16>
    %70 = vector.shape_cast %67 : vector<16x64xbf16> to vector<1x1x16x64xbf16>
    tpu.vector_store %arg6[%c0_70, %c1_71, %c0_72, %c0_73], %70 {strides = array<i32>} : memref<1x16x16x64xbf16, #tpu.memory_space<vmem>>, vector<1x1x16x64xbf16>,
    %71 = vector.extract_strided_slice %62 {offsets = [36, 0], sizes = [16, 64], strides = [1, 1]} : vector<288x64xbf16> to vector<16x64xbf16>
    %c0_74 = arith.constant 0 : index
    %c2_75 = arith.constant 2 : index
    %c0_76 = arith.constant 0 : index
    %c0_77 = arith.constant 0 : index
    %72 = vector.load %arg6[%c0_74, %c2_75, %c0_76, %c0_77] : memref<1x16x16x64xbf16, #tpu.memory_space<vmem>>, vector<1x1x16x64xbf16>
    %73 = vector.shape_cast %72 : vector<1x1x16x64xbf16> to vector<16x64xbf16>
    %74 = vector.shape_cast %71 : vector<16x64xbf16> to vector<1x1x16x64xbf16>
    tpu.vector_store %arg6[%c0_74, %c2_75, %c0_76, %c0_77], %74 {strides = array<i32>} : memref<1x16x16x64xbf16, #tpu.memory_space<vmem>>, vector<1x1x16x64xbf16>,
    %75 = vector.extract_strided_slice %62 {offsets = [54, 0], sizes = [16, 64], strides = [1, 1]} : vector<288x64xbf16> to vector<16x64xbf16>
    %c0_78 = arith.constant 0 : index
    %c3 = arith.constant 3 : index
    %c0_79 = arith.constant 0 : index
    %c0_80 = arith.constant 0 : index
    %76 = vector.load %arg6[%c0_78, %c3, %c0_79, %c0_80] : memref<1x16x16x64xbf16, #tpu.memory_space<vmem>>, vector<1x1x16x64xbf16>
    %77 = vector.shape_cast %76 : vector<1x1x16x64xbf16> to vector<16x64xbf16>
    %78 = vector.shape_cast %75 : vector<16x64xbf16> to vector<1x1x16x64xbf16>
    tpu.vector_store %arg6[%c0_78, %c3, %c0_79, %c0_80], %78 {strides = array<i32>} : memref<1x16x16x64xbf16, #tpu.memory_space<vmem>>, vector<1x1x16x64xbf16>,
    %79 = vector.extract_strided_slice %62 {offsets = [72, 0], sizes = [16, 64], strides = [1, 1]} : vector<288x64xbf16> to vector<16x64xbf16>
    %c0_81 = arith.constant 0 : index
    %c4 = arith.constant 4 : index
    %c0_82 = arith.constant 0 : index
    %c0_83 = arith.constant 0 : index
    %80 = vector.load %arg6[%c0_81, %c4, %c0_82, %c0_83] : memref<1x16x16x64xbf16, #tpu.memory_space<vmem>>, vector<1x1x16x64xbf16>
    %81 = vector.shape_cast %80 : vector<1x1x16x64xbf16> to vector<16x64xbf16>
    %82 = vector.shape_cast %79 : vector<16x64xbf16> to vector<1x1x16x64xbf16>
    tpu.vector_store %arg6[%c0_81, %c4, %c0_82, %c0_83], %82 {strides = array<i32>} : memref<1x16x16x64xbf16, #tpu.memory_space<vmem>>, vector<1x1x16x64xbf16>,
    %83 = vector.extract_strided_slice %62 {offsets = [90, 0], sizes = [16, 64], strides = [1, 1]} : vector<288x64xbf16> to vector<16x64xbf16>
    %c0_84 = arith.constant 0 : index
    %c5 = arith.constant 5 : index
    %c0_85 = arith.constant 0 : index
    %c0_86 = arith.constant 0 : index
    %84 = vector.load %arg6[%c0_84, %c5, %c0_85, %c0_86] : memref<1x16x16x64xbf16, #tpu.memory_space<vmem>>, vector<1x1x16x64xbf16>
    %85 = vector.shape_cast %84 : vector<1x1x16x64xbf16> to vector<16x64xbf16>
    %86 = vector.shape_cast %83 : vector<16x64xbf16> to vector<1x1x16x64xbf16>
    tpu.vector_store %arg6[%c0_84, %c5, %c0_85, %c0_86], %86 {strides = array<i32>} : memref<1x16x16x64xbf16, #tpu.memory_space<vmem>>, vector<1x1x16x64xbf16>,
    %87 = vector.extract_strided_slice %62 {offsets = [108, 0], sizes = [16, 64], strides = [1, 1]} : vector<288x64xbf16> to vector<16x64xbf16>
    %c0_87 = arith.constant 0 : index
    %c6 = arith.constant 6 : index
    %c0_88 = arith.constant 0 : index
    %c0_89 = arith.constant 0 : index
    %88 = vector.load %arg6[%c0_87, %c6, %c0_88, %c0_89] : memref<1x16x16x64xbf16, #tpu.memory_space<vmem>>, vector<1x1x16x64xbf16>
    %89 = vector.shape_cast %88 : vector<1x1x16x64xbf16> to vector<16x64xbf16>
    %90 = vector.shape_cast %87 : vector<16x64xbf16> to vector<1x1x16x64xbf16>
    tpu.vector_store %arg6[%c0_87, %c6, %c0_88, %c0_89], %90 {strides = array<i32>} : memref<1x16x16x64xbf16, #tpu.memory_space<vmem>>, vector<1x1x16x64xbf16>,
    %91 = vector.extract_strided_slice %62 {offsets = [126, 0], sizes = [16, 64], strides = [1, 1]} : vector<288x64xbf16> to vector<16x64xbf16>
    %c0_90 = arith.constant 0 : index
    %c7 = arith.constant 7 : index
    %c0_91 = arith.constant 0 : index
    %c0_92 = arith.constant 0 : index
    %92 = vector.load %arg6[%c0_90, %c7, %c0_91, %c0_92] : memref<1x16x16x64xbf16, #tpu.memory_space<vmem>>, vector<1x1x16x64xbf16>
    %93 = vector.shape_cast %92 : vector<1x1x16x64xbf16> to vector<16x64xbf16>
    %94 = vector.shape_cast %91 : vector<16x64xbf16> to vector<1x1x16x64xbf16>
    tpu.vector_store %arg6[%c0_90, %c7, %c0_91, %c0_92], %94 {strides = array<i32>} : memref<1x16x16x64xbf16, #tpu.memory_space<vmem>>, vector<1x1x16x64xbf16>,
    %95 = vector.extract_strided_slice %62 {offsets = [144, 0], sizes = [16, 64], strides = [1, 1]} : vector<288x64xbf16> to vector<16x64xbf16>
    %c0_93 = arith.constant 0 : index
    %c8 = arith.constant 8 : index
    %c0_94 = arith.constant 0 : index
    %c0_95 = arith.constant 0 : index
    %96 = vector.load %arg6[%c0_93, %c8, %c0_94, %c0_95] : memref<1x16x16x64xbf16, #tpu.memory_space<vmem>>, vector<1x1x16x64xbf16>
    %97 = vector.shape_cast %96 : vector<1x1x16x64xbf16> to vector<16x64xbf16>
    %98 = vector.shape_cast %95 : vector<16x64xbf16> to vector<1x1x16x64xbf16>
    tpu.vector_store %arg6[%c0_93, %c8, %c0_94, %c0_95], %98 {strides = array<i32>} : memref<1x16x16x64xbf16, #tpu.memory_space<vmem>>, vector<1x1x16x64xbf16>,
    %99 = vector.extract_strided_slice %62 {offsets = [162, 0], sizes = [16, 64], strides = [1, 1]} : vector<288x64xbf16> to vector<16x64xbf16>
    %c0_96 = arith.constant 0 : index
    %c9 = arith.constant 9 : index
    %c0_97 = arith.constant 0 : index
    %c0_98 = arith.constant 0 : index
    %100 = vector.load %arg6[%c0_96, %c9, %c0_97, %c0_98] : memref<1x16x16x64xbf16, #tpu.memory_space<vmem>>, vector<1x1x16x64xbf16>
    %101 = vector.shape_cast %100 : vector<1x1x16x64xbf16> to vector<16x64xbf16>
    %102 = vector.shape_cast %99 : vector<16x64xbf16> to vector<1x1x16x64xbf16>
    tpu.vector_store %arg6[%c0_96, %c9, %c0_97, %c0_98], %102 {strides = array<i32>} : memref<1x16x16x64xbf16, #tpu.memory_space<vmem>>, vector<1x1x16x64xbf16>,
    %103 = vector.extract_strided_slice %62 {offsets = [180, 0], sizes = [16, 64], strides = [1, 1]} : vector<288x64xbf16> to vector<16x64xbf16>
    %c0_99 = arith.constant 0 : index
    %c10 = arith.constant 10 : index
    %c0_100 = arith.constant 0 : index
    %c0_101 = arith.constant 0 : index
    %104 = vector.load %arg6[%c0_99, %c10, %c0_100, %c0_101] : memref<1x16x16x64xbf16, #tpu.memory_space<vmem>>, vector<1x1x16x64xbf16>
    %105 = vector.shape_cast %104 : vector<1x1x16x64xbf16> to vector<16x64xbf16>
    %106 = vector.shape_cast %103 : vector<16x64xbf16> to vector<1x1x16x64xbf16>
    tpu.vector_store %arg6[%c0_99, %c10, %c0_100, %c0_101], %106 {strides = array<i32>} : memref<1x16x16x64xbf16, #tpu.memory_space<vmem>>, vector<1x1x16x64xbf16>,
    %107 = vector.extract_strided_slice %62 {offsets = [198, 0], sizes = [16, 64], strides = [1, 1]} : vector<288x64xbf16> to vector<16x64xbf16>
    %c0_102 = arith.constant 0 : index
    %c11 = arith.constant 11 : index
    %c0_103 = arith.constant 0 : index
    %c0_104 = arith.constant 0 : index
    %108 = vector.load %arg6[%c0_102, %c11, %c0_103, %c0_104] : memref<1x16x16x64xbf16, #tpu.memory_space<vmem>>, vector<1x1x16x64xbf16>
    %109 = vector.shape_cast %108 : vector<1x1x16x64xbf16> to vector<16x64xbf16>
    %110 = vector.shape_cast %107 : vector<16x64xbf16> to vector<1x1x16x64xbf16>
    tpu.vector_store %arg6[%c0_102, %c11, %c0_103, %c0_104], %110 {strides = array<i32>} : memref<1x16x16x64xbf16, #tpu.memory_space<vmem>>, vector<1x1x16x64xbf16>,
    %111 = vector.extract_strided_slice %62 {offsets = [216, 0], sizes = [16, 64], strides = [1, 1]} : vector<288x64xbf16> to vector<16x64xbf16>
    %c0_105 = arith.constant 0 : index
    %c12 = arith.constant 12 : index
    %c0_106 = arith.constant 0 : index
    %c0_107 = arith.constant 0 : index
    %112 = vector.load %arg6[%c0_105, %c12, %c0_106, %c0_107] : memref<1x16x16x64xbf16, #tpu.memory_space<vmem>>, vector<1x1x16x64xbf16>
    %113 = vector.shape_cast %112 : vector<1x1x16x64xbf16> to vector<16x64xbf16>
    %114 = vector.shape_cast %111 : vector<16x64xbf16> to vector<1x1x16x64xbf16>
    tpu.vector_store %arg6[%c0_105, %c12, %c0_106, %c0_107], %114 {strides = array<i32>} : memref<1x16x16x64xbf16, #tpu.memory_space<vmem>>, vector<1x1x16x64xbf16>,
    %115 = vector.extract_strided_slice %62 {offsets = [234, 0], sizes = [16, 64], strides = [1, 1]} : vector<288x64xbf16> to vector<16x64xbf16>
    %c0_108 = arith.constant 0 : index
    %c13 = arith.constant 13 : index
    %c0_109 = arith.constant 0 : index
    %c0_110 = arith.constant 0 : index
    %116 = vector.load %arg6[%c0_108, %c13, %c0_109, %c0_110] : memref<1x16x16x64xbf16, #tpu.memory_space<vmem>>, vector<1x1x16x64xbf16>
    %117 = vector.shape_cast %116 : vector<1x1x16x64xbf16> to vector<16x64xbf16>
    %118 = vector.shape_cast %115 : vector<16x64xbf16> to vector<1x1x16x64xbf16>
    tpu.vector_store %arg6[%c0_108, %c13, %c0_109, %c0_110], %118 {strides = array<i32>} : memref<1x16x16x64xbf16, #tpu.memory_space<vmem>>, vector<1x1x16x64xbf16>,
    %119 = vector.extract_strided_slice %62 {offsets = [252, 0], sizes = [16, 64], strides = [1, 1]} : vector<288x64xbf16> to vector<16x64xbf16>
    %c0_111 = arith.constant 0 : index
    %c14 = arith.constant 14 : index
    %c0_112 = arith.constant 0 : index
    %c0_113 = arith.constant 0 : index
    %120 = vector.load %arg6[%c0_111, %c14, %c0_112, %c0_113] : memref<1x16x16x64xbf16, #tpu.memory_space<vmem>>, vector<1x1x16x64xbf16>
    %121 = vector.shape_cast %120 : vector<1x1x16x64xbf16> to vector<16x64xbf16>
    %122 = vector.shape_cast %119 : vector<16x64xbf16> to vector<1x1x16x64xbf16>
    tpu.vector_store %arg6[%c0_111, %c14, %c0_112, %c0_113], %122 {strides = array<i32>} : memref<1x16x16x64xbf16, #tpu.memory_space<vmem>>, vector<1x1x16x64xbf16>,
    %123 = vector.extract_strided_slice %62 {offsets = [270, 0], sizes = [16, 64], strides = [1, 1]} : vector<288x64xbf16> to vector<16x64xbf16>
    %c0_114 = arith.constant 0 : index
    %c15 = arith.constant 15 : index
    %c0_115 = arith.constant 0 : index
    %c0_116 = arith.constant 0 : index
    %124 = vector.load %arg6[%c0_114, %c15, %c0_115, %c0_116] : memref<1x16x16x64xbf16, #tpu.memory_space<vmem>>, vector<1x1x16x64xbf16>
    %125 = vector.shape_cast %124 : vector<1x1x16x64xbf16> to vector<16x64xbf16>
    %126 = vector.shape_cast %123 : vector<16x64xbf16> to vector<1x1x16x64xbf16>
    tpu.vector_store %arg6[%c0_114, %c15, %c0_115, %c0_116], %126 {strides = array<i32>} : memref<1x16x16x64xbf16, #tpu.memory_space<vmem>>, vector<1x1x16x64xbf16>,
    return
  }
  func.func @transform_0(%arg0: i32, %arg1: i32) -> (i32, i32, i32) {
    %c0_i32 = arith.constant 0 : i32
    %c0_i32_0 = arith.constant 0 : i32
    return %arg0, %c0_i32, %arg1 : i32, i32, i32
  }
  func.func @transform_1(%arg0: i32, %arg1: i32) -> (i32, i32, i32, i32) {
    %c0_i32 = arith.constant 0 : i32
    %c0_i32_0 = arith.constant 0 : i32
    %c0_i32_1 = arith.constant 0 : i32
    %c0_i32_2 = arith.constant 0 : i32
    return %c0_i32, %c0_i32_0, %arg1, %c0_i32_1 : i32, i32, i32, i32
  }
  func.func @transform_2(%arg0: i32, %arg1: i32) -> (i32, i32) {
    %c0_i32 = arith.constant 0 : i32
    %c0_i32_0 = arith.constant 0 : i32
    %c0_i32_1 = arith.constant 0 : i32
    return %c0_i32, %c0_i32_0 : i32, i32
  }
  func.func @transform_3(%arg0: i32, %arg1: i32) -> i32 {
    %c0_i32 = arith.constant 0 : i32
    %c0_i32_0 = arith.constant 0 : i32
    return %c0_i32 : i32
  }
  func.func @transform_4(%arg0: i32, %arg1: i32) -> (i32, i32, i32, i32) {
    %c0_i32 = arith.constant 0 : i32
    %c0_i32_0 = arith.constant 0 : i32
    %c0_i32_1 = arith.constant 0 : i32
    %c0_i32_2 = arith.constant 0 : i32
    return %arg0, %c0_i32, %c0_i32_0, %c0_i32_1 : i32, i32, i32, i32
  }
}

</mosaic_0001>

<bundles_post_ra>
// kernel: tpu_custom_call.1
= control target key start
LH: loop header
LB: loop body
LE: loop exit
PB: predicated region body
PF: predicated region fallthrough
CT: control target
= control target key end

     0   :  { %s6970_s0 = inlined_call_operand.vmem [shape: bf16[2,342,4], index: 0, kind: input, shape index: {}]   ;;  %s6971_s1 = inlined_call_operand.vmem [shape: bf16[3,3,4,64], index: 1, kind: input, shape index: {}]   ;;  %s6972_s2 = inlined_call_operand.vmem [shape: f32[1,64], index: 2, kind: input, shape index: {}]   ;;  %s6973_s3 = inlined_call_operand.<no memory space> [shape: f32[1], index: 3, kind: input, shape index: {}]   ;;  %s6974_s4 = inlined_call_operand.hbm [shape: bf16[2,16,16,64], index: 4, kind: output, shape index: {}]  }
   0x1   :  { %9 = sst [smem:[#allocation3]] %s6973_s3 }
   0x2   :  { %10 = vsyncpa [#allocation5], 0 }
   0x3   :  { %12 = vsyncpa [#allocation5 + $0x1], 0  ;;  %s5340_s17 = smov 0   ;;  %s5342_s18 = smov 0  }
   0x4   :  { %s5344_s19 = smov 0   ;;  %s5346_s20 = smov 0  }
   0x5   :  { %s5348_s21 = smov 0   ;;  %s5350_s22 = smov 0  }
   0x6 LB: > { %s4225_s3 = sadd.s32 4294967295, %s5307_s22   ;;  %s4226_s23 = sadd.s32 4294967294, %s5307_s22   ;;  %s5307_s22 = sphi %s5350_s22, %s18_s22   ;;  %s5303_s21 = sphi %s5348_s21, %s7025_s21   ;;  %s5299_s20 = sphi %s5346_s20, %s7024_s20   ;;  %s5295_s19 = sphi %s5344_s19, %s7023_s19   ;;  %s5291_s18 = sphi %s5342_s18, %s7022_s18   ;;  %s5287_s17 = sphi %s5340_s17, %s7021_s17  }
   0x7   : > { %s30_s24 = sadd.s32 1, %s5303_s21  ;;  %s133_s25 = sadd.s32 1, %s5295_s19 }
   0x8   : > { %p32_p0 = scmp.ge.s32.totalorder %s30_s24, 2  ;;  %p143_p1 = scmp.ne.s32.totalorder %s5295_s19, %s5291_s18 }
   0x9   : > { %p144_p2 = scmp.eq.s32.totalorder %s4225_s3, 1  ;;  %p149_p3 = scmp.ne.s32.totalorder %s5291_s18, %s5287_s17 }
   0xa   : > { %s7027_s24 = smov (%p32_p0, %s30_s24), 0  ;;  %p150_p5 = scmp.eq.s32.totalorder %s4226_s23, 1 }
   0xb   : > { %p5380_p4 = por %p144_p2, %p143_p1  ;;  %s130_s27 = ssub.s32 %s5303_s21, %s7027_s24 }
   0xc   : > { %p4230_p6 = scmp.ge.s32.totalorder %s5307_s22, 1  ;;  %p131_p7 = scmp.eq.s32.totalorder %s130_s27, 0 }
   0xd   : > { %p5387_p8 = por %p150_p5, %p149_p3  ;;  %p192_p9 = scmp.lt.s32.totalorder %s5307_s22, 3 }
   0xe   : > { %s5393_s29 = scalar_select %p131_p7, %s5295_s19, %s133_s25  }
   0xf   : > { %p193_p10 = pnand %p4230_p6, %p192_p9 }
  0x11   : > { %196 = sbr.rel (%p193_p10) target bundleno = 592 (0x250), region = 36 }
  0x16   : > { %v4233_v0 = vld [vmem:[%s6971_s1 + $0x2] sm:$0x3]  ;;  %vm575_vm0 = vcmask 1041408   ;;  %p225_p11 = scmp.lt.s32.totalorder %s5299_s20, 1  ;;  %v4289_v2 = vld [vmem:[%s6971_s1 + $0x4] sm:$0x3] }
  0x17   : > { %5101 = vmatprep.subr.msk.bf16.mxu0 %vm575_vm0, %v4233_v0  ;;  %5102 = vmatprep.subr.msk.bf16.mxu1 %vm575_vm0, %v4233_v0  ;;  %v577_v1 = vsel %vm575_vm0, %v4233_v0, 0  ;;  %v274_v3 = vld [vmem:[%s6971_s1] sm:$0x3]  ;;  %vm371_vm1 = vsmask.f32 7424  ;;  %vm520_vm2 = vcmask 31744  }
  0x18   : > { %4758 = vmatpush3.bf16.msra.mxu0 %v577_v1  ;;  %5100 = vmatpush3.bf16.msra.mxu1 %v577_v1  ;;  %s226_s10 = scalar_select %p225_p11, %s5299_s20, 1  ;;  %v1071_v8 = vsel %vm575_vm0, %v4289_v2, 0  ;;  %v793_v16 = vsel %vm575_vm0, %v274_v3, 0  ;;  %v5459_v33 = vld [vmem:[%s6971_s1 + $0x8] sm:$0x3]  ;;  %vm978_vm3 = vcmask 1046528  }
  0x19   : > { %5104 = vmatprep.subr.msk.bf16.mxu0 %vm575_vm0, %v4289_v2  ;;  %5103 = vmatprep.subr.msk.bf16.mxu1 %vm575_vm0, %v274_v3  ;;  %v5479_v45 = vld [vmem:[%s6971_s1 + $0x6] sm:$0x3]  ;;  %vm2178_vm4 = vcmask 1045504   ;;  %vm1731_vm5 = vsmask.f32 6400  ;;  %vm3378_vm6 = vcmask 1044480  }
  0x1a   : > { %s5111_s11 = smul.u32 172, %s226_s10  ;;  %vm2931_vm7 = vsmask.f32 5376  ;;  %s3729_s10 = sld [smem:[#allocation3]]  ;;  %vm3864_vm10 = vcmask 519168   ;;  %vm3875_vm12 = vcmask 1042432  }
  0x1b   : > { %s222_s13 = sand.u32 1, %s5291_s18   ;;  %vm3876_vm13 = vcmask 1046532   ;;  %vm3915_vm14 = vcmask 1040384   ;;  %vm3916_vm15 = vcmask 1044484   ;;  %s4585_s16 = sshll.u32 %s5299_s20, 11 }
  0x1c   : > { %s5414_s14 = scalar_lea.vmem %s6970_s0, %s5111_s11  ;;  %s6907_s25 = scalar_lea.hbm %s6974_s4, %s4585_s16 }
  0x1d   : > { %v238_v4 = vld [vmem:[%s5414_s14] sm:$0xf]  ;;  %v5418_v5 = vld [vmem:[%s5414_s14 + $0x4] sm:$0xf]  ;;  %v5424_v7 = vld [vmem:[%s5414_s14 + $0x8] sm:$0xff]   ;;  %s6925_s27 = scalar_lea.sflag [#allocation5], %s222_s13 }
  0x1e   : > { %v5421_v6 = vcombine.low %v238_v4, %v5418_v5  ;;  %v380_v11 = vshll.u32 %v5424_v7, 16  ;;  %v384_v12 = vshrl.u32 %v5424_v7, 16  ;;  %v5432_v13 = vld [vmem:[%s5414_s14 + $0x50] sm:$0xff]   ;;  %v5435_v14 = vld [vmem:[%s5414_s14 + $0x58] sm:$0xff]   ;;  %v5447_v24 = vld [vmem:[%s5414_s14 + $0x60] sm:$0xff]   ;;  %s5309_s5 = smov [#allocation4]  }
  0x1f   : > { %v5438_v15 = vld [vmem:[%s5414_s14 + $0x10] sm:$0xff]   ;;  %v452_v19 = vshll.u32 %v5432_v13, 16  ;;  %v456_v20 = vshrl.u32 %v5432_v13, 16  ;;  %v460_v21 = vshll.u32 %v5435_v14, 16  ;;  %v464_v22 = vshrl.u32 %v5435_v14, 16  ;;  %v5452_v28 = vld [vmem:[%s5414_s14 + $0x18] sm:$0xff]  }
  0x20   : > { %v373_v9 = vshrl.u32 %v5421_v6, 16  ;;  %v375_v10 = vshll.u32 %v5421_v6, 16  ;;  %v382_v18 = vrot.slane %v380_v11, 1  ;;  %v388_v23 = vshll.u32 %v5438_v15, 16  ;;  %v5465_v37 = vld [vmem:[%s5414_s14 + $0x68] sm:$0xff]   ;;  %v5469_v39 = vld [vmem:[%s5414_s14 + $0x20] sm:$0xff]  }
  0x21   : > { %v5449_v27 = vrot.slane %v452_v19, 1  ;;  %v462_v29 = vrot.slane %v460_v21, 1  ;;  %v468_v31 = vshll.u32 %v5447_v24, 16  ;;  %v392_v32 = vshrl.u32 %v5438_v15, 16  ;;  %v5474_v44 = vld [vmem:[%s5414_s14 + $0x70] sm:$0xff]   ;;  %v5486_v50 = vld [vmem:[%s5414_s14 + $0x28] sm:$0xff]  }
  0x22   : > { %v377_v17 = vrot.slane %v375_v10, 1  ;;  %v386_v26 = vor.u32 %v384_v12, %v382_v18  ;;  %v390_v30 = vrot.slane %v388_v23, 1  ;;  %v396_v36 = vshll.u32 %v5452_v28, 16  ;;  %v5501_v62 = vld [vmem:[%s5414_s14 + $0x78] sm:$0xff]   ;;  %v5511_v10 = vld [vmem:[%s5414_s14 + $0x30] sm:$0xff]   ;;  %v5514_v11 = vld [vmem:[%s5414_s14 + $0x80] sm:$0xff]  }
  0x23   : > { %v458_v35 = vor.u32 %v456_v20, %v5449_v27  ;;  %v472_v38 = vshrl.u32 %v5447_v24, 16  ;;  %v466_v40 = vor.u32 %v464_v22, %v462_v29  ;;  %v470_v42 = vrot.slane %v468_v31, 1  ;;  %v5523_v23 = vld [vmem:[%s5414_s14 + $0x38] sm:$0xff]   ;;  %s5235_s6 = sshll.u32 %s5309_s5, 4  ;;  %s5236_s6 = int_to_ptr.vmem [resolvable:$false] %s5235_s6 }
  0x24   : > { %v378_v25 = vor.u32 %v377_v17, %v373_v9  ;;  %v391_v41 = vsel %vm371_vm1, %v386_v26, %v390_v30  ;;  %v394_v43 = vor.u32 %v392_v32, %v390_v30  ;;  %v398_v47 = vrot.slane %v396_v36, 1  ;;  %v5528_v26 = vld [vmem:[%s5414_s14 + $0x88] sm:$0xff]   ;;  %s5237_s7 = scalar_lea.vmem %s5236_s6, 4096 }
  0x25   : > { %v463_v46 = vsel %vm371_vm1, %v458_v35, %v462_v29  ;;  %v476_v48 = vshll.u32 %v5465_v37, 16  ;;  %v400_v49 = vshrl.u32 %v5452_v28, 16  ;;  %v471_v51 = vsel %vm371_vm1, %v466_v40, %v470_v42  ;;  %v5540_v40 = vld [vmem:[%s5414_s14 + $0x48] sm:$0xff]  }
  0x26   : > { %v383_v34 = vsel %vm371_vm1, %v378_v25, %v382_v18  ;;  %4779 = vmatprep.mubr.msk.bf16.mxu1 %vm520_vm2, %v463_v46  ;;  %v474_v52 = vor.u32 %v472_v38, %v470_v42  ;;  %v404_v53 = vshll.u32 %v5469_v39, 16  ;;  %v480_v54 = vshrl.u32 %v5465_v37, 16  ;;  %v5537_v38 = vld [vmem:[%s5414_s14 + $0x40] sm:$0xff]  }
  0x27   : > { %4759 = vmatprep.mubr.msk.bf16.mxu0 %vm520_vm2, %v383_v34  ;;  %4780 = vmatmul.mubr.msk.bf16.vlgmr.msra.gmra.mxu1 %vm520_vm2, %v471_v51  ;;  %v399_v55 = vsel %vm371_vm1, %v394_v43, %v398_v47  ;;  %v478_v56 = vrot.slane %v476_v48, 1  ;;  %v402_v57 = vor.u32 %v400_v49, %v398_v47  ;;  %v484_v58 = vshll.u32 %v5474_v44, 16  ;;  %v5186_v43 = vld [vmem:[%s5414_s14 + $0x90] ss:$0 sps:$4 sm:$0x11]  }
  0x28   : > { %4760 = vmatmul.mubr.msk.bf16.vlgmr.msra.gmra.mxu0 %vm520_vm2, %v391_v41  ;;  %4796 = vmatpush3.bf16.msra.mxu1 %v793_v16  ;;  %v406_v59 = vrot.slane %v404_v53, 1  ;;  %v408_v60 = vshrl.u32 %v5469_v39, 16  ;;  %v412_v61 = vshll.u32 %v5486_v50, 16  ;;  %v488_v2 = vshrl.u32 %v5474_v44, 16 }
  0x29   : > { %4834 = vmatpush3.bf16.msra.mxu0 %v1071_v8  ;;  %4763 = vmatprep.mubr.msk.bf16.mxu0 %vm520_vm2, %v399_v55  ;;  %v479_v63 = vsel %vm371_vm1, %v474_v52, %v478_v56  ;;  %v482_v0 = vor.u32 %v480_v54, %v478_v56  ;;  %v486_v1 = vrot.slane %v484_v58, 1  ;;  %v492_v9 = vshll.u32 %v5501_v62, 16 }
  0x2a   : > { %5106 = vmatprep.subr.msk.bf16.mxu0 %vm575_vm0, %v5459_v33  ;;  %5105 = vmatprep.subr.msk.bf16.mxu1 %vm575_vm0, %v5479_v45  ;;  %v407_v3 = vsel %vm371_vm1, %v402_v57, %v406_v59  ;;  %v410_v4 = vor.u32 %v408_v60, %v406_v59  ;;  %v414_v8 = vrot.slane %v412_v61, 1  ;;  %v416_v17 = vshrl.u32 %v5486_v50, 16 }
  0x2b   : > { %4783 = vmatprep.mubr.msk.bf16.mxu1 %vm520_vm2, %v479_v63  ;;  %v487_v12 = vsel %vm371_vm1, %v482_v0, %v486_v1  ;;  %v490_v16 = vor.u32 %v488_v2, %v486_v1  ;;  %v496_v18 = vshrl.u32 %v5501_v62, 16  ;;  %v494_v20 = vrot.slane %v492_v9, 1  ;;  %v972_v63 = vld [vmem:[%s5414_s14] sm:$0xe] }
  0x2c   : > { %v415_v19 = vsel %vm371_vm1, %v410_v4, %v414_v8  ;;  %v420_v21 = vshll.u32 %v5511_v10, 16  ;;  %v500_v22 = vshll.u32 %v5514_v11, 16  ;;  %v424_v25 = vshrl.u32 %v5511_v10, 16 }
  0x2d   : > { %v495_v29 = vsel %vm371_vm1, %v490_v16, %v494_v20  ;;  %v418_v30 = vor.u32 %v416_v17, %v414_v8  ;;  %v428_v34 = vshll.u32 %v5523_v23, 16  ;;  %v504_v35 = vshrl.u32 %v5514_v11, 16 }
  0x2e   : > { %v422_v31 = vrot.slane %v420_v21, 1  ;;  %v502_v32 = vrot.slane %v500_v22, 1  ;;  %v508_v36 = vshll.u32 %v5528_v26, 16  ;;  %v498_v41 = vor.u32 %v496_v18, %v494_v20 }
  0x2f   : > { %4784 = vmatmul.mubr.msk.bf16.gmra.mxu1 %vm520_vm2, %v487_v12  ;;  %v430_v46 = vrot.slane %v428_v34, 1  ;;  %v436_v49 = vshll.u32 %v5537_v38, 16  ;;  %v432_v52 = vshrl.u32 %v5523_v23, 16  ;;  %v440_v54 = vshrl.u32 %v5537_v38, 16 }
  0x30   : > { %4764 = vmatmul.mubr.msk.bf16.gmra.mxu0 %vm520_vm2, %v407_v3  ;;  %4787 = vmatprep.mubr.msk.bf16.mxu1 %vm520_vm2, %v495_v29  ;;  %v426_v42 = vor.u32 %v424_v25, %v422_v31  ;;  %v506_v47 = vor.u32 %v504_v35, %v502_v32  ;;  %v510_v48 = vrot.slane %v508_v36, 1  ;;  %v423_v51 = vsel %vm371_vm1, %v418_v30, %v422_v31 }
  0x31   : > { %4767 = vmatprep.mubr.msk.bf16.mxu0 %vm520_vm2, %v415_v19  ;;  %v444_v55 = vshll.u32 %v5540_v40, 16  ;;  %v503_v56 = vsel %vm371_vm1, %v498_v41, %v502_v32  ;;  %v512_v57 = vshrl.u32 %v5528_v26, 16  ;;  %v516_v58 = vshll.u32 %v5186_v43, 16 }
  0x32   : > { %v431_v53 = vsel %vm371_vm1, %v426_v42, %v430_v46  ;;  %v511_v59 = vsel %vm371_vm1, %v506_v47, %v510_v48  ;;  %v438_v60 = vrot.slane %v436_v49, 1  ;;  %v434_v61 = vor.u32 %v432_v52, %v430_v46  ;;  %v5639_v46 = vld [vmem:[%s5414_s14 + $0x10] sm:$0xff]   ;;  %v5644_v49 = vld [vmem:[%s5414_s14 + $0x18] sm:$0xff]  }
  0x33   : > { %v446_v1 = vrot.slane %v444_v55, 1  ;;  %v514_v2 = vor.u32 %v512_v57, %v510_v48  ;;  %v518_v3 = vrot.slane %v516_v58, 1  ;;  %v448_v8 = vshrl.u32 %v5540_v40, 16  ;;  %v5657_v55 = vld [vmem:[%s5414_s14 + $0x30] sm:$0xff]  }
  0x34   : > { %v442_v0 = vor.u32 %v440_v54, %v438_v60  ;;  %v439_v4 = vsel %vm371_vm1, %v434_v61, %v438_v60  ;;  %v4290_v12 = vcombine.low %v972_v63, %v5418_v5  ;;  %v1012_v17 = vrot.slane %v5528_v26, 1  ;;  %v5672_v61 = vld [vmem:[%s5414_s14 + $0x38] sm:$0xff]  }
  0x35   : > { %v519_v16 = vsel %vm371_vm1, %v514_v2, %v518_v3  ;;  %v450_v18 = vor.u32 %v448_v8, %v446_v1  ;;  %v1014_v19 = vrot.slane %v5186_v43, 1  ;;  %v980_v21 = vrot.slane %v5424_v7, 1  ;;  %v2172_v43 = vld [vmem:[%s5414_s14 + $0x8] sm:$0xc]  ;;  %v5682_v2 = vld [vmem:[%s5414_s14 + $0x40] sm:$0xff]  }
  0x36   : > { %v447_v9 = vsel %vm371_vm1, %v442_v0, %v446_v1  ;;  %v979_v20 = vrot.slane %v4290_v12, 1  ;;  %v1510_v29 = vsel %vm575_vm0, %v5479_v45, 0  ;;  %v982_v30 = vrot.slane %v5438_v15, 1  ;;  %v5690_v8 = vld [vmem:[%s5414_s14 + $0x48] sm:$0xff]  }
  0x37   : > { %4788 = vmatmul.mubr.msk.bf16.gmra.mxu1 %vm520_vm2, %v503_v56  ;;  %v5573_v5 = vsel %vm978_vm3, %v1012_v17, %v1014_v19  ;;  %v455_v22 = vsel %vm371_vm1, %v450_v18, %v5449_v27  ;;  %v984_v27 = vrot.slane %v5452_v28, 1  ;;  %v1957_v31 = vsel %vm575_vm0, %v5459_v33, 0 }
  0x38   : > { %4768 = vmatmul.mubr.msk.bf16.gmra.mxu0 %vm520_vm2, %v423_v51  ;;  %4791 = vmatprep.mubr.msk.bf16.mxu1 %vm520_vm2, %v511_v59  ;;  %v981_v25 = vsel %vm978_vm3, %v979_v20, %v980_v21  ;;  %v983_v45 = vsel %vm978_vm3, %v980_v21, %v982_v30  ;;  %v988_v34 = vrot.slane %v5486_v50, 1  ;;  %v992_v36 = vrot.slane %v5523_v23, 1  ;;  %v5648_v51 = vld [vmem:[%s5414_s14 + $0x20] sm:$0xff]  }
  0x39   : > { %4771 = vmatprep.mubr.msk.bf16.mxu0 %vm520_vm2, %v431_v53  ;;  %v985_v32 = vsel %vm978_vm3, %v982_v30, %v984_v27  ;;  %v994_v42 = vrot.slane %v5537_v38, 1  ;;  %v2180_v53 = vrot.slane %v5639_v46, 2  ;;  %v2182_v54 = vrot.slane %v5644_v49, 2  ;;  %v5720_v30 = vld [vmem:[%s5414_s14 + $0x58] sm:$0xff]  }
  0x3a   : > { %v2184_v57 = vrot.slane %v5648_v51, 2  ;;  %v998_v58 = vrot.slane %v5432_v13, 1  ;;  %v1000_v59 = vrot.slane %v5435_v14, 1  ;;  %v2188_v1 = vrot.slane %v5657_v55, 2 }
  0x3b   : > { %v995_v48 = vsel %vm978_vm3, %v992_v36, %v994_v42  ;;  %v5667_v60 = vsel %vm2178_vm4, %v2180_v53, %v2182_v54  ;;  %v2194_v18 = vrot.slane %v5690_v8, 2  ;;  %v1002_v20 = vrot.slane %v5447_v24, 1 }
  0x3c   : > { %v5675_v63 = vsel %vm2178_vm4, %v2182_v54, %v2184_v57 }
  0x3f   : > { %4792 = vmatmul.mubr.msk.bf16.gmra.mxu1 %vm520_vm2, %v519_v16  ;;  %v2192_v16 = vrot.slane %v5682_v2, 2 }
  0x40   : > { %4772 = vmatmul.mubr.msk.bf16.gmra.mxu0 %vm520_vm2, %v439_v4  ;;  %4797 = vmatprep.mubr.msk.bf16.mxu1 %vm520_vm2, %v5421_v6  ;;  %v5586_v6 = vld [vmem:[%s6971_s1 + $0xa] sm:$0x3]  ;;  %v2190_v4 = vrot.slane %v5672_v61, 2 }
  0x41   : > { %4775 = vmatprep.mubr.msk.bf16.mxu0 %vm520_vm2, %v447_v9  ;;  %v5708_v21 = vsel %vm2178_vm4, %v2192_v16, %v2194_v18 }
  0x42   : > { %v5697_v12 = vsel %vm2178_vm4, %v2188_v1, %v2190_v4  ;;  %v5703_v19 = vsel %vm2178_vm4, %v2190_v4, %v2192_v16 }
  0x47   : > { %4798 = vmatmul.mubr.msk.bf16.vlgmr.msra.gmra.mxu1 %vm520_vm2, %v5424_v7  ;;  %v5602_v7 = vld [vmem:[%s6971_s1 + $0xc] sm:$0x3] }
  0x48   : > { %4776 = vmatmul.mubr.msk.bf16.gmra.mxu0 %vm520_vm2, %v455_v22  ;;  %4872 = vmatpush3.bf16.msra.mxu1 %v1510_v29  ;;  %v1004_v22 = vrot.slane %v5465_v37, 1  ;;  %v1003_v29 = vsel %vm978_vm3, %v1000_v59, %v1002_v20 }
  0x49   : > { %4835 = vmatprep.mubr.msk.bf16.mxu0 %vm520_vm2, %v981_v25  ;;  %4801 = vmatprep.mubr.msk.bf16.mxu1 %vm520_vm2, %v5438_v15  ;;  %v986_v15 = vrot.slane %v5469_v39, 1  ;;  %v5716_v25 = vld [vmem:[%s5414_s14 + $0x50] sm:$0xff]  }
  0x4a   : > { %5107 = vmatprep.subr.msk.bf16.mxu1 %vm575_vm0, %v5586_v6 }
  0x4b   : > { %v987_v33 = vsel %vm978_vm3, %v984_v27, %v986_v15  ;;  %v989_v35 = vsel %vm978_vm3, %v986_v15, %v988_v34  ;;  %v1005_v27 = vsel %vm978_vm3, %v1002_v20, %v1004_v22  ;;  %v1008_v15 = vrot.slane %v5501_v62, 1 }
  0x4f   : > { %4802 = vmatmul.mubr.msk.bf16.gmra.mxu1 %vm520_vm2, %v5452_v28  ;;  %v990_v28 = vrot.slane %v5511_v10, 1 }
  0x50   : > { %4836 = vmatmul.mubr.msk.bf16.vlgmr.msra.gmra.mxu0 %vm520_vm2, %v983_v45  ;;  %4805 = vmatprep.mubr.msk.bf16.mxu1 %vm520_vm2, %v5469_v39  ;;  %v2196_v45 = vrot.slane %v5716_v25, 2 }
  0x51   : > { %4910 = vmatpush3.bf16.msra.mxu0 %v1957_v31  ;;  %4839 = vmatprep.mubr.msk.bf16.mxu0 %vm520_vm2, %v985_v32  ;;  %v991_v39 = vsel %vm978_vm3, %v988_v34, %v990_v28  ;;  %v993_v41 = vsel %vm978_vm3, %v990_v28, %v992_v36  ;;  %v1286_v34 = vld [vmem:[%s5414_s14 + $0x8] sm:$0xe] }
  0x52   : > { %5108 = vmatprep.subr.msk.bf16.mxu0 %vm575_vm0, %v5602_v7  ;;  %v5727_v31 = vsel %vm2178_vm4, %v2194_v18, %v2196_v45  ;;  %v5745_v28 = vld [vmem:[%s5414_s14 + $0x68] sm:$0xff]  }
  0x57   : > { %4806 = vmatmul.mubr.msk.bf16.gmra.mxu1 %vm520_vm2, %v5486_v50  ;;  %v996_v50 = vrot.slane %v5540_v40, 1 }
  0x58   : > { %4840 = vmatmul.mubr.msk.bf16.gmra.mxu0 %vm520_vm2, %v987_v33  ;;  %4809 = vmatprep.mubr.msk.bf16.mxu1 %vm520_vm2, %v5511_v10  ;;  %v5636_v10 = vld [vmem:[%s5414_s14 + $0xc] sm:$0xf]  ;;  %v5741_v33 = vld [vmem:[%s5414_s14 + $0x60] sm:$0xff]  }
  0x59   : > { %4843 = vmatprep.mubr.msk.bf16.mxu0 %vm520_vm2, %v989_v35  ;;  %v4368_v47 = vcombine.low %v2172_v43, %v5636_v10 }
  0x5b   : > { %v2179_v52 = vrot.slane %v4368_v47, 2  ;;  %v1741_v47 = vshrl.u32 %v5639_v46, 16 }
  0x5d   : > { %v5660_v56 = vsel %vm2178_vm4, %v2179_v52, %v2180_v53  ;;  %v1419_v52 = vrot.slane %v5639_v46, 1  ;;  %v5768_v53 = vld [vmem:[%s5414_s14 + $0x70] sm:$0xff]  }
  0x5e   : > { %v2204_v4 = vrot.slane %v5768_v53, 2 }
  0x5f   : > { %4810 = vmatmul.mubr.msk.bf16.gmra.mxu1 %vm520_vm2, %v5523_v23  ;;  %v997_v23 = vsel %vm978_vm3, %v994_v42, %v996_v50  ;;  %v1010_v42 = vrot.slane %v5514_v11, 1 }
  0x60   : > { %4844 = vmatmul.mubr.msk.bf16.gmra.mxu0 %vm520_vm2, %v991_v39  ;;  %4813 = vmatprep.mubr.msk.bf16.mxu1 %vm520_vm2, %v5537_v38  ;;  %v5652_v38 = vld [vmem:[%s5414_s14 + $0x28] sm:$0xff]   ;;  %v2200_v39 = vrot.slane %v5741_v33, 2 }
  0x61   : > { %4847 = vmatprep.mubr.msk.bf16.mxu0 %vm520_vm2, %v993_v41  ;;  %v2186_v0 = vrot.slane %v5652_v38, 2  ;;  %v4310_v41 = vcombine.low %v1286_v34, %v5636_v10  ;;  %v1011_v54 = vsel %vm978_vm3, %v1008_v15, %v1010_v42  ;;  %v5801_v34 = vld [vmem:[%s5414_s14 + $0x88] sm:$0xff]  }
  0x63   : > { %v5685_v3 = vsel %vm2178_vm4, %v2184_v57, %v2186_v0  ;;  %v5693_v9 = vsel %vm2178_vm4, %v2186_v0, %v2188_v1  ;;  %v1733_v43 = vshrl.u32 %v4310_v41, 16  ;;  %v1736_v10 = vshll.u32 %v4310_v41, 16 }
  0x64   : > { %v1013_v57 = vsel %vm978_vm3, %v1010_v42, %v1012_v17  ;;  %v1743_v0 = vrot.slane %v1741_v47, 1  ;;  %v1750_v17 = vshrl.u32 %v5644_v49, 16  ;;  %v1771_v47 = vshll.u32 %v5652_v38, 16 }
  0x67   : > { %4814 = vmatmul.mubr.msk.bf16.gmra.mxu1 %vm520_vm2, %v5540_v40  ;;  %v999_v40 = vsel %vm978_vm3, %v996_v50, %v998_v58 }
  0x68   : > { %4848 = vmatmul.mubr.msk.bf16.gmra.mxu0 %vm520_vm2, %v995_v48  ;;  %4817 = vmatprep.mubr.msk.bf16.mxu1 %vm520_vm2, %v5432_v13  ;;  %v1001_v13 = vsel %vm978_vm3, %v998_v58, %v1000_v59  ;;  %v1744_v48 = vshll.u32 %v5639_v46, 16  ;;  %v5775_v58 = vld [vmem:[%s5414_s14 + $0x78] sm:$0xff]   ;;  %v1738_v59 = vrot.slane %v1736_v10, 2  ;;  %v1768_v10 = vshrl.u32 %v5652_v38, 16 }
  0x69   : > { %4851 = vmatprep.mubr.msk.bf16.mxu0 %vm520_vm2, %v997_v23  ;;  %v1418_v23 = vrot.slane %v4310_v41, 1 }
  0x6a   : > { %v1746_v1 = vrot.slane %v1744_v48, 2 }
  0x6b   : > { %v1420_v46 = vsel %vm978_vm3, %v1418_v23, %v1419_v52  ;;  %v1777_v23 = vshrl.u32 %v5657_v55, 16 }
  0x6c   : > { %v1747_v20 = vor.u32 %v1746_v1, %v1743_v0  ;;  %v2710_v0 = vsel %vm575_vm0, %v5602_v7, 0  ;;  %v1770_v1 = vrot.slane %v1768_v10, 1 }
  0x6f   : > { %4818 = vmatmul.mubr.msk.bf16.gmra.mxu1 %vm520_vm2, %v5435_v14  ;;  %v2198_v14 = vrot.slane %v5720_v30, 2 }
  0x70   : > { %4852 = vmatmul.mubr.msk.bf16.gmra.mxu0 %vm520_vm2, %v999_v40  ;;  %4821 = vmatprep.mubr.msk.bf16.mxu1 %vm520_vm2, %v5447_v24  ;;  %v1006_v24 = vrot.slane %v5474_v44, 1 }
  0x71   : > { %4855 = vmatprep.mubr.msk.bf16.mxu0 %vm520_vm2, %v1001_v13  ;;  %v5732_v32 = vsel %vm2178_vm4, %v2196_v45, %v2198_v14  ;;  %v1753_v13 = vshll.u32 %v5644_v49, 16  ;;  %v1423_v45 = vrot.slane %v5648_v51, 1 }
  0x72   : > { %v1007_v35 = vsel %vm978_vm3, %v1004_v22, %v1006_v24  ;;  %v1009_v36 = vsel %vm978_vm3, %v1006_v24, %v1008_v15  ;;  %v1759_v22 = vshrl.u32 %v5648_v51, 16  ;;  %v1752_v24 = vrot.slane %v1750_v17, 1 }
  0x73   : > { %v1755_v15 = vrot.slane %v1753_v13, 2  ;;  %v1779_v17 = vrot.slane %v1777_v23, 1 }
  0x77   : > { %4822 = vmatmul.mubr.msk.bf16.gmra.mxu1 %vm520_vm2, %v5465_v37  ;;  %v2202_v37 = vrot.slane %v5745_v28, 2 }
  0x78   : > { %4856 = vmatmul.mubr.msk.bf16.gmra.mxu0 %vm520_vm2, %v1003_v29  ;;  %4825 = vmatprep.mubr.msk.bf16.mxu1 %vm520_vm2, %v5474_v44  ;;  %v5753_v44 = vsel %vm2178_vm4, %v2198_v14, %v2200_v39  ;;  %v1762_v29 = vshll.u32 %v5648_v51, 16  ;;  %v5798_v14 = vld [vmem:[%s5414_s14 + $0x80] sm:$0xff]  }
  0x79   : > { %4859 = vmatprep.mubr.msk.bf16.mxu0 %vm520_vm2, %v1005_v27  ;;  %v5758_v50 = vsel %vm2178_vm4, %v2200_v39, %v2202_v37  ;;  %v5782_v40 = vsel %vm2178_vm4, %v2202_v37, %v2204_v4  ;;  %v1421_v27 = vrot.slane %v5644_v49, 1  ;;  %v2208_v39 = vrot.slane %v5798_v14, 2 }
  0x7a   : > { %v2210_v37 = vrot.slane %v5801_v34, 2  ;;  %v2271_v49 = vsel %vm575_vm0, %v5586_v6, 0 }
  0x7b   : > { %v1422_v41 = vsel %vm978_vm3, %v1419_v52, %v1421_v27  ;;  %v1424_v51 = vsel %vm978_vm3, %v1421_v27, %v1423_v45  ;;  %v1780_v52 = vshll.u32 %v5657_v55, 16  ;;  %v1786_v27 = vshrl.u32 %v5672_v61, 16 }
  0x7c   : > { %v5824_v6 = vsel %vm2178_vm4, %v2208_v39, %v2210_v37 }
  0x7f   : > { %4826 = vmatmul.mubr.msk.bf16.gmra.mxu1 %vm520_vm2, %v5501_v62  ;;  %v1735_v62 = vrot.slane %v1733_v43, 1  ;;  %v1756_v43 = vor.u32 %v1755_v15, %v1752_v24 }
  0x80   : > { %4860 = vmatmul.mubr.msk.bf16.gmra.mxu0 %vm520_vm2, %v1007_v35  ;;  %4829 = vmatprep.mubr.msk.bf16.mxu1 %vm520_vm2, %v5514_v11  ;;  %v2206_v11 = vrot.slane %v5775_v58, 2  ;;  %v1761_v35 = vrot.slane %v1759_v22, 1 }
  0x81   : > { %4863 = vmatprep.mubr.msk.bf16.mxu0 %vm520_vm2, %v1009_v36  ;;  %v1739_v18 = vor.u32 %v1738_v59, %v1735_v62  ;;  %v1764_v36 = vrot.slane %v1762_v29, 2  ;;  %v5833_v62 = vld [vmem:[%s5414_s14 + $0x90] sm:$0xff]   ;;  %v1757_v59 = vsel %vm1731_vm5, %v1747_v20, %v1756_v43 }
  0x82   : > { %v5788_v16 = vsel %vm2178_vm4, %v2204_v4, %v2206_v11  ;;  %v5813_v42 = vsel %vm2178_vm4, %v2206_v11, %v2208_v39  ;;  %v1773_v4 = vrot.slane %v1771_v47, 2  ;;  %v5841_v11 = vld [vmem:[%s5414_s14 + $0x98] ss:$0 sps:$4 sm:$0x33]   ;;  %v1431_v39 = vrot.slane %v5682_v2, 1 }
  0x83   : > { %v1765_v48 = vor.u32 %v1764_v36, %v1761_v35  ;;  %v1798_v35 = vshll.u32 %v5682_v2, 16  ;;  %v1429_v36 = vrot.slane %v5672_v61, 1 }
  0x84   : > { %v1774_v29 = vor.u32 %v1773_v4, %v1770_v1  ;;  %v5886_v1 = vld [vmem:[%s5414_s14 + $0x14] sm:$0xf]  ;;  %v3372_v4 = vld [vmem:[%s5414_s14 + $0x10] sm:$0x8] }
  0x85   : > { %v1800_v10 = vrot.slane %v1798_v35, 2  ;;  %v1432_v23 = vsel %vm978_vm3, %v1429_v36, %v1431_v39 }
  0x87   : > { %4830 = vmatmul.mubr.msk.bf16.gmra.mxu1 %vm520_vm2, %v5528_v26  ;;  %v1748_v26 = vsel %vm1731_vm5, %v1739_v18, %v1747_v20  ;;  %v5849_v18 = vld [vmem:[%s6971_s1 + $0x10] sm:$0x3]  ;;  %v2214_v20 = vrot.slane %v5841_v11, 2 }
  0x88   : > { %4864 = vmatmul.mubr.msk.bf16.gmra.mxu0 %vm520_vm2, %v1011_v54  ;;  %4873 = vmatprep.mubr.msk.bf16.mxu1 %vm520_vm2, %v1420_v46  ;;  %v1425_v54 = vrot.slane %v5652_v38, 1  ;;  %v1766_v46 = vsel %vm1731_vm5, %v1756_v43, %v1765_v48  ;;  %v1782_v38 = vrot.slane %v1780_v52, 2 }
  0x89   : > { %4867 = vmatprep.mubr.msk.bf16.mxu0 %vm520_vm2, %v1013_v57  ;;  %v1427_v57 = vrot.slane %v5657_v55, 1  ;;  %v2212_v55 = vrot.slane %v5833_v62, 2 }
  0x8a   : > { %v1426_v13 = vsel %vm978_vm3, %v1423_v45, %v1425_v54  ;;  %v1789_v45 = vshll.u32 %v5672_v61, 16  ;;  %v1783_v15 = vor.u32 %v1782_v38, %v1779_v17 }
  0x8b   : > { %v1428_v7 = vsel %vm978_vm3, %v1425_v54, %v1427_v57  ;;  %v5855_v22 = vsel %vm2178_vm4, %v2210_v37, %v2212_v55  ;;  %v5861_v24 = vsel %vm2178_vm4, %v2212_v55, %v2214_v20  ;;  %v1788_v37 = vrot.slane %v1786_v27, 1  ;;  %v5891_v55 = vld [vmem:[%s5414_s14 + $0x18] sm:$0xff]   ;;  %v5896_v27 = vld [vmem:[%s5414_s14 + $0x20] sm:$0xff]  }
  0x8c   : > { %v1430_v47 = vsel %vm978_vm3, %v1427_v57, %v1429_v36  ;;  %v1813_v54 = vshrl.u32 %v5716_v25, 16  ;;  %v1816_v57 = vshll.u32 %v5716_v25, 16  ;;  %v1822_v36 = vshrl.u32 %v5720_v30, 16 }
  0x8f   : > { %4874 = vmatmul.mubr.msk.bf16.vlgmr.msra.gmra.mxu1 %vm520_vm2, %v1422_v41  ;;  %v1775_v41 = vsel %vm1731_vm5, %v1765_v48, %v1774_v29  ;;  %v1807_v48 = vshll.u32 %v5690_v8, 16 }
  0x90   : > { %4868 = vmatmul.mubr.msk.bf16.gmra.mxu0 %vm520_vm2, %v5573_v5  ;;  %v5821_v5 = vld [vmem:[%s6971_s1 + $0xe] sm:$0x3]  ;;  %4948 = vmatpush3.bf16.msra.mxu1 %v2271_v49  ;;  %v1791_v49 = vrot.slane %v1789_v45, 2  ;;  %v3380_v45 = vrot.slane %v5891_v55, 3 }
  0x91   : > { %4911 = vmatprep.mubr.msk.bf16.mxu0 %vm520_vm2, %v1748_v26  ;;  %4877 = vmatprep.mubr.msk.bf16.mxu1 %vm520_vm2, %v1424_v51  ;;  %v1795_v26 = vshrl.u32 %v5682_v2, 16  ;;  %v1784_v51 = vsel %vm1731_vm5, %v1774_v29, %v1783_v15  ;;  %v1804_v2 = vshrl.u32 %v5690_v8, 16  ;;  %v1809_v38 = vrot.slane %v1807_v48, 2 }
  0x92   : > { %5109 = vmatprep.subr.msk.bf16.mxu1 %vm575_vm0, %v5821_v5  ;;  %v1792_v61 = vor.u32 %v1791_v49, %v1788_v37  ;;  %v1818_v29 = vrot.slane %v1816_v57, 2  ;;  %v1831_v49 = vshrl.u32 %v5741_v33, 16 }
  0x93   : > { %v1797_v43 = vrot.slane %v1795_v26, 1  ;;  %v1806_v17 = vrot.slane %v1804_v2, 1  ;;  %v6975_v26 = vrot.slane %v5896_v27, 3 }
  0x95   : > { %v1801_v52 = vor.u32 %v1800_v10, %v1797_v43  ;;  %v1810_v35 = vor.u32 %v1809_v38, %v1806_v17  ;;  %v5915_v43 = vsel %vm3378_vm6, %v3380_v45, %v6975_v26  ;;  %v1437_v10 = vrot.slane %v5720_v30, 1 }
  0x96   : > { %v1849_v17 = vshrl.u32 %v5768_v53, 16  ;;  %v1852_v38 = vshll.u32 %v5768_v53, 16 }
  0x97   : > { %4878 = vmatmul.mubr.msk.bf16.gmra.mxu1 %vm520_vm2, %v1426_v13  ;;  %v4446_v13 = vcombine.low %v3372_v4, %v5886_v1  ;;  %v1802_v20 = vsel %vm1731_vm5, %v1792_v61, %v1801_v52 }
  0x98   : > { %4912 = vmatmul.mubr.msk.bf16.vlgmr.msra.gmra.mxu0 %vm520_vm2, %v1757_v59  ;;  %4881 = vmatprep.mubr.msk.bf16.mxu1 %vm520_vm2, %v1428_v7  ;;  %v1433_v59 = vrot.slane %v5690_v8, 1  ;;  %v1815_v7 = vrot.slane %v1813_v54, 1  ;;  %v1833_v54 = vrot.slane %v1831_v49, 1  ;;  %v1870_v49 = vshll.u32 %v5798_v14, 16 }
  0x99   : > { %4986 = vmatpush3.bf16.msra.mxu0 %v2710_v0  ;;  %4915 = vmatprep.mubr.msk.bf16.mxu0 %vm520_vm2, %v1766_v46  ;;  %v1435_v0 = vrot.slane %v5716_v25, 1  ;;  %v1793_v46 = vsel %vm1731_vm5, %v1783_v15, %v1792_v61  ;;  %v3379_v25 = vrot.slane %v4446_v13, 3  ;;  %v1824_v61 = vrot.slane %v1822_v36, 1 }
  0x9a   : > { %5110 = vmatprep.subr.msk.bf16.mxu0 %vm575_vm0, %v5849_v18  ;;  %v1434_v8 = vsel %vm978_vm3, %v1431_v39, %v1433_v59  ;;  %v1819_v39 = vor.u32 %v1818_v29, %v1815_v7  ;;  %v1443_v13 = vrot.slane %v5768_v53, 1  ;;  %v1861_v53 = vshll.u32 %v5775_v58, 16 }
  0x9b   : > { %v1436_v15 = vsel %vm978_vm3, %v1433_v59, %v1435_v0  ;;  %v5907_v37 = vsel %vm3378_vm6, %v3379_v25, %v3380_v45  ;;  %v1438_v59 = vsel %vm978_vm3, %v1435_v0, %v1437_v10  ;;  %v1441_v0 = vrot.slane %v5745_v28, 1 }
  0x9c   : > { %v1820_v48 = vsel %vm1731_vm5, %v1810_v35, %v1819_v39  ;;  %v1851_v25 = vrot.slane %v1849_v17, 1  ;;  %v1854_v45 = vrot.slane %v1852_v38, 2  ;;  %v1451_v17 = vrot.slane %v5833_v62, 1 }
  0x9f   : > { %4882 = vmatmul.mubr.msk.bf16.gmra.mxu1 %vm520_vm2, %v1430_v47  ;;  %v1439_v47 = vrot.slane %v5741_v33, 1 }
  0xa0   : > { %4916 = vmatmul.mubr.msk.bf16.gmra.mxu0 %vm520_vm2, %v1775_v41  ;;  %4885 = vmatprep.mubr.msk.bf16.mxu1 %vm520_vm2, %v1432_v23  ;;  %v1825_v41 = vshll.u32 %v5720_v30, 16  ;;  %v1811_v23 = vsel %vm1731_vm5, %v1801_v52, %v1810_v35  ;;  %v1840_v30 = vshrl.u32 %v5745_v28, 16  ;;  %v1444_v35 = vsel %vm978_vm3, %v1441_v0, %v1443_v13 }
  0xa1   : > { %4919 = vmatprep.mubr.msk.bf16.mxu0 %vm520_vm2, %v1784_v51  ;;  %v1834_v51 = vshll.u32 %v5741_v33, 16  ;;  %v1440_v4 = vsel %vm978_vm3, %v1437_v10, %v1439_v47  ;;  %v1843_v33 = vshll.u32 %v5745_v28, 16  ;;  %v1858_v28 = vshrl.u32 %v5775_v58, 16 }
  0xa2   : > { %v1827_v2 = vrot.slane %v1825_v41, 2  ;;  %v1842_v7 = vrot.slane %v1840_v30, 1  ;;  %v1855_v41 = vor.u32 %v1854_v45, %v1851_v25  ;;  %v1447_v10 = vrot.slane %v5798_v14, 1  ;;  %v5207_v25 = vld [vmem:[%s5414_s14 + $0x98] ss:$0 sps:$4 sm:$0x11]  }
  0xa3   : > { %v1836_v57 = vrot.slane %v1834_v51, 2  ;;  %v1845_v29 = vrot.slane %v1843_v33, 2  ;;  %v1445_v51 = vrot.slane %v5775_v58, 1  ;;  %v1876_v58 = vshrl.u32 %v5801_v34, 16 }
  0xa4   : > { %v1885_v30 = vshrl.u32 %v5833_v62, 16  ;;  %v1888_v33 = vshll.u32 %v5833_v62, 16  ;;  %v1894_v62 = vshrl.u32 %v5841_v11, 16 }
  0xa5   : > { %v1837_v52 = vor.u32 %v1836_v57, %v1833_v54  ;;  %v1846_v36 = vor.u32 %v1845_v29, %v1842_v7  ;;  %v1872_v54 = vrot.slane %v1870_v49, 2  ;;  %v1446_v57 = vsel %vm978_vm3, %v1443_v13, %v1445_v51 }
  0xa6   : > { %v1887_v7 = vrot.slane %v1885_v30, 1  ;;  %v1890_v29 = vrot.slane %v1888_v33, 2  ;;  %v6026_v30 = vld [vmem:[%s5414_s14 + $0x48] sm:$0xff]  }
  0xa7   : > { %4886 = vmatmul.mubr.msk.bf16.gmra.mxu1 %vm520_vm2, %v1434_v8 }
  0xa8   : > { %4920 = vmatmul.mubr.msk.bf16.gmra.mxu0 %vm520_vm2, %v1793_v46  ;;  %4889 = vmatprep.mubr.msk.bf16.mxu1 %vm520_vm2, %v1436_v15  ;;  %v1828_v46 = vor.u32 %v1827_v2, %v1824_v61  ;;  %v1442_v15 = vsel %vm978_vm3, %v1439_v47, %v1441_v0  ;;  %v1847_v47 = vsel %vm1731_vm5, %v1837_v52, %v1846_v36  ;;  %v1863_v61 = vrot.slane %v1861_v53, 2 }
  0xa9   : > { %4923 = vmatprep.mubr.msk.bf16.mxu0 %vm520_vm2, %v1802_v20  ;;  %v1856_v2 = vsel %vm1731_vm5, %v1846_v36, %v1855_v41  ;;  %v1878_v0 = vrot.slane %v1876_v58, 1  ;;  %v1453_v36 = vrot.slane %v5207_v25, 1  ;;  %v6010_v58 = vld [vmem:[%s5414_s14 + $0x38] sm:$0xff]  }
  0xaa   : > { %v1829_v20 = vsel %vm1731_vm5, %v1819_v39, %v1828_v46  ;;  %v1838_v8 = vsel %vm1731_vm5, %v1828_v46, %v1837_v52  ;;  %v1867_v39 = vshrl.u32 %v5798_v14, 16  ;;  %v1879_v14 = vshll.u32 %v5801_v34, 16 }
  0xab   : > { %v1449_v52 = vrot.slane %v5801_v34, 1 }
  0xac   : > { %v1881_v13 = vrot.slane %v1879_v14, 2  ;;  %v6022_v14 = vld [vmem:[%s5414_s14 + $0x40] sm:$0xff]  }
  0xad   : > { %v1452_v45 = vsel %vm978_vm3, %v1449_v52, %v1451_v17 }
  0xae   : > { %v1882_v34 = vor.u32 %v1881_v13, %v1878_v0 }
  0xaf   : > { %4890 = vmatmul.mubr.msk.bf16.gmra.mxu1 %vm520_vm2, %v1438_v59  ;;  %v1448_v59 = vsel %vm978_vm3, %v1445_v51, %v1447_v10 }
  0xb0   : > { %4924 = vmatmul.mubr.msk.bf16.gmra.mxu0 %vm520_vm2, %v1811_v23  ;;  %4893 = vmatprep.mubr.msk.bf16.mxu1 %vm520_vm2, %v1440_v4  ;;  %v1860_v23 = vrot.slane %v1858_v28, 1  ;;  %v2486_v28 = vld [vmem:[%s5414_s14 + $0x10] sm:$0xc] }
  0xb1   : > { %4927 = vmatprep.mubr.msk.bf16.mxu0 %vm520_vm2, %v1820_v48  ;;  %v1869_v48 = vrot.slane %v1867_v39, 1  ;;  %v5977_v51 = vcombine.low %v2486_v28, %v5886_v1 }
  0xb2   : > { %v1864_v4 = vor.u32 %v1863_v61, %v1860_v23  ;;  %v2619_v23 = vrot.slane %v5891_v55, 2 }
  0xb3   : > { %v1873_v46 = vor.u32 %v1872_v54, %v1869_v48  ;;  %v3157_v48 = vsel %vm575_vm0, %v5821_v5, 0  ;;  %v2621_v54 = vrot.slane %v5896_v27, 2  ;;  %v3471_v5 = vsel %vm575_vm0, %v5849_v18, 0 }
  0xb4   : > { %v1865_v38 = vsel %vm1731_vm5, %v1855_v41, %v1864_v4  ;;  %v1896_v41 = vrot.slane %v1894_v62, 1 }
  0xb5   : > { %v1883_v53 = vsel %vm1731_vm5, %v1873_v46, %v1882_v34 }
  0xb7   : > { %4894 = vmatmul.mubr.msk.bf16.gmra.mxu1 %vm520_vm2, %v1442_v15  ;;  %v1897_v15 = vshll.u32 %v5841_v11, 16 }
  0xb8   : > { %4928 = vmatmul.mubr.msk.bf16.gmra.mxu0 %vm520_vm2, %v1829_v20  ;;  %4897 = vmatprep.mubr.msk.bf16.mxu1 %vm520_vm2, %v1444_v35  ;;  %v1874_v20 = vsel %vm1731_vm5, %v1864_v4, %v1873_v46  ;;  %v1891_v35 = vor.u32 %v1890_v29, %v1887_v7 }
  0xb9   : > { %4931 = vmatprep.mubr.msk.bf16.mxu0 %vm520_vm2, %v1838_v8  ;;  %v1450_v8 = vsel %vm978_vm3, %v1447_v10, %v1449_v52  ;;  %v1899_v39 = vrot.slane %v1897_v15, 2  ;;  %v1454_v10 = vsel %vm978_vm3, %v1451_v17, %v1453_v36  ;;  %v2631_v17 = vrot.slane %v6026_v30, 2 }
  0xba   : > { %v1892_v49 = vsel %vm1731_vm5, %v1882_v34, %v1891_v35  ;;  %vm3896_vm3 = vcmask 1045508  }
  0xbb   : > { %v1900_v11 = vor.u32 %v1899_v39, %v1896_v41 }
  0xbd   : > { %v1901_v1 = vsel %vm1731_vm5, %v1891_v35, %v1900_v11 }
  0xbf   : > { %4898 = vmatmul.mubr.msk.bf16.gmra.mxu1 %vm520_vm2, %v1446_v57  ;;  %v2622_v57 = vsel %vm2178_vm4, %v2619_v23, %v2621_v54 }
  0xc0   : > { %4932 = vmatmul.mubr.msk.bf16.gmra.mxu0 %vm520_vm2, %v1847_v47  ;;  %4901 = vmatprep.mubr.msk.bf16.mxu1 %vm520_vm2, %v1448_v59  ;;  %v2618_v47 = vrot.slane %v5977_v51, 2  ;;  %v6004_v59 = vld [vmem:[%s5414_s14 + $0x30] sm:$0xff]  }
  0xc1   : > { %4935 = vmatprep.mubr.msk.bf16.mxu0 %vm520_vm2, %v1856_v2  ;;  %v5990_v2 = vld [vmem:[%s5414_s14 + $0x28] sm:$0xff]  }
  0xc2   : > { %v2620_v61 = vsel %vm2178_vm4, %v2618_v47, %v2619_v23 }
  0xc7   : > { %4902 = vmatmul.mubr.msk.bf16.gmra.mxu1 %vm520_vm2, %v1450_v8  ;;  %v6056_v8 = vld [vmem:[%s5414_s14 + $0x58] sm:$0xff]  }
  0xc8   : > { %4936 = vmatmul.mubr.msk.bf16.gmra.mxu0 %vm520_vm2, %v1865_v38  ;;  %4905 = vmatprep.mubr.msk.bf16.mxu1 %vm520_vm2, %v1452_v45  ;;  %v2635_v15 = vrot.slane %v6056_v8, 2 }
  0xc9   : > { %4939 = vmatprep.mubr.msk.bf16.mxu0 %vm520_vm2, %v1874_v20  ;;  %v6048_v20 = vld [vmem:[%s5414_s14 + $0x50] sm:$0xff]  }
  0xca   : > { %v2633_v45 = vrot.slane %v6048_v20, 2 }
  0xcc   : > { %v2634_v28 = vsel %vm2178_vm4, %v2631_v17, %v2633_v45 }
  0xcf   : > { %4906 = vmatmul.mubr.msk.bf16.gmra.mxu1 %vm520_vm2, %v1454_v10 }
  0xd0   : > { %4940 = vmatmul.mubr.msk.bf16.gmra.mxu0 %vm520_vm2, %v1883_v53  ;;  %4949 = vmatprep.mubr.msk.bf16.mxu1 %vm520_vm2, %v5660_v56  ;;  %v2623_v56 = vrot.slane %v5990_v2, 2  ;;  %v6080_v53 = vld [vmem:[%s5414_s14 + $0x60] sm:$0xff]  }
  0xd1   : > { %4943 = vmatprep.mubr.msk.bf16.mxu0 %vm520_vm2, %v1892_v49  ;;  %v6088_v49 = vld [vmem:[%s5414_s14 + $0x68] sm:$0xff]   ;;  %v2637_v11 = vrot.slane %v6080_v53, 2 }
  0xd2   : > { %v2624_v4 = vsel %vm2178_vm4, %v2621_v54, %v2623_v56 }
  0xd3   : > { %v2638_v54 = vsel %vm2178_vm4, %v2635_v15, %v2637_v11 }
  0xd7   : > { %4950 = vmatmul.mubr.msk.bf16.vlgmr.msra.gmra.mxu1 %vm520_vm2, %v5667_v60  ;;  %v2625_v60 = vrot.slane %v6004_v59, 2 }
  0xd8   : > { %4944 = vmatmul.mubr.msk.bf16.gmra.mxu0 %vm520_vm2, %v1901_v1  ;;  %5024 = vmatpush3.bf16.msra.mxu1 %v3157_v48  ;;  %v2639_v1 = vrot.slane %v6088_v49, 2 }
  0xd9   : > { %4987 = vmatprep.mubr.msk.bf16.mxu0 %vm520_vm2, %v2620_v61  ;;  %4953 = vmatprep.mubr.msk.bf16.mxu1 %vm520_vm2, %v5675_v63  ;;  %v2627_v63 = vrot.slane %v6010_v58, 2  ;;  %v2626_v18 = vsel %vm2178_vm4, %v2623_v56, %v2625_v60  ;;  %v6112_v56 = vld [vmem:[%s5414_s14 + $0x70] sm:$0xff]  }
  0xdb   : > { %v2628_v46 = vsel %vm2178_vm4, %v2625_v60, %v2627_v63 }
  0xdf   : > { %4954 = vmatmul.mubr.msk.bf16.gmra.mxu1 %vm520_vm2, %v5685_v3  ;;  %v2629_v3 = vrot.slane %v6022_v14, 2 }
  0xe0   : > { %4988 = vmatmul.mubr.msk.bf16.vlgmr.msra.gmra.mxu0 %vm520_vm2, %v2622_v57  ;;  %4957 = vmatprep.mubr.msk.bf16.mxu1 %vm520_vm2, %v5693_v9 }
  0xe1   : > { %5062 = vmatpush3.bf16.msra.mxu0 %v3471_v5  ;;  %4991 = vmatprep.mubr.msk.bf16.mxu0 %vm520_vm2, %v2624_v4  ;;  %v2630_v13 = vsel %vm2178_vm4, %v2627_v63, %v2629_v3  ;;  %v6120_v4 = vld [vmem:[%s5414_s14 + $0x78] sm:$0xff]   ;;  %v2641_v63 = vrot.slane %v6112_v56, 2 }
  0xe7   : > { %v6033_v52 = vpop.f32.mrf.mxu1  ;;  %4958 = vmatmul.mubr.msk.bf16.gmra.mxu1 %vm520_vm2, %v5697_v12  ;;  %v2632_v12 = vsel %vm2178_vm4, %v2629_v3, %v2631_v17  ;;  %v2643_v3 = vrot.slane %v6120_v4, 2 }
  0xe8   : > { %v6028_v33 = vpop.f32.mrf.mxu0  ;;  %4992 = vmatmul.mubr.msk.bf16.gmra.mxu0 %vm520_vm2, %v2626_v18  ;;  %4961 = vmatprep.mubr.msk.bf16.mxu1 %vm520_vm2, %v5703_v19 }
  0xe9   : > { %4995 = vmatprep.mubr.msk.bf16.mxu0 %vm520_vm2, %v2628_v46  ;;  %v6042_v38 = vpop.f32.mrf.mxu1 }
  0xea   : > { %v6037_v9 = vpop.f32.mrf.mxu0 }
  0xeb   : > { %v6050_v7 = vpop.f32.mrf.mxu1 }
  0xec   : > { %v6044_v0 = vpop.f32.mrf.mxu0 }
  0xed   : > { %v6058_v25 = vpop.f32.mrf.mxu1 }
  0xee   : > { %v6052_v29 = vpop.f32.mrf.mxu0 }
  0xef   : > { %v6065_v34 = vpop.f32.mrf.mxu1  ;;  %4962 = vmatmul.mubr.msk.bf16.gmra.mxu1 %vm520_vm2, %v5708_v21  ;;  %v2636_v21 = vsel %vm2178_vm4, %v2633_v45, %v2635_v15  ;;  %v6144_v45 = vld [vmem:[%s5414_s14 + $0x80] sm:$0xff]  }
  0xf0   : > { %v6060_v19 = vpop.f32.mrf.mxu0  ;;  %4996 = vmatmul.mubr.msk.bf16.gmra.mxu0 %vm520_vm2, %v2630_v13  ;;  %4965 = vmatprep.mubr.msk.bf16.mxu1 %vm520_vm2, %v5727_v31  ;;  %6992 = vst [vmem:[#allocation15_spill] sm:$0xff] %v6144_v45 }
  0xf1   : > { %4999 = vmatprep.mubr.msk.bf16.mxu0 %vm520_vm2, %v2632_v12  ;;  %v6074_v35 = vpop.f32.mrf.mxu1  ;;  %v2642_v12 = vsel %vm2178_vm4, %v2639_v1, %v2641_v63 }
  0xf2   : > { %v6069_v62 = vpop.f32.mrf.mxu0 }
  0xf3   : > { %v6082_v41 = vpop.f32.mrf.mxu1 }
  0xf4   : > { %v6076_v36 = vpop.f32.mrf.mxu0  ;;  %6984 = vst [vmem:[#allocation7_spill] sm:$0xff] %v6082_v41 }
  0xf5   : > { %v6090_v10 = vpop.f32.mrf.mxu1 }
  0xf6   : > { %v6084_v39 = vpop.f32.mrf.mxu0  ;;  %6985 = vst [vmem:[#allocation8_spill] sm:$0xff] %v6090_v10 }
  0xf7   : > { %v6097_v47 = vpop.f32.mrf.mxu1  ;;  %4966 = vmatmul.mubr.msk.bf16.gmra.mxu1 %vm520_vm2, %v5732_v32  ;;  %v2640_v32 = vsel %vm2178_vm4, %v2637_v11, %v2639_v1 }
  0xf8   : > { %v6092_v31 = vpop.f32.mrf.mxu0  ;;  %5000 = vmatmul.mubr.msk.bf16.gmra.mxu0 %vm520_vm2, %v2634_v28  ;;  %6986 = vst [vmem:[#allocation9_spill] sm:$0xff] %v6097_v47  ;;  %4969 = vmatprep.mubr.msk.bf16.mxu1 %vm520_vm2, %v5753_v44 }
  0xf9   : > { %5003 = vmatprep.mubr.msk.bf16.mxu0 %vm520_vm2, %v2636_v21  ;;  %v6106_v61 = vpop.f32.mrf.mxu1  ;;  %v6152_v21 = vld [vmem:[%s5414_s14 + $0x88] sm:$0xff]  }
  0xfa   : > { %v6101_v23 = vpop.f32.mrf.mxu0  ;;  %6987 = vst [vmem:[#allocation10_spill] sm:$0xff] %v6106_v61  ;;  %6994 = vst [vmem:[#allocation17_spill] sm:$0xff] %v6152_v21  ;;  %v6184_v61 = vld [vmem:[%s5414_s14 + $0x98] sm:$0xff]  }
  0xfb   : > { %v6114_v57 = vpop.f32.mrf.mxu1  ;;  %6996 = vst [vmem:[#allocation19_spill] sm:$0xff] %v6184_v61 }
  0xfc   : > { %v6108_v48 = vpop.f32.mrf.mxu0  ;;  %6988 = vst [vmem:[#allocation11_spill] sm:$0xff] %v6114_v57  ;;  %v6178_v57 = vld [vmem:[%s5414_s14 + $0x90] sm:$0xff]  }
  0xfd   : > { %v6122_v60 = vpop.f32.mrf.mxu1 }
  0xfe   : > { %v6116_v5 = vpop.f32.mrf.mxu0  ;;  %6989 = vst [vmem:[#allocation12_spill] sm:$0xff] %v6122_v60 }
  0xff   : > { %v6129_v18 = vpop.f32.mrf.mxu1  ;;  %4970 = vmatmul.mubr.msk.bf16.gmra.mxu1 %vm520_vm2, %v5758_v50  ;;  %v2644_v50 = vsel %vm2178_vm4, %v2641_v63, %v2643_v3  ;;  %v2647_v63 = vrot.slane %v6152_v21, 2 }
 0x100   : > { %v6124_v44 = vpop.f32.mrf.mxu0  ;;  %5004 = vmatmul.mubr.msk.bf16.gmra.mxu0 %vm520_vm2, %v2638_v54  ;;  %6990 = vst [vmem:[#allocation13_spill] sm:$0xff] %v6129_v18  ;;  %4973 = vmatprep.mubr.msk.bf16.mxu1 %vm520_vm2, %v5782_v40  ;;  %v2645_v40 = vrot.slane %v6144_v45, 2 }
 0x101   : > { %5007 = vmatprep.mubr.msk.bf16.mxu0 %vm520_vm2, %v2640_v32  ;;  %v6138_v17 = vpop.f32.mrf.mxu1 }
 0x102   : > { %v6133_v46 = vpop.f32.mrf.mxu0  ;;  %6991 = vst [vmem:[#allocation14_spill] sm:$0xff] %v6138_v17  ;;  %v2941_v17 = vshrl.u32 %v5891_v55, 16  ;;  %v2646_v60 = vsel %vm2178_vm4, %v2643_v3, %v2645_v40 }
 0x103   : > { %v6146_v15 = vpop.f32.mrf.mxu1 }
 0x104   : > { %v6140_v13 = vpop.f32.mrf.mxu0  ;;  %6993 = vst [vmem:[#allocation16_spill] sm:$0xff] %v6146_v15  ;;  %v2936_v15 = vshll.u32 %v5977_v51, 16 }
 0x105   : > { %v6154_v11 = vpop.f32.mrf.mxu1 }
 0x106   : > { %v6148_v28 = vpop.f32.mrf.mxu0  ;;  %6995 = vst [vmem:[#allocation18_spill] sm:$0xff] %v6154_v11  ;;  %v2938_v21 = vrot.slane %v2936_v15, 3 }
 0x107   : > { %v4799_v1 = vpop.f32.mrf.mxu1  ;;  %4974 = vmatmul.mubr.msk.bf16.gmra.mxu1 %vm520_vm2, %v5788_v16  ;;  %v2944_v16 = vshll.u32 %v5891_v55, 16 }
 0x108   : > { %v6156_v54 = vpop.f32.mrf.mxu0  ;;  %5008 = vmatmul.mubr.msk.bf16.gmra.mxu0 %vm520_vm2, %v2642_v12  ;;  %v838_v26 = vadd.f32 %v4799_v1, %v6028_v33  ;;  %4977 = vmatprep.mubr.msk.bf16.mxu1 %vm520_vm2, %v5813_v42  ;;  %v2648_v42 = vsel %vm2178_vm4, %v2645_v40, %v2647_v63  ;;  %v2649_v40 = vrot.slane %v6178_v57, 2 }
 0x109   : > { %5011 = vmatprep.mubr.msk.bf16.mxu0 %vm520_vm2, %v2644_v50  ;;  %v829_v12 = vpop.f32.mrf.mxu1  ;;  %v2933_v50 = vshrl.u32 %v5977_v51, 16 }
 0x10a   : > { %v6163_v32 = vpop.f32.mrf.mxu0  ;;  %v830_v18 = vadd.f32 %v829_v12, %v6037_v9  ;;  %v2943_v9 = vrot.slane %v2941_v17, 2  ;;  %v2946_v12 = vrot.slane %v2944_v16, 3 }
 0x10b   : > { %v4800_v33 = vpop.f32.mrf.mxu1  ;;  %v2935_v55 = vrot.slane %v2933_v50, 2 }
 0x10c   : > { %v6169_v11 = vpop.f32.mrf.mxu0  ;;  %v841_v47 = vadd.f32 %v4800_v33, %v6044_v0  ;;  %v2651_v33 = vrot.slane %v6184_v61, 2  ;;  %v2947_v16 = vor.u32 %v2946_v12, %v2943_v9 }
 0x10d   : > { %v832_v51 = vpop.f32.mrf.mxu1  ;;  %v2939_v50 = vor.u32 %v2938_v21, %v2935_v55 }
 0x10e   : > { %v6180_v1 = vpop.f32.mrf.mxu0  ;;  %v833_v3 = vadd.f32 %v832_v51, %v6052_v29  ;;  %v2953_v29 = vshll.u32 %v5896_v27, 16 }
 0x10f   : > { %v4803_v41 = vpop.f32.mrf.mxu1  ;;  %4978 = vmatmul.mubr.msk.bf16.gmra.mxu1 %vm520_vm2, %v5824_v6  ;;  %v2959_v6 = vshrl.u32 %v5990_v2, 16 }
 0x110   : > { %v4837_v10 = vpop.f32.mrf.mxu0  ;;  %5012 = vmatmul.mubr.msk.bf16.gmra.mxu0 %vm520_vm2, %v2646_v60  ;;  %v854_v60 = vadd.f32 %v4803_v41, %v6060_v19  ;;  %4981 = vmatprep.mubr.msk.bf16.mxu1 %vm520_vm2, %v5855_v22  ;;  %v2650_v41 = vsel %vm2178_vm4, %v2647_v63, %v2649_v40  ;;  %v5228_v22 = vld [vmem:[%s5414_s14 + $0xa0] ss:$0 sps:$4 sm:$0x33]   ;;  %v2955_v9 = vrot.slane %v2953_v29, 3  ;;  %v2971_v29 = vshll.u32 %v6004_v59, 16 }
 0x111   : > { %v6189_v45 = vadd.f32 %v4837_v10, %v838_v26  ;;  %5015 = vmatprep.mubr.msk.bf16.mxu0 %vm520_vm2, %v2648_v42  ;;  %v2950_v26 = vshrl.u32 %v5896_v27, 16  ;;  %v845_v10 = vpop.f32.mrf.mxu1  ;;  %v2962_v42 = vshll.u32 %v5990_v2, 16 }
 0x112   : > { %v1107_v0 = vpop.f32.mrf.mxu0  ;;  %v846_v51 = vadd.f32 %v845_v10, %v6069_v62  ;;  %v2948_v62 = vsel %vm2931_vm7, %v2939_v50, %v2947_v16 }
 0x113   : > { %6997 = vst [vmem:[#allocation20_spill] sm:$0xff] %v6189_v45  ;;  %v6197_v17 = vadd.f32 %v1107_v0, %v830_v18  ;;  %v4804_v18 = vpop.f32.mrf.mxu1  ;;  %v2952_v55 = vrot.slane %v2950_v26, 2  ;;  %v2964_v63 = vrot.slane %v2962_v42, 3  ;;  %v2968_v26 = vshrl.u32 %v6004_v59, 16 }
 0x114   : > { %v4838_v15 = vpop.f32.mrf.mxu0  ;;  %v857_v45 = vadd.f32 %v4804_v18, %v6076_v36  ;;  %v2977_v42 = vshrl.u32 %v6010_v58, 16 }
 0x115   : > { %6998 = vst [vmem:[#allocation21_spill] sm:$0xff] %v6197_v17  ;;  %v6206_v19 = vadd.f32 %v4838_v15, %v841_v47  ;;  %v2652_v17 = vsel %vm2178_vm4, %v2649_v40, %v2651_v33  ;;  %v848_v12 = vpop.f32.mrf.mxu1  ;;  %v2961_v47 = vrot.slane %v2959_v6, 2  ;;  %v2653_v40 = vrot.slane %v5228_v22, 2 }
 0x116   : > { %v1110_v0 = vpop.f32.mrf.mxu0  ;;  %v849_v10 = vadd.f32 %v848_v12, %v6084_v39  ;;  %v2956_v39 = vor.u32 %v2955_v9, %v2952_v55  ;;  %v2973_v12 = vrot.slane %v2971_v29, 3 }
 0x117   : > { %v6212_v21 = vadd.f32 %v1110_v0, %v833_v3  ;;  %v4807_v36 = vpop.f32.mrf.mxu1  ;;  %4982 = vmatmul.mubr.msk.bf16.gmra.mxu1 %vm520_vm2, %v5861_v24  ;;  %v2654_v18 = vsel %vm2178_vm4, %v2651_v33, %v2653_v40  ;;  %vm6685_vm4 = vmor %vm3875_vm12, %vm3876_vm13 }
 0x118   : > { %v4841_v61 = vpop.f32.mrf.mxu0  ;;  %5016 = vmatmul.mubr.msk.bf16.gmra.mxu0 %vm520_vm2, %v2650_v41  ;;  %v870_v50 = vadd.f32 %v4807_v36, %v6092_v31  ;;  %5025 = vmatprep.mubr.msk.bf16.mxu1 %vm520_vm2, %v2948_v62  ;;  %v2980_v41 = vshll.u32 %v6010_v58, 16  ;;  %v2957_v9 = vsel %vm2931_vm7, %v2947_v16, %v2956_v39 }
 0x119   : > { %v6217_v15 = vadd.f32 %v4841_v61, %v854_v60  ;;  %5019 = vmatprep.mubr.msk.bf16.mxu0 %vm520_vm2, %v2652_v17  ;;  %v861_v61 = vpop.f32.mrf.mxu1  ;;  %v2965_v17 = vor.u32 %v2964_v63, %v2961_v47 }
 0x11a   : > { %v1123_v3 = vpop.f32.mrf.mxu0  ;;  %v862_v24 = vadd.f32 %v861_v61, %v6101_v23  ;;  %v2982_v36 = vrot.slane %v2980_v41, 3 }
 0x11b   : > { %v6225_v6 = vadd.f32 %v1123_v3, %v846_v51  ;;  %v4808_v0 = vpop.f32.mrf.mxu1  ;;  %v2970_v51 = vrot.slane %v2968_v26, 2  ;;  %v2966_v23 = vsel %vm2931_vm7, %v2956_v39, %v2965_v17  ;;  %v3384_v3 = vrot.slane %v5990_v2, 3 }
 0x11c   : > { %v4842_v60 = vpop.f32.mrf.mxu0  ;;  %v873_v62 = vadd.f32 %v4808_v0, %v6108_v48  ;;  %v6999_v0 = vrot.slane %v5896_v27, 3 }
 0x11d   : > { %v6231_v22 = vadd.f32 %v4842_v60, %v857_v45  ;;  %v864_v47 = vpop.f32.mrf.mxu1  ;;  %v2979_v45 = vrot.slane %v2977_v42, 2  ;;  %v2974_v16 = vor.u32 %v2973_v12, %v2970_v51  ;;  %v2995_v60 = vshrl.u32 %v6026_v30, 16 }
 0x11e   : > { %v1126_v31 = vpop.f32.mrf.mxu0  ;;  %v865_v33 = vadd.f32 %v864_v47, %v6116_v5  ;;  %v2986_v5 = vshrl.u32 %v6022_v14, 16  ;;  %v2998_v42 = vshll.u32 %v6026_v30, 16 }
 0x11f   : > { %v6235_v55 = vadd.f32 %v1126_v31, %v849_v10  ;;  %v4811_v48 = vpop.f32.mrf.mxu1  ;;  %5026 = vmatmul.mubr.msk.bf16.vlgmr.msra.gmra.mxu1 %vm520_vm2, %v2957_v9  ;;  %v3385_v31 = vsel %vm3378_vm6, %v6999_v0, %v3384_v3 }
 0x120   : > { %v4845_v63 = vpop.f32.mrf.mxu0  ;;  %5020 = vmatmul.mubr.msk.bf16.gmra.mxu0 %vm520_vm2, %v2654_v18  ;;  %v886_v26 = vadd.f32 %v4811_v48, %v6124_v44  ;;  %5029 = vmatprep.mubr.msk.bf16.mxu1 %vm520_vm2, %v2966_v23  ;;  %v2975_v18 = vsel %vm2931_vm7, %v2965_v17, %v2974_v16  ;;  %v2988_v9 = vrot.slane %v2986_v5, 2  ;;  %v3388_v48 = vrot.slane %v6010_v58, 3 }
 0x121   : > { %v6241_v40 = vadd.f32 %v4845_v63, %v870_v50  ;;  %5063 = vmatprep.mubr.msk.bf16.mxu0 %vm520_vm2, %v5907_v37  ;;  %v2989_v50 = vshll.u32 %v6022_v14, 16  ;;  %v877_v39 = vpop.f32.mrf.mxu1  ;;  %v2983_v37 = vor.u32 %v2982_v36, %v2979_v45  ;;  %v3000_v45 = vrot.slane %v2998_v42, 3 }
 0x122   : > { %v1139_v10 = vpop.f32.mrf.mxu0  ;;  %v878_v41 = vadd.f32 %v877_v39, %v6133_v46  ;;  %v3013_v39 = vshrl.u32 %v6056_v8, 16 }
 0x123   : > { %v6248_v29 = vadd.f32 %v1139_v10, %v862_v24  ;;  %v4812_v44 = vpop.f32.mrf.mxu1  ;;  %v2991_v47 = vrot.slane %v2989_v50, 3  ;;  %v2984_v46 = vsel %vm2931_vm7, %v2974_v16, %v2983_v37  ;;  %v3007_v10 = vshll.u32 %v6048_v20, 16 }
 0x124   : > { %v4846_v61 = vpop.f32.mrf.mxu0  ;;  %v889_v51 = vadd.f32 %v4812_v44, %v6140_v13  ;;  %v3386_v13 = vrot.slane %v6004_v59, 3 }
 0x125   : > { %v6256_v2 = vadd.f32 %v4846_v61, %v873_v62  ;;  %v880_v63 = vpop.f32.mrf.mxu1  ;;  %v2997_v62 = vrot.slane %v2995_v60, 2  ;;  %v3016_v61 = vshll.u32 %v6056_v8, 16 }
 0x126   : > { %v1142_v24 = vpop.f32.mrf.mxu0  ;;  %v881_v17 = vadd.f32 %v880_v63, %v6148_v28  ;;  %v2992_v28 = vor.u32 %v2991_v47, %v2988_v9  ;;  %v3387_v42 = vsel %vm3378_vm6, %v3384_v3, %v3386_v13 }
 0x127   : > { %v6263_v12 = vadd.f32 %v1142_v24, %v865_v33  ;;  %v4815_v36 = vpop.f32.mrf.mxu1  ;;  %5030 = vmatmul.mubr.msk.bf16.gmra.mxu1 %vm520_vm2, %v2975_v18  ;;  %v3001_v59 = vor.u32 %v3000_v45, %v2997_v62  ;;  %v3009_v18 = vrot.slane %v3007_v10, 3  ;;  %v3018_v3 = vrot.slane %v3016_v61, 3 }
 0x128   : > { %v4849_v23 = vpop.f32.mrf.mxu0  ;;  %5064 = vmatmul.mubr.msk.bf16.vlgmr.msra.gmra.mxu0 %vm520_vm2, %v5915_v43  ;;  %v3004_v43 = vshrl.u32 %v6048_v20, 16  ;;  %v902_v16 = vadd.f32 %v4815_v36, %v6156_v54  ;;  %5033 = vmatprep.mubr.msk.bf16.mxu1 %vm520_vm2, %v2984_v46  ;;  %v2993_v9 = vsel %vm2931_vm7, %v2983_v37, %v2992_v28  ;;  %v3022_v36 = vshrl.u32 %v6080_v53, 16 }
 0x129   : > { %v6269_v27 = vadd.f32 %v4849_v23, %v886_v26  ;;  %5067 = vmatprep.mubr.msk.bf16.mxu0 %vm520_vm2, %v3385_v31  ;;  %v893_v26 = vpop.f32.mrf.mxu1 }
 0x12a   : > { %v1155_v33 = vpop.f32.mrf.mxu0  ;;  %v894_v58 = vadd.f32 %v893_v26, %v6163_v32  ;;  %v3006_v24 = vrot.slane %v3004_v43, 2  ;;  %v3002_v32 = vsel %vm2931_vm7, %v2992_v28, %v3001_v59 }
 0x12b   : > { %v6278_v5 = vadd.f32 %v1155_v33, %v878_v41  ;;  %v4816_v44 = vpop.f32.mrf.mxu1  ;;  %v3389_v41 = vsel %vm3378_vm6, %v3386_v13, %v3388_v48 }
 0x12c   : > { %v4850_v50 = vpop.f32.mrf.mxu0  ;;  %v905_v0 = vadd.f32 %v4816_v44, %v6169_v11  ;;  %v3390_v11 = vrot.slane %v6022_v14, 3  ;;  %v3010_v45 = vor.u32 %v3009_v18, %v3006_v24  ;;  %v3031_v14 = vshrl.u32 %v6088_v49, 16 }
 0x12d   : > { %v6284_v60 = vadd.f32 %v4850_v50, %v889_v51  ;;  %v896_v47 = vpop.f32.mrf.mxu1  ;;  %v3015_v51 = vrot.slane %v3013_v39, 2  ;;  %v3024_v44 = vrot.slane %v3022_v36, 2  ;;  %v3052_v36 = vshll.u32 %v6120_v4, 16 }
 0x12e   : > { %v1158_v54 = vpop.f32.mrf.mxu0  ;;  %v897_v23 = vadd.f32 %v896_v47, %v6180_v1  ;;  %v3025_v1 = vshll.u32 %v6080_v53, 16  ;;  %v3391_v26 = vsel %vm3378_vm6, %v3388_v48, %v3390_v11  ;;  %v3011_v39 = vsel %vm2931_vm7, %v3001_v59, %v3010_v45 }
 0x12f   : > { %v6289_v31 = vadd.f32 %v1158_v54, %v881_v17  ;;  %v4819_v62 = vpop.f32.mrf.mxu1  ;;  %5034 = vmatmul.mubr.msk.bf16.gmra.mxu1 %vm520_vm2, %v2993_v9  ;;  %v3392_v17 = vrot.slane %v6026_v30, 3  ;;  %v3019_v10 = vor.u32 %v3018_v3, %v3015_v51  ;;  %v3040_v51 = vshrl.u32 %v6112_v56, 16 }
 0x130   : > { %v4853_v63 = vpop.f32.mrf.mxu0  ;;  %5068 = vmatmul.mubr.msk.bf16.gmra.mxu0 %vm520_vm2, %v3387_v42  ;;  %5037 = vmatprep.mubr.msk.bf16.mxu1 %vm520_vm2, %v3002_v32  ;;  %v3027_v54 = vrot.slane %v3025_v1, 3  ;;  %v3396_v32 = vrot.slane %v6056_v8, 3  ;;  %v3043_v3 = vshll.u32 %v6112_v56, 16 }
 0x131   : > { %v6295_v46 = vadd.f32 %v4853_v63, %v902_v16  ;;  %5071 = vmatprep.mubr.msk.bf16.mxu0 %vm520_vm2, %v3389_v41  ;;  %v909_v33 = vpop.f32.mrf.mxu1  ;;  %v3034_v16 = vshll.u32 %v6088_v49, 16  ;;  %v3393_v61 = vsel %vm3378_vm6, %v3390_v11, %v3392_v17  ;;  %v3020_v18 = vsel %vm2931_vm7, %v3010_v45, %v3019_v10 }
 0x132   : > { %v1171_v37 = vpop.f32.mrf.mxu0  ;;  %v910_v9 = vadd.f32 %v909_v33, %v6042_v38  ;;  %v3028_v38 = vor.u32 %v3027_v54, %v3024_v44  ;;  %v3049_v45 = vshrl.u32 %v6120_v4, 16 }
 0x133   : > { %v6301_v13 = vadd.f32 %v1171_v37, %v894_v58  ;;  %v4820_v30 = vpop.f32.mrf.mxu1  ;;  %v918_v58 = vadd.f32 %v4819_v62, %v6033_v52  ;;  %v3036_v48 = vrot.slane %v3034_v16, 3  ;;  %v3394_v52 = vrot.slane %v6048_v20, 3 }
 0x134   : > { %v4854_v43 = vpop.f32.mrf.mxu0  ;;  %v3042_v16 = vrot.slane %v3040_v51, 2  ;;  %v3051_v44 = vrot.slane %v3049_v45, 2 }
 0x135   : > { %v6308_v28 = vadd.f32 %v4854_v43, %v905_v0  ;;  %v912_v41 = vpop.f32.mrf.mxu1  ;;  %v3033_v0 = vrot.slane %v3031_v14, 2  ;;  %v3395_v33 = vsel %vm3378_vm6, %v3392_v17, %v3394_v52  ;;  %v3397_v14 = vsel %vm3378_vm6, %v3394_v52, %v3396_v32 }
 0x136   : > { %v1174_v50 = vpop.f32.mrf.mxu0  ;;  %v913_v8 = vadd.f32 %v912_v41, %v6058_v25  ;;  %v3054_v17 = vrot.slane %v3052_v36, 3 }
 0x137   : > { %v6314_v42 = vadd.f32 %v1174_v50, %v897_v23  ;;  %v4823_v59 = vpop.f32.mrf.mxu1  ;;  %5038 = vmatmul.mubr.msk.bf16.gmra.mxu1 %vm520_vm2, %v3011_v39  ;;  %v921_v23 = vadd.f32 %v4820_v30, %v6050_v7  ;;  %v3037_v20 = vor.u32 %v3036_v48, %v3033_v0  ;;  %v3029_v39 = vsel %vm2931_vm7, %v3019_v10, %v3028_v38  ;;  %v7000_v48 = vld [vmem:[#allocation7_spill] sm:$0xff] }
 0x138   : > { %v4857_v24 = vpop.f32.mrf.mxu0  ;;  %5072 = vmatmul.mubr.msk.bf16.gmra.mxu0 %vm520_vm2, %v3391_v26  ;;  %5041 = vmatprep.mubr.msk.bf16.mxu1 %vm520_vm2, %v3020_v18  ;;  %v3045_v26 = vrot.slane %v3043_v3, 3  ;;  %v934_v30 = vadd.f32 %v4823_v59, %v6065_v34  ;;  %v3398_v34 = vrot.slane %v6080_v53, 3  ;;  %v3400_v0 = vrot.slane %v6088_v49, 3 }
 0x139   : > { %v6319_v47 = vadd.f32 %v4857_v24, %v918_v58  ;;  %5075 = vmatprep.mubr.msk.bf16.mxu0 %vm520_vm2, %v3393_v61  ;;  %v925_v62 = vpop.f32.mrf.mxu1  ;;  %v3038_v25 = vsel %vm2931_vm7, %v3028_v38, %v3037_v20  ;;  %v3055_v53 = vor.u32 %v3054_v17, %v3051_v44  ;;  %v7005_v17 = vld [vmem:[#allocation10_spill] sm:$0xff] }
 0x13a   : > { %v1187_v63 = vpop.f32.mrf.mxu0  ;;  %v926_v54 = vadd.f32 %v925_v62, %v6074_v35  ;;  %v3046_v18 = vor.u32 %v3045_v26, %v3042_v16  ;;  %v7001_v35 = vld [vmem:[#allocation15_spill] sm:$0xff]  ;;  %v3399_v36 = vsel %vm3378_vm6, %v3396_v32, %v3398_v34 }
 0x13b   : > { %v6328_v11 = vadd.f32 %v1187_v63, %v910_v9  ;;  %v4824_v43 = vpop.f32.mrf.mxu1  ;;  %v3058_v59 = vshrl.u32 %v7001_v35, 16  ;;  %v3061_v63 = vshll.u32 %v7001_v35, 16 }
 0x13c   : > { %v4858_v37 = vpop.f32.mrf.mxu0  ;;  %v937_v9 = vadd.f32 %v4824_v43, %v7000_v48  ;;  %v3047_v43 = vsel %vm2931_vm7, %v3037_v20, %v3046_v18  ;;  %v3402_v20 = vrot.slane %v6112_v56, 3  ;;  %v3404_v48 = vrot.slane %v6120_v4, 3  ;;  %v7008_v4 = vld [vmem:[#allocation12_spill] sm:$0xff] }
 0x13d   : > { %v6334_v1 = vadd.f32 %v4858_v37, %v921_v23  ;;  %v928_v61 = vpop.f32.mrf.mxu1  ;;  %v7002_v23 = vld [vmem:[#allocation17_spill] sm:$0xff]  ;;  %v7003_v37 = vld [vmem:[#allocation8_spill] sm:$0xff] }
 0x13e   : > { %v1190_v7 = vpop.f32.mrf.mxu0  ;;  %v3067_v38 = vshrl.u32 %v7002_v23, 16  ;;  %v3070_v62 = vshll.u32 %v7002_v23, 16  ;;  %v929_v45 = vadd.f32 %v928_v61, %v7003_v37  ;;  %v3056_v61 = vsel %vm2931_vm7, %v3046_v18, %v3055_v53  ;;  %v7007_v37 = vld [vmem:[#allocation19_spill] sm:$0xff] }
 0x13f   : > { %v6339_v50 = vadd.f32 %v1190_v7, %v913_v8  ;;  %v4827_v24 = vpop.f32.mrf.mxu1  ;;  %5042 = vmatmul.mubr.msk.bf16.gmra.mxu1 %vm520_vm2, %v3029_v39  ;;  %v3401_v7 = vsel %vm3378_vm6, %v3398_v34, %v3400_v0  ;;  %v3063_v39 = vrot.slane %v3061_v63, 3  ;;  %v3079_v18 = vshll.u32 %v6178_v57, 16 }
 0x140   : > { %v4861_v58 = vpop.f32.mrf.mxu0  ;;  %5076 = vmatmul.mubr.msk.bf16.gmra.mxu0 %vm520_vm2, %v3395_v33  ;;  %5045 = vmatprep.mubr.msk.bf16.mxu1 %vm520_vm2, %v3038_v25  ;;  %v3069_v44 = vrot.slane %v3067_v38, 2  ;;  %v3072_v32 = vrot.slane %v3070_v62, 3 }
 0x141   : > { %v6345_v41 = vadd.f32 %v4861_v58, %v934_v30  ;;  %5079 = vmatprep.mubr.msk.bf16.mxu0 %vm520_vm2, %v3397_v14  ;;  %v941_v51 = vpop.f32.mrf.mxu1  ;;  %v7004_v14 = vld [vmem:[#allocation9_spill] sm:$0xff]  ;;  %v3060_v30 = vrot.slane %v3058_v59, 2  ;;  %v7006_v59 = vld [vmem:[#allocation11_spill] sm:$0xff] }
 0x142   : > { %v1203_v10 = vpop.f32.mrf.mxu0  ;;  %v950_v16 = vadd.f32 %v4827_v24, %v7004_v14  ;;  %v3073_v62 = vor.u32 %v3072_v32, %v3069_v44 }
 0x143   : > { %v6352_v52 = vadd.f32 %v1203_v10, %v926_v54  ;;  %v4828_v8 = vpop.f32.mrf.mxu1  ;;  %v942_v54 = vadd.f32 %v941_v51, %v7005_v17  ;;  %v3064_v51 = vor.u32 %v3063_v39, %v3060_v30  ;;  %v6391_v30 = vld [vmem:[%s5414_s14 + $0xa0] ss:$0 sps:$4 sm:$0x77]   ;;  %v7009_v39 = vld [vmem:[#allocation13_spill] sm:$0xff]  ;;  %s4231_s14 = sshll.u32 %s222_s13, 7 }
 0x144   : > { %v4862_v3 = vpop.f32.mrf.mxu0  ;;  %v953_v63 = vadd.f32 %v4828_v8, %v7006_v59  ;;  %s6676_s15 = scalar_lea.vmem [#allocation4], %s4231_s14 }
 0x145   : > { %v6360_v49 = vadd.f32 %v4862_v3, %v937_v9  ;;  %v944_v58 = vpop.f32.mrf.mxu1  ;;  %v3076_v9 = vshrl.u32 %v6178_v57, 16  ;;  %v3065_v17 = vsel %vm2931_vm7, %v3055_v53, %v3064_v51  ;;  %s4134_s3 = sshll.u32 %s6676_s15, 4  ;;  %s6909_s3 = int_to_ptr.vmem [resolvable:$true] %s4134_s3 }
 0x146   : > { %v1206_v33 = vpop.f32.mrf.mxu0  ;;  %s5231_s30 = scalar_lea.vmem %s6909_s3, 2048  ;;  %p5238_p1 = scmp.lt.s32.totalorder %s6909_s3, %s5236_s6 }
 0x147   : > { %v6366_v26 = vadd.f32 %v1206_v33, %v929_v45  ;;  %v4831_v34 = vpop.f32.mrf.mxu1  ;;  %5046 = vmatmul.mubr.msk.bf16.gmra.mxu1 %vm520_vm2, %v3047_v43  ;;  %v3085_v45 = vshrl.u32 %v7007_v37, 16  ;;  %v945_v33 = vadd.f32 %v944_v58, %v7008_v4  ;;  %v3408_v4 = vrot.slane %v7002_v23, 3  ;;  %p5232_p12 = scmp.ne.s32.totalorder %s6909_s3, %s5231_s30  ;;  %p5239_p2 = scmp.lt.s32.totalorder %s5237_s7, %s5231_s30 }
 0x148   : > { %v4865_v25 = vpop.f32.mrf.mxu0  ;;  %5080 = vmatmul.mubr.msk.bf16.gmra.mxu0 %vm520_vm2, %v3399_v36  ;;  %5049 = vmatprep.mubr.msk.bf16.mxu1 %vm520_vm2, %v3056_v61  ;;  %v3088_v36 = vshll.u32 %v7007_v37, 16  ;;  %v3081_v61 = vrot.slane %v3079_v18, 3  ;;  %v966_v44 = vadd.f32 %v4831_v34, %v7009_v39  ;;  %v3406_v34 = vrot.slane %v7001_v35, 3 }
 0x149   : > { %v6371_v10 = vadd.f32 %v4865_v25, %v950_v16  ;;  %5083 = vmatprep.mubr.msk.bf16.mxu0 %vm520_vm2, %v3401_v7  ;;  %v957_v38 = vpop.f32.mrf.mxu1  ;;  %v3403_v7 = vsel %vm3378_vm6, %v3400_v0, %v3402_v20  ;;  %v3405_v16 = vsel %vm3378_vm6, %v3402_v20, %v3404_v48  ;;  %v3078_v25 = vrot.slane %v3076_v9, 2  ;;  %p5233_p13 = pnand %p5232_p12, %p5380_p4  ;;  %p5240_p3 = por %p5239_p2, %p5238_p1 }
 0x14a   : > { %v1219_v24 = vpop.f32.mrf.mxu0  ;;  %v3074_v0 = vsel %vm2931_vm7, %v3064_v51, %v3073_v62  ;;  %v3090_v59 = vrot.slane %v3088_v36, 3  ;;  %v7011_v51 = vld [vmem:[#allocation16_spill] sm:$0xff] }
 0x14b   : > { %v6380_v3 = vadd.f32 %v1219_v24, %v942_v54  ;;  %v4832_v8 = vpop.f32.mrf.mxu1  ;;  %v3087_v24 = vrot.slane %v3085_v45, 2  ;;  %v7012_v36 = vld [vmem:[#allocation20_spill] sm:$0xff]  ;;  %p5234_p0 = pneg %p5233_p13 }
 0x14c   : > { %v4866_v56 = vpop.f32.mrf.mxu0  ;;  %v969_v45 = vadd.f32 %v4832_v8, %v7011_v51 }
 0x14d   : > { %v6386_v43 = vadd.f32 %v4866_v56, %v953_v63  ;;  %v960_v54 = vpop.f32.mrf.mxu1  ;;  %v7010_v63 = vld [vmem:[#allocation14_spill] sm:$0xff]  ;;  %v3082_v56 = vor.u32 %v3081_v61, %v3078_v25  ;;  %v3091_v39 = vor.u32 %v3090_v59, %v3087_v24  ;;  %v7014_v25 = vld [vmem:[#allocation21_spill] sm:$0xff]  ;;  %p5241_p5 = pnand %p5240_p3, %p5234_p0 }
 0x14e   : > { %v1222_v14 = vpop.f32.mrf.mxu0  ;;  %v958_v20 = vadd.f32 %v957_v38, %v7010_v63 }
 0x14f   : > { %v6394_v32 = vadd.f32 %v1222_v14, %v945_v33  ;;  %v4875_v18 = vpop.f32.mrf.mxu1  ;;  %5050 = vmatmul.mubr.msk.bf16.gmra.mxu1 %vm520_vm2, %v3065_v17  ;;  %v3094_v33 = vshrl.u32 %v6391_v30, 16  ;;  %v3097_v14 = vshll.u32 %v6391_v30, 16 }
 0x150   : > { %v4869_v58 = vpop.f32.mrf.mxu0  ;;  %5084 = vmatmul.mubr.msk.bf16.gmra.mxu0 %vm520_vm2, %v3403_v7  ;;  %v1691_v7 = vadd.f32 %v4875_v18, %v7012_v36  ;;  %5053 = vmatprep.mubr.msk.bf16.mxu1 %vm520_vm2, %v3074_v0  ;;  %v3409_v18 = vsel %vm3378_vm6, %v3406_v34, %v3408_v4 }
 0x151   : > { %v6400_v9 = vadd.f32 %v4869_v58, %v966_v44  ;;  %5087 = vmatprep.mubr.msk.bf16.mxu0 %vm520_vm2, %v3405_v16  ;;  %v1546_v35 = vpop.f32.mrf.mxu1  ;;  %v7013_v44 = vld [vmem:[#allocation18_spill] sm:$0xff]  ;;  %v3407_v58 = vsel %vm3378_vm6, %v3404_v48, %v3406_v34  ;;  %v3096_v51 = vrot.slane %v3094_v33, 2  ;;  %v3099_v24 = vrot.slane %v3097_v14, 3 }
 0x152   : > { %v1235_v53 = vpop.f32.mrf.mxu0  ;;  %v961_v17 = vadd.f32 %v960_v54, %v7013_v44  ;;  %v1689_v61 = vadd.f32 %v1546_v35, %v7014_v25  ;;  %v3412_v33 = vrot.slane %v7007_v37, 3 }
 0x153   : > { %v6409_v38 = vadd.f32 %v1235_v53, %v958_v20  ;;  %v4876_v8 = vpop.f32.mrf.mxu1  ;;  %v3083_v20 = vsel %vm2931_vm7, %v3073_v62, %v3082_v56  ;;  %v3410_v62 = vrot.slane %v6178_v57, 3 }
 0x154   : > { %v4870_v16 = vpop.f32.mrf.mxu0  ;;  %v1692_v0 = vadd.f32 %v4876_v8, %v6206_v19 }
 0x155   : > { %v6415_v23 = vadd.f32 %v4870_v16, %v969_v45  ;;  %v1549_v59 = vpop.f32.mrf.mxu1  ;;  %v3092_v45 = vsel %vm2931_vm7, %v3082_v56, %v3091_v39  ;;  %v3100_v56 = vor.u32 %v3099_v24, %v3096_v51  ;;  %v3411_v57 = vsel %vm3378_vm6, %v3408_v4, %v3410_v62 }
 0x156   : > { %v1238_v63 = vpop.f32.mrf.mxu0  ;;  %v1690_v48 = vadd.f32 %v1549_v59, %v6212_v21  ;;  %v3414_v4 = vrot.slane %v6391_v30, 3 }
 0x157   : > { %v6421_v53 = vadd.f32 %v1238_v63, %v961_v17  ;;  %v4879_v34 = vpop.f32.mrf.mxu1  ;;  %5054 = vmatmul.mubr.msk.bf16.gmra.mxu1 %vm520_vm2, %v3083_v20 }
 0x158   : > { %v4913_v54 = vpop.f32.mrf.mxu0  ;;  %5088 = vmatmul.mubr.msk.bf16.gmra.mxu0 %vm520_vm2, %v3407_v58  ;;  %v1695_v14 = vadd.f32 %v4879_v34, %v6217_v15  ;;  %5057 = vmatprep.mubr.msk.bf16.mxu1 %vm520_vm2, %v3092_v45  ;;  %v3413_v58 = vsel %vm3378_vm6, %v3410_v62, %v3412_v33 }
 0x159   : > { %v6426_v36 = vadd.f32 %v4913_v54, %v1691_v7  ;;  %5091 = vmatprep.mubr.msk.bf16.mxu0 %vm520_vm2, %v3409_v18  ;;  %v1562_v21 = vpop.f32.mrf.mxu1 }
 0x15a   : > { %v1993_v19 = vpop.f32.mrf.mxu0  ;;  %v1693_v16 = vadd.f32 %v1562_v21, %v6225_v6 }
 0x15b   : > { %v6433_v35 = vadd.f32 %v1993_v19, %v1689_v61  ;;  %v4880_v17 = vpop.f32.mrf.mxu1  ;;  %v3101_v61 = vsel %vm2931_vm7, %v3091_v39, %v3100_v56 }
 0x15c   : > { %v4914_v7 = vpop.f32.mrf.mxu0  ;;  %v1696_v37 = vadd.f32 %v4880_v17, %v6231_v22 }
 0x15d   : > { %v6437_v44 = vadd.f32 %v4914_v7, %v1692_v0  ;;  %v1565_v8 = vpop.f32.mrf.mxu1 }
 0x15e   : > { %v1996_v25 = vpop.f32.mrf.mxu0  ;;  %v1694_v6 = vadd.f32 %v1565_v8, %v6235_v55  ;;  %v3415_v55 = vsel %vm3378_vm6, %v3412_v33, %v3414_v4 }
 0x15f   : > { %v6442_v15 = vadd.f32 %v1996_v25, %v1690_v48  ;;  %v4883_v18 = vpop.f32.mrf.mxu1  ;;  %5058 = vmatmul.mubr.msk.bf16.gmra.mxu1 %vm520_vm2, %v3101_v61 }
 0x160   : > { %v4917_v63 = vpop.f32.mrf.mxu0  ;;  %5092 = vmatmul.mubr.msk.bf16.gmra.mxu0 %vm520_vm2, %v3411_v57  ;;  %v1699_v0 = vadd.f32 %v4883_v18, %v6241_v40 }
 0x161   : > { %v6447_v20 = vadd.f32 %v4917_v63, %v1695_v14  ;;  %5095 = vmatprep.mubr.msk.bf16.mxu0 %vm520_vm2, %v3413_v58  ;;  %v1578_v39 = vpop.f32.mrf.mxu1 }
 0x162   : > { %v2009_v22 = vpop.f32.mrf.mxu0  ;;  %v1697_v59 = vadd.f32 %v1578_v39, %v6248_v29 }
 0x163   : > { %v6453_v51 = vadd.f32 %v2009_v22, %v1693_v16  ;;  %v4884_v45 = vpop.f32.mrf.mxu1 }
 0x164   : > { %v4918_v24 = vpop.f32.mrf.mxu0  ;;  %v1700_v30 = vadd.f32 %v4884_v45, %v6256_v2 }
 0x165   : > { %v6456_v54 = vadd.f32 %v4918_v24, %v1696_v37  ;;  %v1581_v34 = vpop.f32.mrf.mxu1 }
 0x166   : > { %v2012_v48 = vpop.f32.mrf.mxu0  ;;  %v1698_v40 = vadd.f32 %v1581_v34, %v6263_v12 }
 0x167   : > { %v6460_v62 = vadd.f32 %v2012_v48, %v1694_v6  ;;  %v4887_v56 = vpop.f32.mrf.mxu1 }
 0x168   : > { %v4921_v19 = vpop.f32.mrf.mxu0  ;;  %5096 = vmatmul.mubr.msk.bf16.gmra.mxu0 %vm520_vm2, %v3415_v55  ;;  %v1703_v21 = vadd.f32 %v4887_v56, %v6269_v27 }
 0x169   : > { %v6464_v14 = vadd.f32 %v4921_v19, %v1699_v0  ;;  %v1594_v33 = vpop.f32.mrf.mxu1 }
 0x16a   : > { %v2025_v29 = vpop.f32.mrf.mxu0  ;;  %v1701_v2 = vadd.f32 %v1594_v33, %v6278_v5 }
 0x16b   : > { %v6467_v7 = vadd.f32 %v2025_v29, %v1697_v59  ;;  %v4888_v17 = vpop.f32.mrf.mxu1 }
 0x16c   : > { %v4922_v16 = vpop.f32.mrf.mxu0  ;;  %v1704_v58 = vadd.f32 %v4888_v17, %v6284_v60 }
 0x16d   : > { %v6470_v57 = vadd.f32 %v4922_v16, %v1700_v30  ;;  %v1597_v12 = vpop.f32.mrf.mxu1 }
 0x16e   : > { %v2028_v25 = vpop.f32.mrf.mxu0  ;;  %v1702_v8 = vadd.f32 %v1597_v12, %v6289_v31 }
 0x16f   : > { %v6473_v37 = vadd.f32 %v2028_v25, %v1698_v40  ;;  %v4891_v27 = vpop.f32.mrf.mxu1 }
 0x170   : > { %v4925_v61 = vpop.f32.mrf.mxu0  ;;  %v1707_v4 = vadd.f32 %v4891_v27, %v6295_v46 }
 0x171   : > { %v6476_v63 = vadd.f32 %v4925_v61, %v1703_v21  ;;  %v1610_v5 = vpop.f32.mrf.mxu1 }
 0x172   : > { %v2041_v6 = vpop.f32.mrf.mxu0  ;;  %v1705_v0 = vadd.f32 %v1610_v5, %v6301_v13 }
 0x173   : > { %v6479_v18 = vadd.f32 %v2041_v6, %v1701_v2  ;;  %v4892_v60 = vpop.f32.mrf.mxu1 }
 0x174   : > { %v4926_v22 = vpop.f32.mrf.mxu0  ;;  %v1708_v59 = vadd.f32 %v4892_v60, %v6308_v28 }
 0x175   : > { %v6482_v39 = vadd.f32 %v4926_v22, %v1704_v58  ;;  %v1613_v31 = vpop.f32.mrf.mxu1 }
 0x176   : > { %v2044_v24 = vpop.f32.mrf.mxu0  ;;  %v1706_v48 = vadd.f32 %v1613_v31, %v6314_v42 }
 0x177   : > { %v6485_v55 = vadd.f32 %v2044_v24, %v1702_v8  ;;  %v4895_v46 = vpop.f32.mrf.mxu1 }
 0x178   : > { %v4929_v45 = vpop.f32.mrf.mxu0  ;;  %v1711_v19 = vadd.f32 %v4895_v46, %v6319_v47 }
 0x179   : > { %v6488_v30 = vadd.f32 %v4929_v45, %v1707_v4  ;;  %v1626_v13 = vpop.f32.mrf.mxu1 }
 0x17a   : > { %v2057_v34 = vpop.f32.mrf.mxu0  ;;  %v1709_v29 = vadd.f32 %v1626_v13, %v6328_v11 }
 0x17b   : > { %v6491_v40 = vadd.f32 %v2057_v34, %v1705_v0  ;;  %v4896_v28 = vpop.f32.mrf.mxu1 }
 0x17c   : > { %v4930_v56 = vpop.f32.mrf.mxu0  ;;  %v1712_v16 = vadd.f32 %v4896_v28, %v6334_v1 }
 0x17d   : > { %v6494_v21 = vadd.f32 %v4930_v56, %v1708_v59  ;;  %v1629_v42 = vpop.f32.mrf.mxu1 }
 0x17e   : > { %v2060_v33 = vpop.f32.mrf.mxu0  ;;  %v1710_v25 = vadd.f32 %v1629_v42, %v6339_v50 }
 0x17f   : > { %v6497_v2 = vadd.f32 %v2060_v33, %v1706_v48  ;;  %v4899_v47 = vpop.f32.mrf.mxu1 }
 0x180   : > { %v4933_v17 = vpop.f32.mrf.mxu0  ;;  %v1715_v61 = vadd.f32 %v4899_v47, %v6345_v41 }
 0x181   : > { %v6500_v58 = vadd.f32 %v4933_v17, %v1711_v19  ;;  %v1642_v11 = vpop.f32.mrf.mxu1 }
 0x182   : > { %v2073_v12 = vpop.f32.mrf.mxu0  ;;  %v1713_v6 = vadd.f32 %v1642_v11, %v6352_v52 }
 0x183   : > { %v6503_v8 = vadd.f32 %v2073_v12, %v1709_v29  ;;  %v4900_v1 = vpop.f32.mrf.mxu1 }
 0x184   : > { %v4934_v27 = vpop.f32.mrf.mxu0  ;;  %v1716_v22 = vadd.f32 %v4900_v1, %v6360_v49 }
 0x185   : > { %v6506_v4 = vadd.f32 %v4934_v27, %v1712_v16  ;;  %v1645_v50 = vpop.f32.mrf.mxu1 }
 0x186   : > { %v2076_v5 = vpop.f32.mrf.mxu0  ;;  %v1714_v24 = vadd.f32 %v1645_v50, %v6366_v26 }
 0x187   : > { %v6509_v0 = vadd.f32 %v2076_v5, %v1710_v25  ;;  %v4903_v41 = vpop.f32.mrf.mxu1 }
 0x188   : > { %v4937_v60 = vpop.f32.mrf.mxu0  ;;  %v1719_v45 = vadd.f32 %v4903_v41, %v6371_v10 }
 0x189   : > { %v6512_v59 = vadd.f32 %v4937_v60, %v1715_v61  ;;  %v1658_v52 = vpop.f32.mrf.mxu1 }
 0x18a   : > { %v2089_v31 = vpop.f32.mrf.mxu0  ;;  %v1717_v34 = vadd.f32 %v1658_v52, %v6380_v3 }
 0x18b   : > { %v6515_v48 = vadd.f32 %v2089_v31, %v1713_v6  ;;  %v4904_v49 = vpop.f32.mrf.mxu1 }
 0x18c   : > { %v4938_v46 = vpop.f32.mrf.mxu0  ;;  %v1720_v56 = vadd.f32 %v4904_v49, %v6386_v43 }
 0x18d   : > { %v6518_v19 = vadd.f32 %v4938_v46, %v1716_v22  ;;  %v1661_v26 = vpop.f32.mrf.mxu1 }
 0x18e   : > { %v2092_v13 = vpop.f32.mrf.mxu0  ;;  %v1718_v33 = vadd.f32 %v1661_v26, %v6394_v32 }
 0x18f   : > { %v6521_v29 = vadd.f32 %v2092_v13, %v1714_v24  ;;  %v4907_v10 = vpop.f32.mrf.mxu1 }
 0x190   : > { %v4941_v28 = vpop.f32.mrf.mxu0  ;;  %v1723_v17 = vadd.f32 %v4907_v10, %v6400_v9 }
 0x191   : > { %v6524_v16 = vadd.f32 %v4941_v28, %v1719_v45  ;;  %v1674_v3 = vpop.f32.mrf.mxu1 }
 0x192   : > { %v2105_v42 = vpop.f32.mrf.mxu0  ;;  %v1721_v12 = vadd.f32 %v1674_v3, %v6409_v38 }
 0x193   : > { %v6527_v25 = vadd.f32 %v2105_v42, %v1717_v34  ;;  %v4908_v43 = vpop.f32.mrf.mxu1 }
 0x194   : > { %v4942_v47 = vpop.f32.mrf.mxu0  ;;  %v1724_v27 = vadd.f32 %v4908_v43, %v6415_v23 }
 0x195   : > { %v6530_v61 = vadd.f32 %v4942_v47, %v1720_v56  ;;  %v1677_v32 = vpop.f32.mrf.mxu1 }
 0x196   : > { %v2108_v11 = vpop.f32.mrf.mxu0  ;;  %v1722_v5 = vadd.f32 %v1677_v32, %v6421_v53 }
 0x197   : > { %v6533_v6 = vadd.f32 %v2108_v11, %v1718_v33  ;;  %v4951_v9 = vpop.f32.mrf.mxu1 }
 0x198   : > { %v4945_v1 = vpop.f32.mrf.mxu0  ;;  %v2452_v60 = vadd.f32 %v4951_v9, %v6426_v36 }
 0x199   : > { %v6536_v22 = vadd.f32 %v4945_v1, %v1723_v17  ;;  %v2307_v38 = vpop.f32.mrf.mxu1 }
 0x19a   : > { %v2121_v50 = vpop.f32.mrf.mxu0  ;;  %v2450_v31 = vadd.f32 %v2307_v38, %v6433_v35 }
 0x19b   : > { %v6539_v24 = vadd.f32 %v2121_v50, %v1721_v12  ;;  %v4952_v23 = vpop.f32.mrf.mxu1 }
 0x19c   : > { %v4946_v41 = vpop.f32.mrf.mxu0  ;;  %v2453_v46 = vadd.f32 %v4952_v23, %v6437_v44 }
 0x19d   : > { %v6542_v45 = vadd.f32 %v4946_v41, %v1724_v27  ;;  %v2310_v53 = vpop.f32.mrf.mxu1 }
 0x19e   : > { %v2124_v52 = vpop.f32.mrf.mxu0  ;;  %v2451_v13 = vadd.f32 %v2310_v53, %v6442_v15 }
 0x19f   : > { %v6545_v34 = vadd.f32 %v2124_v52, %v1722_v5  ;;  %v4955_v36 = vpop.f32.mrf.mxu1 }
 0x1a0   : > { %v4989_v49 = vpop.f32.mrf.mxu0  ;;  %v2456_v28 = vadd.f32 %v4955_v36, %v6447_v20 }
 0x1a1   : > { %v6548_v56 = vadd.f32 %v4989_v49, %v2452_v60  ;;  %v2323_v35 = vpop.f32.mrf.mxu1 }
 0x1a2   : > { %v2746_v26 = vpop.f32.mrf.mxu0  ;;  %v2454_v42 = vadd.f32 %v2323_v35, %v6453_v51 }
 0x1a3   : > { %v6551_v33 = vadd.f32 %v2746_v26, %v2450_v31  ;;  %v4956_v44 = vpop.f32.mrf.mxu1 }
 0x1a4   : > { %v4990_v10 = vpop.f32.mrf.mxu0  ;;  %v2457_v47 = vadd.f32 %v4956_v44, %v6456_v54 }
 0x1a5   : > { %v6554_v17 = vadd.f32 %v4990_v10, %v2453_v46  ;;  %v2326_v15 = vpop.f32.mrf.mxu1 }
 0x1a6   : > { %v2749_v3 = vpop.f32.mrf.mxu0  ;;  %v2455_v11 = vadd.f32 %v2326_v15, %v6460_v62 }
 0x1a7   : > { %v6557_v12 = vadd.f32 %v2749_v3, %v2451_v13  ;;  %v4959_v20 = vpop.f32.mrf.mxu1 }
 0x1a8   : > { %v4993_v43 = vpop.f32.mrf.mxu0  ;;  %v2460_v1 = vadd.f32 %v4959_v20, %v6464_v14 }
 0x1a9   : > { %v6560_v27 = vadd.f32 %v4993_v43, %v2456_v28  ;;  %v2339_v51 = vpop.f32.mrf.mxu1 }
 0x1aa   : > { %v2762_v32 = vpop.f32.mrf.mxu0  ;;  %v2458_v50 = vadd.f32 %v2339_v51, %v6467_v7 }
 0x1ab   : > { %v6563_v5 = vadd.f32 %v2762_v32, %v2454_v42  ;;  %v4960_v54 = vpop.f32.mrf.mxu1 }
 0x1ac   : > { %v4994_v9 = vpop.f32.mrf.mxu0  ;;  %v2461_v41 = vadd.f32 %v4960_v54, %v6470_v57 }
 0x1ad   : > { %v6566_v60 = vadd.f32 %v4994_v9, %v2457_v47  ;;  %v2342_v62 = vpop.f32.mrf.mxu1 }
 0x1ae   : > { %v2765_v38 = vpop.f32.mrf.mxu0  ;;  %v2459_v52 = vadd.f32 %v2342_v62, %v6473_v37 }
 0x1af   : > { %v6569_v31 = vadd.f32 %v2765_v38, %v2455_v11  ;;  %v4963_v14 = vpop.f32.mrf.mxu1 }
 0x1b0   : > { %v4997_v23 = vpop.f32.mrf.mxu0  ;;  %v2464_v49 = vadd.f32 %v4963_v14, %v6476_v63 }
 0x1b1   : > { %v6572_v46 = vadd.f32 %v4997_v23, %v2460_v1  ;;  %v2355_v7 = vpop.f32.mrf.mxu1 }
 0x1b2   : > { %v2778_v53 = vpop.f32.mrf.mxu0  ;;  %v2462_v26 = vadd.f32 %v2355_v7, %v6479_v18 }
 0x1b3   : > { %v6575_v13 = vadd.f32 %v2778_v53, %v2458_v50  ;;  %v4964_v57 = vpop.f32.mrf.mxu1 }
 0x1b4   : > { %v4998_v36 = vpop.f32.mrf.mxu0  ;;  %v2465_v10 = vadd.f32 %v4964_v57, %v6482_v39 }
 0x1b5   : > { %v6578_v28 = vadd.f32 %v4998_v36, %v2461_v41  ;;  %v2358_v37 = vpop.f32.mrf.mxu1 }
 0x1b6   : > { %v2781_v35 = vpop.f32.mrf.mxu0  ;;  %v2463_v3 = vadd.f32 %v2358_v37, %v6485_v55 }
 0x1b7   : > { %v6581_v42 = vadd.f32 %v2781_v35, %v2459_v52  ;;  %v4967_v63 = vpop.f32.mrf.mxu1 }
 0x1b8   : > { %v5001_v44 = vpop.f32.mrf.mxu0  ;;  %v2468_v43 = vadd.f32 %v4967_v63, %v6488_v30 }
 0x1b9   : > { %v6584_v47 = vadd.f32 %v5001_v44, %v2464_v49  ;;  %v2371_v18 = vpop.f32.mrf.mxu1 }
 0x1ba   : > { %v2794_v15 = vpop.f32.mrf.mxu0  ;;  %v2466_v32 = vadd.f32 %v2371_v18, %v6491_v40 }
 0x1bb   : > { %v6587_v11 = vadd.f32 %v2794_v15, %v2462_v26  ;;  %v4968_v39 = vpop.f32.mrf.mxu1 }
 0x1bc   : > { %v5002_v20 = vpop.f32.mrf.mxu0  ;;  %v2469_v9 = vadd.f32 %v4968_v39, %v6494_v21 }
 0x1bd   : > { %v6590_v1 = vadd.f32 %v5002_v20, %v2465_v10  ;;  %v2374_v55 = vpop.f32.mrf.mxu1 }
 0x1be   : > { %v2797_v51 = vpop.f32.mrf.mxu0  ;;  %v2467_v38 = vadd.f32 %v2374_v55, %v6497_v2 }
 0x1bf   : > { %v6593_v50 = vadd.f32 %v2797_v51, %v2463_v3  ;;  %v4971_v30 = vpop.f32.mrf.mxu1 }
 0x1c0   : > { %v5005_v54 = vpop.f32.mrf.mxu0  ;;  %v2472_v23 = vadd.f32 %v4971_v30, %v6500_v58 }
 0x1c1   : > { %v6596_v41 = vadd.f32 %v5005_v54, %v2468_v43  ;;  %v2387_v40 = vpop.f32.mrf.mxu1 }
 0x1c2   : > { %v2810_v62 = vpop.f32.mrf.mxu0  ;;  %v2470_v53 = vadd.f32 %v2387_v40, %v6503_v8 }
 0x1c3   : > { %v6599_v52 = vadd.f32 %v2810_v62, %v2466_v32  ;;  %v4972_v21 = vpop.f32.mrf.mxu1 }
 0x1c4   : > { %v5006_v14 = vpop.f32.mrf.mxu0  ;;  %v2473_v36 = vadd.f32 %v4972_v21, %v6506_v4 }
 0x1c5   : > { %v6602_v49 = vadd.f32 %v5006_v14, %v2469_v9  ;;  %v2390_v2 = vpop.f32.mrf.mxu1 }
 0x1c6   : > { %v2813_v7 = vpop.f32.mrf.mxu0  ;;  %v2471_v35 = vadd.f32 %v2390_v2, %v6509_v0 }
 0x1c7   : > { %v6605_v26 = vadd.f32 %v2813_v7, %v2467_v38  ;;  %v4975_v58 = vpop.f32.mrf.mxu1 }
 0x1c8   : > { %v5009_v57 = vpop.f32.mrf.mxu0  ;;  %v2476_v44 = vadd.f32 %v4975_v58, %v6512_v59 }
 0x1c9   : > { %v6608_v10 = vadd.f32 %v5009_v57, %v2472_v23  ;;  %v2403_v8 = vpop.f32.mrf.mxu1 }
 0x1ca   : > { %v2826_v37 = vpop.f32.mrf.mxu0  ;;  %v2474_v15 = vadd.f32 %v2403_v8, %v6515_v48 }
 0x1cb   : > { %v6611_v3 = vadd.f32 %v2826_v37, %v2470_v53  ;;  %v4976_v4 = vpop.f32.mrf.mxu1 }
 0x1cc   : > { %v5010_v63 = vpop.f32.mrf.mxu0  ;;  %v2477_v20 = vadd.f32 %v4976_v4, %v6518_v19 }
 0x1cd   : > { %v6614_v43 = vadd.f32 %v5010_v63, %v2473_v36  ;;  %v2406_v0 = vpop.f32.mrf.mxu1 }
 0x1ce   : > { %v2829_v18 = vpop.f32.mrf.mxu0  ;;  %v2475_v51 = vadd.f32 %v2406_v0, %v6521_v29 }
 0x1cf   : > { %v6617_v32 = vadd.f32 %v2829_v18, %v2471_v35  ;;  %v4979_v59 = vpop.f32.mrf.mxu1 }
 0x1d0   : > { %v5013_v39 = vpop.f32.mrf.mxu0  ;;  %v2480_v54 = vadd.f32 %v4979_v59, %v6524_v16 }
 0x1d1   : > { %v6620_v9 = vadd.f32 %v5013_v39, %v2476_v44  ;;  %v2419_v48 = vpop.f32.mrf.mxu1 }
 0x1d2   : > { %v2842_v55 = vpop.f32.mrf.mxu0  ;;  %v2478_v62 = vadd.f32 %v2419_v48, %v6527_v25 }
 0x1d3   : > { %v6623_v38 = vadd.f32 %v2842_v55, %v2474_v15  ;;  %v4980_v19 = vpop.f32.mrf.mxu1 }
 0x1d4   : > { %v5014_v30 = vpop.f32.mrf.mxu0  ;;  %v2481_v14 = vadd.f32 %v4980_v19, %v6530_v61 }
 0x1d5   : > { %v6626_v23 = vadd.f32 %v5014_v30, %v2477_v20  ;;  %v2422_v29 = vpop.f32.mrf.mxu1 }
 0x1d6   : > { %v2845_v40 = vpop.f32.mrf.mxu0  ;;  %v2479_v7 = vadd.f32 %v2422_v29, %v6533_v6  ;;  %v6659_v29 = vstv %s3729_s10 }
 0x1d7   : > { %v6629_v53 = vadd.f32 %v2845_v40, %v2475_v51  ;;  %v4983_v16 = vpop.f32.mrf.mxu1 }
 0x1d8   : > { %v5017_v21 = vpop.f32.mrf.mxu0  ;;  %v2484_v57 = vadd.f32 %v4983_v16, %v6536_v22 }
 0x1d9   : > { %v6632_v36 = vadd.f32 %v5017_v21, %v2480_v54  ;;  %v2435_v25 = vpop.f32.mrf.mxu1 }
 0x1da   : > { %v2858_v2 = vpop.f32.mrf.mxu0  ;;  %v2482_v37 = vadd.f32 %v2435_v25, %v6539_v24 }
 0x1db   : > { %v6635_v35 = vadd.f32 %v2858_v2, %v2478_v62  ;;  %v4984_v61 = vpop.f32.mrf.mxu1  ;;  %v6656_v62 = vld [vmem:[%s6972_s2] ss:$0 sm:$0xff] }
 0x1dc   : > { %v5018_v58 = vpop.f32.mrf.mxu0  ;;  %v2485_v63 = vadd.f32 %v4984_v61, %v6542_v45 }
 0x1dd   : > { %v6638_v44 = vadd.f32 %v5018_v58, %v2481_v14  ;;  %v2438_v6 = vpop.f32.mrf.mxu1 }
 0x1de   : > { %v2861_v8 = vpop.f32.mrf.mxu0  ;;  %v2483_v18 = vadd.f32 %v2438_v6, %v6545_v34 }
 0x1df   : > { %v6641_v15 = vadd.f32 %v2861_v8, %v2479_v7  ;;  %v5027_v22 = vpop.f32.mrf.mxu1 }
 0x1e0   : > { %v5021_v4 = vpop.f32.mrf.mxu0  ;;  %v3338_v54 = vadd.f32 %v5027_v22, %v6548_v56 }
 0x1e1   : > { %v6644_v20 = vadd.f32 %v5021_v4, %v2484_v57  ;;  %v3193_v24 = vpop.f32.mrf.mxu1 }
 0x1e2   : > { %v2874_v0 = vpop.f32.mrf.mxu0  ;;  %v3336_v19 = vadd.f32 %v3193_v24, %v6551_v33 }
 0x1e3   : > { %v6646_v39 = vadd.f32 %v2874_v0, %v2482_v37  ;;  %v5028_v55 = vpop.f32.mrf.mxu1 }
 0x1e4   : > { %v5022_v51 = vpop.f32.mrf.mxu0  ;;  %v3339_v16 = vadd.f32 %v5028_v55, %v6554_v17 }
 0x1e5   : > { %v6648_v59 = vadd.f32 %v5022_v51, %v2485_v63  ;;  %v3196_v30 = vpop.f32.mrf.mxu1 }
 0x1e6   : > { %v2877_v45 = vpop.f32.mrf.mxu0  ;;  %v3337_v33 = vadd.f32 %v3196_v30, %v6557_v12 }
 0x1e7   : > { %v6651_v48 = vadd.f32 %v2877_v45, %v2483_v18  ;;  %v5031_v14 = vpop.f32.mrf.mxu1 }
 0x1e8   : > { %v5065_v34 = vpop.f32.mrf.mxu0  ;;  %v3342_v63 = vadd.f32 %v5031_v14, %v6560_v27 }
 0x1e9   : > { %v3652_v40 = vadd.f32 %v5065_v34, %v3338_v54  ;;  %v3209_v2 = vpop.f32.mrf.mxu1 }
 0x1ea   : > { %v3507_v21 = vpop.f32.mrf.mxu0  ;;  %v3340_v51 = vadd.f32 %v3209_v2, %v6563_v5 }
 0x1eb   : > { %v3695_v7 = vadd.f32 %v6656_v62, %v3652_v40  ;;  %v3650_v56 = vadd.f32 %v3507_v21, %v3336_v19  ;;  %v5032_v37 = vpop.f32.mrf.mxu1 }
 0x1ec   : > { %v5066_v57 = vpop.f32.mrf.mxu0  ;;  %v3343_v5 = vadd.f32 %v5032_v37, %v6566_v60 }
 0x1ed   : > { %vm3732_vm8 = vcmp.ge.f32.partialorder %v3695_v7, 0.0  ;;  %v3769_v25 = vmul.f32 %v6659_v29, %v3695_v7  ;;  %v3693_v58 = vadd.f32 %v6656_v62, %v3650_v56  ;;  %v3653_v61 = vadd.f32 %v5066_v57, %v3339_v16  ;;  %v3212_v22 = vpop.f32.mrf.mxu1 }
 0x1ee   : > { %v3510_v8 = vpop.f32.mrf.mxu0 }
 0x1ef   : > { %v3805_v6 = vsel %vm3732_vm8, %v3695_v7, %v3769_v25  ;;  %vm3730_vm9 = vcmp.ge.f32.partialorder %v3693_v58, 0.0  ;;  %v3767_v17 = vmul.f32 %v6659_v29, %v3693_v58  ;;  %v3696_v18 = vadd.f32 %v6656_v62, %v3653_v61  ;;  %v5035_v27 = vpop.f32.mrf.mxu1  ;;  %vm6716_vm8 = vmor %vm3915_vm14, %vm3916_vm15 }
 0x1f0   : > { %v4551_v4 = vpack.c.bf16 %v3805_v6, %v3805_v6  ;;  %v3651_v0 = vadd.f32 %v3510_v8, %v3337_v33  ;;  %v5069_v24 = vpop.f32.mrf.mxu0  ;;  %v3341_v7 = vadd.f32 %v3212_v22, %v6569_v31  ;;  %v3346_v60 = vadd.f32 %v5035_v27, %v6572_v46 }
 0x1f1   : > { %v3803_v12 = vsel %vm3730_vm9, %v3693_v58, %v3767_v17  ;;  %v3656_v55 = vadd.f32 %v5069_v24, %v3342_v63  ;;  %vm3733_vm11 = vcmp.ge.f32.partialorder %v3696_v18, 0.0  ;;  %v3770_v54 = vmul.f32 %v6659_v29, %v3696_v18  ;;  %v3225_v56 = vpop.f32.mrf.mxu1 }
 0x1f2   : > { %v4549_v45 = vpack.c.bf16 %v3803_v12, %v3803_v12  ;;  %v3523_v30 = vpop.f32.mrf.mxu0  ;;  %v3694_v34 = vadd.f32 %v6656_v62, %v3651_v0  ;;  %v4471_v14 = vrot.slane %v4551_v4, 9  ;;  %v3344_v6 = vadd.f32 %v3225_v56, %v6575_v13 }
 0x1f3   : > { %v3699_v19 = vadd.f32 %v6656_v62, %v3656_v55  ;;  %v3654_v40 = vadd.f32 %v3523_v30, %v3340_v51  ;;  %v3806_v21 = vsel %vm3733_vm11, %v3696_v18, %v3770_v54  ;;  %v5036_v33 = vpop.f32.mrf.mxu1  ;;  %vm6724_vm11 = vmor %vm575_vm0, %vm3896_vm3 }
 0x1f4   : > { %3865 = vst.msk [vmem:[%s6676_s15] sm:$0xf] %vm3864_vm10, %v4549_v45  ;;  %v5070_v16 = vpop.f32.mrf.mxu0  ;;  %v4552_v2 = vpack.c.bf16 %v3806_v21, %v3806_v21  ;;  %vm3731_vm1 = vcmp.ge.f32.partialorder %v3694_v34, 0.0  ;;  %v3768_v57 = vmul.f32 %v6659_v29, %v3694_v34  ;;  %v3347_v12 = vadd.f32 %v5036_v33, %v6578_v28 }
 0x1f5   : > { %vm3736_vm2 = vcmp.ge.f32.partialorder %v3699_v19, 0.0  ;;  %v3773_v31 = vmul.f32 %v6659_v29, %v3699_v19  ;;  %v3697_v58 = vadd.f32 %v6656_v62, %v3654_v40  ;;  %v3657_v37 = vadd.f32 %v5070_v16, %v3343_v5  ;;  %v3228_v46 = vpop.f32.mrf.mxu1 }
 0x1f6   : > { %v3526_v61 = vpop.f32.mrf.mxu0  ;;  %v3880_v8 = vrot.slane %v4552_v2, 5  ;;  %v3804_v63 = vsel %vm3731_vm1, %v3694_v34, %v3768_v57 }
 0x1f7   : > { %v3655_v17 = vadd.f32 %v3526_v61, %v3341_v7  ;;  %v4550_v4 = vpack.c.bf16 %v3804_v63, %v3804_v63  ;;  %v3809_v18 = vsel %vm3736_vm2, %v3699_v19, %v3773_v31  ;;  %vm3734_vm5 = vcmp.ge.f32.partialorder %v3697_v58, 0.0  ;;  %v5039_v27 = vpop.f32.mrf.mxu1 }
 0x1f8   : > { %v3771_v22 = vmul.f32 %v6659_v29, %v3697_v58  ;;  %v5073_v0 = vpop.f32.mrf.mxu0  ;;  %v3881_v24 = vsel %vm6685_vm4, %v4471_v14, %v3880_v8  ;;  %v6696_v51 = vpack.c.bf16 %v3809_v18, %v3809_v18  ;;  %v3700_v55 = vadd.f32 %v6656_v62, %v3657_v37 }
 0x1f9   : > { %v3882_v45 = vrot.slane %v3880_v8, 4  ;;  %4472 = vst.msk [vmem:[%s6676_s15 + $0x8] sm:$0xf] %vm3864_vm10, %v3881_v24  ;;  %3866 = vst.msk [vmem:[%s6676_s15 + $0x4] sm:$0xf] %vm3864_vm10, %v4550_v4  ;;  %v3698_v54 = vadd.f32 %v6656_v62, %v3655_v17  ;;  %v3660_v30 = vadd.f32 %v5073_v0, %v3346_v60  ;;  %v3345_v14 = vadd.f32 %v3228_v46, %v6581_v42  ;;  %v3241_v7 = vpop.f32.mrf.mxu1 }
 0x1fa   : > { %v3807_v13 = vsel %vm3734_vm5, %v3697_v58, %v3771_v22  ;;  %v3539_v34 = vpop.f32.mrf.mxu0  ;;  %v3903_v19 = vrot.slane %v6696_v51, 6  ;;  %vm3737_vm6 = vcmp.ge.f32.partialorder %v3700_v55, 0.0  ;;  %v4481_v28 = vrot.slane %v6696_v51, 11 }
 0x1fb   : > { %v4553_v40 = vpack.c.bf16 %v3807_v13, %v3807_v13  ;;  %v3774_v5 = vmul.f32 %v6659_v29, %v3700_v55  ;;  %vm3735_vm7 = vcmp.ge.f32.partialorder %v3698_v54, 0.0  ;;  %v3772_v21 = vmul.f32 %v6659_v29, %v3698_v54  ;;  %v5040_v42 = vpop.f32.mrf.mxu1 }
 0x1fc   : > { %v5074_v56 = vpop.f32.mrf.mxu0  ;;  %v3350_v57 = vadd.f32 %v5039_v27, %v6584_v47  ;;  %v3703_v60 = vadd.f32 %v6656_v62, %v3660_v30  ;;  %v3658_v33 = vadd.f32 %v3539_v34, %v3344_v6  ;;  %v3348_v18 = vadd.f32 %v3241_v7, %v6587_v11 }
 0x1fd   : > { %v3883_v16 = vrot.slane %v4553_v40, 5  ;;  %v4476_v2 = vrot.slane %v4553_v40, 10  ;;  %v3810_v31 = vsel %vm3737_vm6, %v3700_v55, %v3774_v5  ;;  %v3808_v58 = vsel %vm3735_vm7, %v3698_v54, %v3772_v21  ;;  %v3244_v0 = vpop.f32.mrf.mxu1 }
 0x1fe   : > { %v3661_v37 = vadd.f32 %v5074_v56, %v3347_v12  ;;  %v3542_v61 = vpop.f32.mrf.mxu0  ;;  %v4556_v63 = vpack.c.bf16 %v3810_v31, %v3810_v31  ;;  %v4554_v4 = vpack.c.bf16 %v3808_v58, %v3808_v58  ;;  %vm3740_vm9 = vcmp.ge.f32.partialorder %v3703_v60, 0.0 }
 0x1ff   : > { %v3884_v8 = vsel %vm6685_vm4, %v3882_v45, %v3883_v16  ;;  %v3777_v6 = vmul.f32 %v6659_v29, %v3703_v60  ;;  %v3701_v22 = vadd.f32 %v6656_v62, %v3658_v33  ;;  %v3351_v55 = vadd.f32 %v5040_v42, %v6590_v1  ;;  %v5043_v11 = vpop.f32.mrf.mxu1 }
 0x200   : > { %4473 = vst.msk [vmem:[%s6676_s15 + $0xc] sm:$0xf] %vm3864_vm10, %v3884_v8  ;;  %v3704_v46 = vadd.f32 %v6656_v62, %v3661_v37  ;;  %v5077_v24 = vpop.f32.mrf.mxu0  ;;  %v3920_v51 = vrot.slane %v4556_v63, 7  ;;  %v3900_v12 = vrot.slane %v4554_v4, 6  ;;  %v3659_v45 = vadd.f32 %v3542_v61, %v3345_v14 }
 0x201   : > { %v3813_v13 = vsel %vm3740_vm9, %v3703_v60, %v3777_v6  ;;  %vm3738_vm0 = vcmp.ge.f32.partialorder %v3701_v22, 0.0  ;;  %v3775_v54 = vmul.f32 %v6659_v29, %v3701_v22  ;;  %v3349_v27 = vadd.f32 %v3244_v0, %v6593_v50  ;;  %v3257_v7 = vpop.f32.mrf.mxu1 }
 0x202   : > { %v3555_v30 = vpop.f32.mrf.mxu0  ;;  %v3921_v34 = vsel %vm6716_vm8, %v4481_v28, %v3920_v51  ;;  %v3901_v40 = vsel %vm6724_vm11, %v4476_v2, %v3900_v12  ;;  %v3902_v5 = vrot.slane %v3900_v12, 4  ;;  %vm3741_vm12 = vcmp.ge.f32.partialorder %v3704_v46, 0.0 }
 0x203   : > { %4482 = vst.msk [vmem:[%s6676_s15 + $0x18] sm:$0xf] %vm3864_vm10, %v3921_v34  ;;  %4477 = vst.msk [vmem:[%s6676_s15 + $0x10] sm:$0xf] %vm3864_vm10, %v3901_v40  ;;  %v4559_v1 = vpack.c.bf16 %v3813_v13, %v3813_v13  ;;  %v3811_v14 = vsel %vm3738_vm0, %v3701_v22, %v3775_v54  ;;  %v3778_v50 = vmul.f32 %v6659_v29, %v3704_v46  ;;  %v3922_v28 = vrot.slane %v3920_v51, 4  ;;  %v5044_v42 = vpop.f32.mrf.mxu1 }
 0x204   : > { %v3702_v21 = vadd.f32 %v6656_v62, %v3659_v45  ;;  %v5078_v56 = vpop.f32.mrf.mxu0  ;;  %v3904_v16 = vsel %vm6724_vm11, %v3902_v5, %v3903_v19  ;;  %v4557_v2 = vpack.c.bf16 %v3811_v14, %v3811_v14  ;;  %v3664_v60 = vadd.f32 %v5077_v24, %v3350_v57 }
 0x205   : > { %4478 = vst.msk [vmem:[%s6676_s15 + $0x14] sm:$0xf] %vm3864_vm10, %v3904_v16  ;;  %4487 = vst.msk [vmem:[%s6676_s15 + $0x24] sm:$0xf] %vm3864_vm10, %v4559_v1  ;;  %v3814_v31 = vsel %vm3741_vm12, %v3704_v46, %v3778_v50  ;;  %v3354_v33 = vadd.f32 %v5043_v11, %v6596_v41  ;;  %v3662_v19 = vadd.f32 %v3555_v30, %v3348_v18  ;;  %v3260_v22 = vpop.f32.mrf.mxu1 }
 0x206   : > { %vm3739_vm13 = vcmp.ge.f32.partialorder %v3702_v21, 0.0  ;;  %v3776_v58 = vmul.f32 %v6659_v29, %v3702_v21  ;;  %v3558_v37 = vpop.f32.mrf.mxu0  ;;  %v3923_v61 = vrot.slane %v4557_v2, 7  ;;  %v4560_v8 = vpack.c.bf16 %v3814_v31, %v3814_v31 }
 0x207   : > { %v3707_v63 = vadd.f32 %v6656_v62, %v3664_v60  ;;  %v3352_v57 = vadd.f32 %v3257_v7, %v6599_v52  ;;  %v3665_v6 = vadd.f32 %v5078_v56, %v3351_v55  ;;  %v3663_v46 = vadd.f32 %v3558_v37, %v3349_v27  ;;  %v5047_v45 = vpop.f32.mrf.mxu1 }
 0x208   : > { %v3812_v4 = vsel %vm3739_vm13, %v3702_v21, %v3776_v58  ;;  %v5081_v0 = vpop.f32.mrf.mxu0  ;;  %v3924_v24 = vsel %vm6716_vm8, %v3922_v28, %v3923_v61  ;;  %v6758_v51 = vadd.f32 %v5044_v42, %v6602_v49  ;;  %v4491_v12 = vrot.slane %v4560_v8, 9 }
 0x209   : > { %v4558_v41 = vpack.c.bf16 %v3812_v4, %v3812_v4  ;;  %vm3744_vm14 = vcmp.ge.f32.partialorder %v3707_v63, 0.0  ;;  %4483 = vst.msk [vmem:[%s6676_s15 + $0x1c] sm:$0xf] %vm3864_vm10, %v3924_v24  ;;  %v3781_v18 = vmul.f32 %v6659_v29, %v3707_v63  ;;  %v3705_v52 = vadd.f32 %v6656_v62, %v3662_v19  ;;  %v3273_v40 = vpop.f32.mrf.mxu1 }
 0x20a   : > { %v3708_v55 = vadd.f32 %v6656_v62, %v3665_v6  ;;  %v3571_v13 = vpop.f32.mrf.mxu0  ;;  %v3353_v54 = vadd.f32 %v3260_v22, %v6605_v26  ;;  %v3706_v27 = vadd.f32 %v6656_v62, %v3663_v46  ;;  %v3668_v11 = vadd.f32 %v5081_v0, %v3354_v33 }
 0x20b   : > { %4486 = vst.msk [vmem:[%s6676_s15 + $0x20] sm:$0xf] %vm3864_vm10, %v4558_v41  ;;  %v3666_v49 = vadd.f32 %v3571_v13, %v3352_v57  ;;  %v3817_v30 = vsel %vm3744_vm14, %v3707_v63, %v3781_v18  ;;  %vm3742_vm15 = vcmp.ge.f32.partialorder %v3705_v52, 0.0  ;;  %v3779_v34 = vmul.f32 %v6659_v29, %v3705_v52  ;;  %v5048_v28 = vpop.f32.mrf.mxu1 }
 0x20c   : > { %vm3745_vm1 = vcmp.ge.f32.partialorder %v3708_v55, 0.0  ;;  %v5082_v5 = vpop.f32.mrf.mxu0  ;;  %v4563_v1 = vpack.c.bf16 %v3817_v30, %v3817_v30  ;;  %v3782_v14 = vmul.f32 %v6659_v29, %v3708_v55  ;;  %vm3743_vm2 = vcmp.ge.f32.partialorder %v3706_v27, 0.0 }
 0x20d   : > { %v3780_v50 = vmul.f32 %v6659_v29, %v3706_v27  ;;  %v3815_v21 = vsel %vm3742_vm15, %v3705_v52, %v3779_v34  ;;  %v3358_v26 = vadd.f32 %v5047_v45, %v6608_v10  ;;  %v3711_v7 = vadd.f32 %v6656_v62, %v3668_v11  ;;  %v3276_v61 = vpop.f32.mrf.mxu1 }
 0x20e   : > { %v3709_v56 = vadd.f32 %v6656_v62, %v3666_v49  ;;  %v3574_v16 = vpop.f32.mrf.mxu0  ;;  %v3966_v2 = vrot.slane %v4563_v1, 6  ;;  %v4561_v60 = vpack.c.bf16 %v3815_v21, %v3815_v21  ;;  %v3818_v31 = vsel %vm3745_vm1, %v3708_v55, %v3782_v14 }
 0x20f   : > { %v3816_v58 = vsel %vm3743_vm2, %v3706_v27, %v3780_v50  ;;  %v4564_v33 = vpack.c.bf16 %v3818_v31, %v3818_v31  ;;  %vm3748_vm3 = vcmp.ge.f32.partialorder %v3711_v7, 0.0  ;;  %v3785_v37 = vmul.f32 %v6659_v29, %v3711_v7  ;;  %v5051_v46 = vpop.f32.mrf.mxu1 }
 0x210   : > { %v4562_v42 = vpack.c.bf16 %v3816_v58, %v3816_v58  ;;  %v5085_v8 = vpop.f32.mrf.mxu0  ;;  %v3949_v63 = vrot.slane %v4561_v60, 5  ;;  %v3356_v10 = vadd.f32 %v3273_v40, %v6611_v3  ;;  %vm3746_vm5 = vcmp.ge.f32.partialorder %v3709_v56, 0.0 }
 0x211   : > { %v3783_v19 = vmul.f32 %v6659_v29, %v3709_v56  ;;  %v3968_v4 = vrot.slane %v3966_v2, 4  ;;  %v3969_v57 = vrot.slane %v4564_v33, 6  ;;  %v3821_v18 = vsel %vm3748_vm3, %v3711_v7, %v3785_v37  ;;  %v3289_v27 = vpop.f32.mrf.mxu1 }
 0x212   : > { %v3952_v6 = vrot.slane %v4562_v42, 5  ;;  %v4496_v22 = vrot.slane %v4562_v42, 10  ;;  %v3587_v0 = vpop.f32.mrf.mxu0  ;;  %v3950_v24 = vsel %vm6685_vm4, %v4491_v12, %v3949_v63  ;;  %v3951_v41 = vrot.slane %v3949_v63, 4 }
 0x213   : > { %v3819_v3 = vsel %vm3746_vm5, %v3709_v56, %v3783_v19  ;;  %4492 = vst.msk [vmem:[%s6676_s15 + $0x28] sm:$0xf] %vm3864_vm10, %v3950_v24  ;;  %v3970_v52 = vsel %vm6724_vm11, %v3968_v4, %v3969_v57  ;;  %v4567_v45 = vpack.c.bf16 %v3821_v18, %v3821_v18  ;;  %v4501_v12 = vrot.slane %v4564_v33, 11  ;;  %v5052_v21 = vpop.f32.mrf.mxu1 }
 0x214   : > { %v3967_v55 = vsel %vm6724_vm11, %v4496_v22, %v3966_v2  ;;  %v4565_v13 = vpack.c.bf16 %v3819_v3, %v3819_v3  ;;  %v5086_v11 = vpop.f32.mrf.mxu0  ;;  %4498 = vst.msk [vmem:[%s6676_s15 + $0x34] sm:$0xf] %vm3864_vm10, %v3970_v52  ;;  %v3953_v49 = vsel %vm6685_vm4, %v3951_v41, %v3952_v6  ;;  %v3359_v30 = vadd.f32 %v5048_v28, %v6614_v43 }
 0x215   : > { %4497 = vst.msk [vmem:[%s6676_s15 + $0x30] sm:$0xf] %vm3864_vm10, %v3967_v55  ;;  %v3669_v34 = vadd.f32 %v5082_v5, %v6758_v51  ;;  %4493 = vst.msk [vmem:[%s6676_s15 + $0x2c] sm:$0xf] %vm3864_vm10, %v3953_v49  ;;  %v3357_v1 = vadd.f32 %v3276_v61, %v6617_v32  ;;  %v3667_v14 = vadd.f32 %v3574_v16, %v3353_v54  ;;  %v3292_v54 = vpop.f32.mrf.mxu1 }
 0x216   : > { %4506 = vst.msk [vmem:[%s6676_s15 + $0x40] sm:$0xf] %vm3864_vm10, %v4567_v45  ;;  %v3983_v40 = vrot.slane %v4565_v13, 7  ;;  %v3672_v50 = vadd.f32 %v5085_v8, %v3358_v26  ;;  %v3590_v7 = vpop.f32.mrf.mxu0  ;;  %v3362_v2 = vadd.f32 %v5051_v46, %v6620_v9  ;;  %v3360_v43 = vadd.f32 %v3289_v27, %v6623_v38 }
 0x217   : > { %v3712_v56 = vadd.f32 %v6656_v62, %v3669_v34  ;;  %v3670_v28 = vadd.f32 %v3587_v0, %v3356_v10  ;;  %v3710_v5 = vadd.f32 %v6656_v62, %v3667_v14  ;;  %v3363_v32 = vadd.f32 %v5052_v21, %v6626_v23  ;;  %v5055_v33 = vpop.f32.mrf.mxu1 }
 0x218   : > { %v3984_v51 = vsel %vm6716_vm8, %v4501_v12, %v3983_v40  ;;  %v3715_v60 = vadd.f32 %v6656_v62, %v3672_v50  ;;  %v5089_v26 = vpop.f32.mrf.mxu0  ;;  %v3673_v38 = vadd.f32 %v5086_v11, %v3359_v30  ;;  %v3985_v8 = vrot.slane %v3983_v40, 4 }
 0x219   : > { %4502 = vst.msk [vmem:[%s6676_s15 + $0x38] sm:$0xf] %vm3864_vm10, %v3984_v51  ;;  %vm3749_vm6 = vcmp.ge.f32.partialorder %v3712_v56, 0.0  ;;  %v3786_v16 = vmul.f32 %v6659_v29, %v3712_v56  ;;  %v3713_v9 = vadd.f32 %v6656_v62, %v3670_v28  ;;  %vm3747_vm7 = vcmp.ge.f32.partialorder %v3710_v5, 0.0  ;;  %v3305_v4 = vpop.f32.mrf.mxu1 }
 0x21a   : > { %v3784_v31 = vmul.f32 %v6659_v29, %v3710_v5  ;;  %vm3752_vm9 = vcmp.ge.f32.partialorder %v3715_v60, 0.0  ;;  %v3789_v58 = vmul.f32 %v6659_v29, %v3715_v60  ;;  %v3603_v42 = vpop.f32.mrf.mxu0  ;;  %v3716_v61 = vadd.f32 %v6656_v62, %v3673_v38 }
 0x21b   : > { %v3822_v23 = vsel %vm3749_vm6, %v3712_v56, %v3786_v16  ;;  %vm3750_vm0 = vcmp.ge.f32.partialorder %v3713_v9, 0.0  ;;  %v3787_v37 = vmul.f32 %v6659_v29, %v3713_v9  ;;  %v3361_v41 = vadd.f32 %v3292_v54, %v6629_v53  ;;  %v5056_v3 = vpop.f32.mrf.mxu1 }
 0x21c   : > { %v4568_v63 = vpack.c.bf16 %v3822_v23, %v3822_v23  ;;  %v3820_v10 = vsel %vm3747_vm7, %v3710_v5, %v3784_v31  ;;  %v3825_v19 = vsel %vm3752_vm9, %v3715_v60, %v3789_v58  ;;  %v5090_v57 = vpop.f32.mrf.mxu0  ;;  %vm3753_vm12 = vcmp.ge.f32.partialorder %v3716_v61, 0.0 }
 0x21d   : > { %v4566_v6 = vpack.c.bf16 %v3820_v10, %v3820_v10  ;;  %v6816_v22 = vpack.c.bf16 %v3825_v19, %v3825_v19  ;;  %v3823_v46 = vsel %vm3750_vm0, %v3713_v9, %v3787_v37  ;;  %v3790_v24 = vmul.f32 %v6659_v29, %v3716_v61  ;;  %v3308_v34 = vpop.f32.mrf.mxu1 }
 0x21e   : > { %4507 = vst.msk [vmem:[%s6676_s15 + $0x44] sm:$0xf] %vm3864_vm10, %v4568_v63  ;;  %v4569_v0 = vpack.c.bf16 %v3823_v46, %v3823_v46  ;;  %v3671_v18 = vadd.f32 %v3590_v7, %v3357_v1  ;;  %v3606_v52 = vpop.f32.mrf.mxu0  ;;  %v3366_v13 = vadd.f32 %v5055_v33, %v6632_v36  ;;  %v3676_v27 = vadd.f32 %v5089_v26, %v3362_v2 }
 0x21f   : > { %v3986_v55 = vrot.slane %v4566_v6, 7  ;;  %v4016_v45 = vrot.slane %v6816_v22, 5  ;;  %v4516_v11 = vrot.slane %v6816_v22, 10  ;;  %v3826_v49 = vsel %vm3753_vm12, %v3716_v61, %v3790_v24  ;;  %v5059_v56 = vpop.f32.mrf.mxu1 }
 0x220   : > { %v4511_v12 = vrot.slane %v4569_v0, 9  ;;  %v3714_v30 = vadd.f32 %v6656_v62, %v3671_v18  ;;  %v5093_v40 = vpop.f32.mrf.mxu0  ;;  %v4572_v1 = vpack.c.bf16 %v3826_v49, %v3826_v49  ;;  %v3719_v14 = vadd.f32 %v6656_v62, %v3676_v27 }
 0x221   : > { %v3987_v53 = vsel %vm6716_vm8, %v3985_v8, %v3986_v55  ;;  %v3674_v50 = vadd.f32 %v3603_v42, %v3360_v43  ;;  %v3364_v21 = vadd.f32 %v3305_v4, %v6635_v35  ;;  %v3677_v7 = vadd.f32 %v5090_v57, %v3363_v32 }
 0x222   : > { %4503 = vst.msk [vmem:[%s6676_s15 + $0x3c] sm:$0xf] %vm3864_vm10, %v3987_v53  ;;  %vm3751_vm13 = vcmp.ge.f32.partialorder %v3714_v30, 0.0  ;;  %v3788_v36 = vmul.f32 %v6659_v29, %v3714_v30  ;;  %v3619_v2 = vpop.f32.mrf.mxu0  ;;  %v4030_v28 = vrot.slane %v4572_v1, 6  ;;  %vm3756_vm14 = vcmp.ge.f32.partialorder %v3719_v14, 0.0 }
 0x223   : > { %v3793_v51 = vmul.f32 %v6659_v29, %v3719_v14  ;;  %v3717_v5 = vadd.f32 %v6656_v62, %v3674_v50  ;;  %v3367_v43 = vadd.f32 %v5056_v3, %v6638_v44  ;;  %v3720_v54 = vadd.f32 %v6656_v62, %v3677_v7  ;;  %v3321_v44 = vpop.f32.mrf.mxu1 }
 0x224   : > { %v3824_v60 = vsel %vm3751_vm13, %v3714_v30, %v3788_v36  ;;  %v3675_v26 = vadd.f32 %v3606_v52, %v3361_v41  ;;  %v5094_v16 = vpop.f32.mrf.mxu0  ;;  %v4031_v35 = vsel %vm6724_vm11, %v4516_v11, %v4030_v28  ;;  %v3365_v38 = vadd.f32 %v3308_v34, %v6641_v15 }
 0x225   : > { %v4570_v32 = vpack.c.bf16 %v3824_v60, %v3824_v60  ;;  %v3829_v9 = vsel %vm3756_vm14, %v3719_v14, %v3793_v51  ;;  %4517 = vst.msk [vmem:[%s6676_s15 + $0x50] sm:$0xf] %vm3864_vm10, %v4031_v35  ;;  %vm3754_vm15 = vcmp.ge.f32.partialorder %v3717_v5, 0.0  ;;  %v3791_v58 = vmul.f32 %v6659_v29, %v3717_v5  ;;  %v5060_v41 = vpop.f32.mrf.mxu1 }
 0x226   : > { %v4575_v31 = vpack.c.bf16 %v3829_v9, %v3829_v9  ;;  %vm3757_vm1 = vcmp.ge.f32.partialorder %v3720_v54, 0.0  ;;  %v3622_v33 = vpop.f32.mrf.mxu0  ;;  %v4032_v42 = vrot.slane %v4030_v28, 4  ;;  %v3794_v37 = vmul.f32 %v6659_v29, %v3720_v54 }
 0x227   : > { %v4013_v23 = vrot.slane %v4570_v32, 5  ;;  %v3718_v61 = vadd.f32 %v6656_v62, %v3675_v26  ;;  %v3827_v63 = vsel %vm3754_vm15, %v3717_v5, %v3791_v58  ;;  %v3370_v15 = vadd.f32 %v5059_v56, %v6644_v20 }
 0x228   : > { %v4050_v8 = vrot.slane %v4575_v31, 7  ;;  %v3680_v10 = vadd.f32 %v5093_v40, %v3366_v13  ;;  %v5097_v19 = vpop.f32.mrf.mxu0  ;;  %v4573_v6 = vpack.c.bf16 %v3827_v63, %v3827_v63  ;;  %v3830_v22 = vsel %vm3757_vm1, %v3720_v54, %v3794_v37  ;;  %v3324_v40 = vpop.f32.mrf.mxu1 }
 0x229   : > { %v4014_v4 = vsel %vm6685_vm4, %v4511_v12, %v4013_v23  ;;  %v4015_v57 = vrot.slane %v4013_v23, 4  ;;  %v4576_v46 = vpack.c.bf16 %v3830_v22, %v3830_v22  ;;  %vm3755_vm2 = vcmp.ge.f32.partialorder %v3718_v61, 0.0 }
 0x22a   : > { %4512 = vst.msk [vmem:[%s6676_s15 + $0x48] sm:$0xf] %vm3864_vm10, %v4014_v4  ;;  %v3792_v0 = vmul.f32 %v6659_v29, %v3718_v61  ;;  %v3723_v24 = vadd.f32 %v6656_v62, %v3680_v10  ;;  %v3635_v20 = vpop.f32.mrf.mxu0  ;;  %v4033_v3 = vrot.slane %v4573_v6, 6  ;;  %v3368_v52 = vadd.f32 %v3321_v44, %v6646_v39 }
 0x22b   : > { %v4017_v18 = vsel %vm6685_vm4, %v4015_v57, %v4016_v45  ;;  %v3678_v55 = vadd.f32 %v3619_v2, %v3364_v21  ;;  %v4521_v13 = vrot.slane %v4573_v6, 11  ;;  %4526 = vst.msk [vmem:[%s6676_s15 + $0x60] sm:$0xf] %vm3864_vm10, %v4576_v46  ;;  %v3681_v45 = vadd.f32 %v5094_v16, %v3367_v43 }
 0x22c   : > { %4513 = vst.msk [vmem:[%s6676_s15 + $0x4c] sm:$0xf] %vm3864_vm10, %v4017_v18  ;;  %v3828_v27 = vsel %vm3755_vm2, %v3718_v61, %v3792_v0  ;;  %vm3760_vm3 = vcmp.ge.f32.partialorder %v3723_v24, 0.0  ;;  %v3797_v11 = vmul.f32 %v6659_v29, %v3723_v24  ;;  %v4034_v12 = vsel %vm6724_vm11, %v4032_v42, %v4033_v3  ;;  %v5098_v14 = vpop.f32.mrf.mxu0 }
 0x22d   : > { %v4574_v49 = vpack.c.bf16 %v3828_v27, %v3828_v27  ;;  %v3721_v30 = vadd.f32 %v6656_v62, %v3678_v55  ;;  %4518 = vst.msk [vmem:[%s6676_s15 + $0x54] sm:$0xf] %vm3864_vm10, %v4034_v12  ;;  %v3371_v34 = vadd.f32 %v5060_v41, %v6648_v59  ;;  %v3679_v53 = vadd.f32 %v3622_v33, %v3365_v38 }
 0x22e   : > { %v3833_v39 = vsel %vm3760_vm3, %v3723_v24, %v3797_v11  ;;  %v3684_v1 = vadd.f32 %v5097_v19, %v3370_v15  ;;  %v3724_v7 = vadd.f32 %v6656_v62, %v3681_v45  ;;  %v3682_v28 = vadd.f32 %v3635_v20, %v3368_v52  ;;  %v3638_v26 = vpop.f32.mrf.mxu0 }
 0x22f   : > { %v4047_v50 = vrot.slane %v4574_v49, 7  ;;  %v4579_v36 = vpack.c.bf16 %v3833_v39, %v3833_v39  ;;  %vm3758_vm5 = vcmp.ge.f32.partialorder %v3721_v30, 0.0  ;;  %v3795_v21 = vmul.f32 %v6659_v29, %v3721_v30 }
 0x230   : > { %v3722_v56 = vadd.f32 %v6656_v62, %v3679_v53  ;;  %v3727_v2 = vadd.f32 %v6656_v62, %v3684_v1  ;;  %v3369_v60 = vadd.f32 %v3324_v40, %v6651_v48  ;;  %vm3761_vm6 = vcmp.ge.f32.partialorder %v3724_v7, 0.0 }
 0x231   : > { %v4048_v59 = vsel %vm6716_vm8, %v4521_v13, %v4047_v50  ;;  %v4049_v51 = vrot.slane %v4047_v50, 4  ;;  %v3831_v5 = vsel %vm3758_vm5, %v3721_v30, %v3795_v21  ;;  %v3798_v54 = vmul.f32 %v6659_v29, %v3724_v7 }
 0x232   : > { %4522 = vst.msk [vmem:[%s6676_s15 + $0x58] sm:$0xf] %vm3864_vm10, %v4048_v59  ;;  %v4577_v43 = vpack.c.bf16 %v3831_v5, %v3831_v5  ;;  %vm3759_vm7 = vcmp.ge.f32.partialorder %v3722_v56, 0.0  ;;  %v4076_v35 = vrot.slane %v4579_v36, 5  ;;  %v3796_v32 = vmul.f32 %v6659_v29, %v3722_v56 }
 0x233   : > { %v4051_v16 = vsel %vm6716_vm8, %v4049_v51, %v4050_v8  ;;  %vm3764_vm9 = vcmp.ge.f32.partialorder %v3727_v2, 0.0  ;;  %v3834_v48 = vsel %vm3761_vm6, %v3724_v7, %v3798_v54  ;;  %v3801_v9 = vmul.f32 %v6659_v29, %v3727_v2 }
 0x234   : > { %4523 = vst.msk [vmem:[%s6676_s15 + $0x5c] sm:$0xf] %vm3864_vm10, %v4051_v16  ;;  %4527 = vst.msk [vmem:[%s6676_s15 + $0x64] sm:$0xf] %vm3864_vm10, %v4577_v43  ;;  %v3725_v38 = vadd.f32 %v6656_v62, %v3682_v28  ;;  %v3685_v31 = vadd.f32 %v5098_v14, %v3371_v34  ;;  %v4580_v58 = vpack.c.bf16 %v3834_v48, %v3834_v48  ;;  %v4078_v61 = vrot.slane %v4076_v35, 4 }
 0x235   : > { %v3832_v44 = vsel %vm3759_vm7, %v3722_v56, %v3796_v32  ;;  %v3683_v33 = vadd.f32 %v3638_v26, %v3369_v60  ;;  %v3837_v23 = vsel %vm3764_vm9, %v3727_v2, %v3801_v9 }
 0x236   : > { %v4578_v42 = vpack.c.bf16 %v3832_v44, %v3832_v44  ;;  %vm3762_vm0 = vcmp.ge.f32.partialorder %v3725_v38, 0.0  ;;  %v3799_v37 = vmul.f32 %v6659_v29, %v3725_v38  ;;  %v4079_v8 = vrot.slane %v4580_v58, 5 }
 0x237   : > { %v4583_v63 = vpack.c.bf16 %v3837_v23, %v3837_v23  ;;  %v3728_v15 = vadd.f32 %v6656_v62, %v3685_v31  ;;  %v3726_v4 = vadd.f32 %v6656_v62, %v3683_v33  ;;  %v4536_v41 = vrot.slane %v4580_v58, 10 }
 0x238   : > { %v4531_v10 = vrot.slane %v4578_v42, 9  ;;  %v3835_v19 = vsel %vm3762_vm0, %v3725_v38, %v3799_v37  ;;  %v4080_v57 = vsel %vm6685_vm4, %v4078_v61, %v4079_v8 }
 0x239   : > { %v4110_v6 = vrot.slane %v4583_v63, 7  ;;  %v4581_v22 = vpack.c.bf16 %v3835_v19, %v3835_v19  ;;  %vm3765_vm12 = vcmp.ge.f32.partialorder %v3728_v15, 0.0  ;;  %4533 = vst.msk [vmem:[%s6676_s15 + $0x6c] sm:$0xf] %vm3864_vm10, %v4080_v57  ;;  %v3802_v0 = vmul.f32 %v6659_v29, %v3728_v15 }
 0x23a   : > { %v4077_v46 = vsel %vm6685_vm4, %v4531_v10, %v4076_v35  ;;  %vm3763_vm13 = vcmp.ge.f32.partialorder %v3726_v4, 0.0  ;;  %v3800_v24 = vmul.f32 %v6659_v29, %v3726_v4 }
 0x23b   : > { %4532 = vst.msk [vmem:[%s6676_s15 + $0x68] sm:$0xf] %vm3864_vm10, %v4077_v46  ;;  %v4093_v62 = vrot.slane %v4581_v22, 6  ;;  %v3838_v20 = vsel %vm3765_vm12, %v3728_v15, %v3802_v0  ;;  %v4112_v55 = vrot.slane %v4110_v6, 4 }
 0x23c   : > { %v3836_v18 = vsel %vm3763_vm13, %v3726_v4, %v3800_v24  ;;  %v4584_v3 = vpack.c.bf16 %v3838_v20, %v3838_v20 }
 0x23d   : > { %v4094_v25 = vsel %vm6724_vm11, %v4536_v41, %v4093_v62  ;;  %v4582_v52 = vpack.c.bf16 %v3836_v18, %v3836_v18  ;;  %v4095_v29 = vrot.slane %v4093_v62, 4 }
 0x23e   : > { %4537 = vst.msk [vmem:[%s6676_s15 + $0x70] sm:$0xf] %vm3864_vm10, %v4094_v25  ;;  %v4113_v13 = vrot.slane %v4584_v3, 7 }
 0x23f   : > { %v4096_v27 = vrot.slane %v4582_v52, 6  ;;  %v4541_v11 = vrot.slane %v4582_v52, 11 }
 0x240   : > { %v4114_v12 = vsel %vm6716_vm8, %v4112_v55, %v4113_v13 }
 0x241   : > { %v4097_v49 = vsel %vm6724_vm11, %v4095_v29, %v4096_v27  ;;  %v4111_v30 = vsel %vm6716_vm8, %v4541_v11, %v4110_v6  ;;  %4543 = vst.msk [vmem:[%s6676_s15 + $0x7c] sm:$0xf] %vm3864_vm10, %v4114_v12 }
 0x242   : > { %4538 = vst.msk [vmem:[%s6676_s15 + $0x74] sm:$0xf] %vm3864_vm10, %v4097_v49  ;;  %4542 = vst.msk [vmem:[%s6676_s15 + $0x78] sm:$0xf] %vm3864_vm10, %v4111_v30 }
 0x243   : > { %5244 = shalt.err (!%p5241_p5)
}
 0x244   : > { %s5245_s8 = scalar_lea.hbm %s6907_s25, 2048  ;;  %s5249_s11 = scalar_lea.hbm %s6974_s4, 4096 }
 0x245   : > { %p5246_p6 = scmp.ne.s32.totalorder %s6907_s25, %s5245_s8  ;;  %p5250_p10 = scmp.lt.s32.totalorder %s6907_s25, %s6974_s4 }
 0x246   : > { %p5251_p11 = scmp.lt.s32.totalorder %s5249_s11, %s5245_s8 }
 0x247   : > { %p5247_p7 = pnand %p5246_p6, %p5380_p4 }
 0x248   : > { %p5252_p12 = por %p5251_p11, %p5250_p10 }
 0x249   : > { %p5248_p9 = pneg %p5247_p7 }
 0x24b   : > { %p5253_p13 = pnand %p5252_p12, %p5248_p9 }
 0x24d   : > { %5256 = shalt.err (!%p5253_p13)
}
 0x24e   : > { %s5310_s14 = smov 64   ;;  %s5311_s15 = smov 4  }
 0x24f   : > { %5112 = dma.vmem_to_hbm [thread:$0]  (%p5380_p4), %s6909_s3, 2048, %s6907_s25, %s6925_s27, %s5310_s14, %s5310_s14, %s5311_s15  }
 0x250 PF: > { %p5118_p0 = scmp.ge.s32.totalorder %s5307_s22, 2  ;;  %s4149_s16 = sand.u32 1, %s5287_s17  }
 0x251   : > { %s4150_s23 = scalar_lea.sflag [#allocation5], %s4149_s16 }
 0x252   : > { %p5115_p1 = pnand %p5118_p0, %p5387_p8 }
 0x254   : > { %p5116_p2 = pneg %p5115_p1 }
 0x256   : > { %5282 = dma.done.wait (%p5116_p2), %s4150_s23, 2048  }
 0x257   : > { %5284 = vsyncadd (%p5116_p2), %s4150_s23, 4294965248  ;;  %s18_s22 = sadd.s32 1, %s5307_s22   ;;  %s7021_s17 = smov %s5291_s18 }
 0x258   : > { %p15_p3 = scmp.ge.s32.totalorder %s18_s22, 4   ;;  %s7022_s18 = smov %s5295_s19 }
 0x259   : > { %s7023_s19 = smov %s5393_s29  ;;  %s7024_s20 = smov %s5303_s21 }
 0x25a   : > { %s7025_s21 = smov %s7027_s24  ;;  %17 = sbr.rel (!%p15_p3) target bundleno = 6 (0x6), region = 97 }
 0x25f   :  { %4155 = vsyncpa [#allocation5], 1 }
 0x260   :  { %4157 = vsyncpa [#allocation5 + $0x1], 1 }

</bundles_post_ra>
